<compile_context>
chip_gen: v7x
topology: tpu7x:2x2x1
jax: 0.10.0
libtpu: 0.0.40
codegen_flags: <defaults>
</compile_context>

<pallas_src>
import jax
import jax.numpy as jnp
from jax.experimental import pallas as pl
from jax.experimental.pallas import tpu as pltpu


_LANE = 128


def _round_up(x, m):
    return ((x + m - 1) // m) * m


def _cdiv(a, b):
    return (a + b - 1) // b


# ------------------------------ fused kernel --------------------------------

def _make_block_kernel(k, Ho, Wo, Cin, Cout_p, Gk, GCin, sc_off):
    """Whole residual block for one image: conv1+bn1+relu, shortcut,
    conv2+bn2, +residual, relu.  All indices are static (small unrolled loops).
    """
    M = Ho * Wo

    def kernel(xg_ref, w1_ref, b1_ref, w2_ref, b2_ref, wsc_ref, bsc_ref,
               o_ref, slab1_ref, y1_ref, y1p_ref, slab2_ref):
        # ---- conv1: in-VMEM im2col of the (single) halo block ----
        # slab1[ho*Wo + wo, t*GCin + c] = xg[tap-group t shifted window]
        for ho in range(Ho):
            r0 = ho * Wo
            for gy in range(Gk):
                for gx in range(Gk):
                    t = gy * Gk + gx
                    slab1_ref[r0:r0 + Wo, t * GCin:(t + 1) * GCin] = \
                        xg_ref[gy + ho, gx:gx + Wo, :]

        # one merged-tap MXU contraction: (M, Gk*Gk*GCin) x (.., Cout_p)
        acc1 = jnp.dot(slab1_ref[...], w1_ref[...],
                       preferred_element_type=jnp.float32)
        y1_ref[...] = jnp.maximum(acc1 + b1_ref[...], 0.0).astype(y1_ref.dtype)

        # ---- shortcut: 1x1 conv (+BN) or identity, as a matmul on a column
        # slice of the already-built slab (no extra activation reads) ----
        sc = jnp.dot(slab1_ref[:, sc_off:sc_off + Cin], wsc_ref[...],
                     preferred_element_type=jnp.float32) + bsc_ref[...]

        # ---- stage y1 into a zero-padded VMEM buffer (conv2 has pad=1) ----
        y1p_ref[...] = jnp.zeros_like(y1p_ref)
        for ho in range(Ho):
            y1p_ref[1 + ho, 1:1 + Wo, :] = y1_ref[ho * Wo:(ho + 1) * Wo, :]

        # ---- conv2: in-VMEM im2col + single merged-tap matmul (K = 9*Cout_p)
        for ho in range(Ho):
            r0 = ho * Wo
            for dy in range(k):
                for dx in range(k):
                    t = dy * k + dx
                    slab2_ref[r0:r0 + Wo, t * Cout_p:(t + 1) * Cout_p] = \
                        y1p_ref[ho + dy, dx:dx + Wo, :]
        acc2 = jnp.dot(slab2_ref[...], w2_ref[...],
                       preferred_element_type=jnp.float32) + b2_ref[...]

        # ---- bn2 + residual add + final ReLU (f32 epilogue) ----
        o_ref[...] = jnp.maximum(acc2 + sc, 0.0).astype(o_ref.dtype)

    return kernel


# ------------------------------ block forward -------------------------------

def residual_block_forward(x_nchw, params, stride, eps=1e-5):
    N, Cin, H, W = x_nchw.shape
    Cout = params["conv1_w"].shape[0]
    out_dtype = x_nchw.dtype
    k, s, pad = 3, stride, 1

    Ho = (H + 2 * pad - k) // s + 1
    Wo = (W + 2 * pad - k) // s + 1
    M = Ho * Wo
    Cout_p = _round_up(Cout, _LANE)
    Gk = _cdiv(k, s)                      # tap groups per spatial axis
    GCin = s * s * Cin                    # channels per stride-group
    HoG = Ho + Gk - 1
    WoG = Wo + Gk - 1
    HpG = max(HoG * s, _round_up(H + 2 * pad, s))
    WpG = max(WoG * s, _round_up(W + 2 * pad, s))
    HoG_, WoG_ = HpG // s, WpG // s

    # ---- activation prep: NCHW->NHWC, zero pad, fold stride phases into the
    # channel dim (so the kernel never needs strided VMEM loads), cast bf16 ----
    x = jnp.transpose(x_nchw, (0, 2, 3, 1))
    xp = jnp.pad(x, ((0, 0), (pad, HpG - H - pad), (pad, WpG - W - pad), (0, 0)))
    xg = xp.reshape(N, HoG_, s, WoG_, s, Cin)
    xg = jnp.transpose(xg, (0, 1, 3, 2, 4, 5)).reshape(N * HoG_, WoG_, GCin)
    xg = xg.astype(jnp.bfloat16)

    # ---- fold eval-mode BN into conv weights; build merged-tap matrices ----
    def fold(w_oihw, bn):
        gamma, beta, mean, var = bn
        scale = gamma * jax.lax.rsqrt(var + eps)
        return jnp.transpose(w_oihw, (2, 3, 1, 0)) * scale, beta - mean * scale

    w1_t, b1 = fold(params["conv1_w"], params["bn1"])   # (3,3,Cin,Cout)
    w2_t, b2 = fold(params["conv2_w"], params["bn2"])   # (3,3,Cout,Cout)

    # conv1 weight rows ordered (gy, gx, ph, pw, cin) to match the slab layout.
    K1 = Gk * Gk * GCin
    w1m = jnp.zeros((Gk, Gk, s, s, Cin, Cout_p), jnp.float32)
    for gy in range(Gk):
        for gx in range(Gk):
            for ph in range(s):
                for pw in range(s):
                    dy, dx = gy * s + ph, gx * s + pw
                    if dy < k and dx < k:
                        w1m = w1m.at[gy, gx, ph, pw, :, :Cout].set(w1_t[dy, dx])
    w1m = w1m.reshape(K1, Cout_p).astype(jnp.bfloat16)

    # conv2 weight rows ordered (dy, dx, cin padded to Cout_p).
    K2 = k * k * Cout_p
    w2m = jnp.zeros((k, k, Cout_p, Cout_p), jnp.float32)
    w2m = w2m.at[:, :, :Cout, :Cout].set(w2_t)
    w2m = w2m.reshape(K2, Cout_p).astype(jnp.bfloat16)

    b1p = jnp.zeros((1, Cout_p), jnp.float32).at[0, :Cout].set(b1)
    b2p = jnp.zeros((1, Cout_p), jnp.float32).at[0, :Cout].set(b2)

    # shortcut as a (Cin, Cout_p) matmul: 1x1 conv (+BN) or identity matrix.
    if "sc_w" in params:
        wsc_t, bsc = fold(params["sc_w"], params["sc_bn"])      # (1,1,Cin,Cout)
        wsc = jnp.zeros((Cin, Cout_p), jnp.float32).at[:, :Cout].set(wsc_t[0, 0])
        bscp = jnp.zeros((1, Cout_p), jnp.float32).at[0, :Cout].set(bsc)
    else:  # identity: Cin == Cout, stride == 1 (bf16-quantized residual, f32 add)
        wsc = jnp.zeros((Cin, Cout_p), jnp.float32).at[:, :Cout].set(
            jnp.eye(Cin, dtype=jnp.float32))
        bscp = jnp.zeros((1, Cout_p), jnp.float32)
    wsc = wsc.astype(jnp.bfloat16)

    # The shortcut's samples already live in slab1 columns (tap-group (go,go),
    # phase (pad%s, pad%s)): compute that static column offset.
    go = pad // s
    pch = (pad % s) * s + (pad % s)
    sc_off = (go * Gk + go) * GCin + pch * Cin

    kernel = _make_block_kernel(k, Ho, Wo, Cin, Cout_p, Gk, GCin, sc_off)

    grid_spec = pltpu.PrefetchScalarGridSpec(
        num_scalar_prefetch=0,
        grid=(N,),                                   # one image per step
        in_specs=[
            pl.BlockSpec((HoG_, WoG_, GCin), lambda n: (n, 0, 0)),   # halo block
            pl.BlockSpec((K1, Cout_p), lambda n: (0, 0)),            # resident w1
            pl.BlockSpec((1, Cout_p), lambda n: (0, 0)),             # resident b1
            pl.BlockSpec((K2, Cout_p), lambda n: (0, 0)),            # resident w2
            pl.BlockSpec((1, Cout_p), lambda n: (0, 0)),             # resident b2
            pl.BlockSpec((Cin, Cout_p), lambda n: (0, 0)),           # shortcut w
            pl.BlockSpec((1, Cout_p), lambda n: (0, 0)),             # shortcut b
        ],
        out_specs=pl.BlockSpec((M, Cout_p), lambda n: (n, 0)),
        scratch_shapes=[
            pltpu.VMEM((M, K1), jnp.bfloat16),                  # conv1 im2col slab
            pltpu.VMEM((M, Cout_p), jnp.bfloat16),              # y1 (bn1+relu)
            pltpu.VMEM((Ho + 2, Wo + 2, Cout_p), jnp.bfloat16), # zero-padded y1
            pltpu.VMEM((M, K2), jnp.bfloat16),                  # conv2 im2col slab
        ],
    )

    out_flat = pl.pallas_call(
        kernel,
        out_shape=jax.ShapeDtypeStruct((N * M, Cout_p), out_dtype),
        grid_spec=grid_spec,
        compiler_params=pltpu.CompilerParams(
            dimension_semantics=("parallel",),
            vmem_limit_bytes=64 * 1024 * 1024,
        ),
    )(xg, w1m, b1p, w2m, b2p, wsc, bscp)

    out = out_flat.reshape(N, Ho, Wo, Cout_p)[:, :, :, :Cout]
    return jnp.transpose(out, (0, 3, 1, 2))          # NHWC -> NCHW


# ------------------------------ reference & init ----------------------------

def _reference_forward(x_nchw, params, stride, eps=1e-5):
    x = jnp.transpose(x_nchw, (0, 2, 3, 1))

    def conv(inp, w, s, pad):
        return jax.lax.conv_general_dilated(
            inp, jnp.transpose(w, (2, 3, 1, 0)), (s, s),
            [(pad, pad), (pad, pad)],
            dimension_numbers=("NHWC", "HWIO", "NHWC"))

    def bn(inp, p):
        g, b, m, v = p
        return (inp - m) * (g * jax.lax.rsqrt(v + eps)) + b

    sc = (bn(conv(x, params["sc_w"], stride, 0), params["sc_bn"])
          if "sc_w" in params else x)
    y = jax.nn.relu(bn(conv(x, params["conv1_w"], stride, 1), params["bn1"]))
    y = bn(conv(y, params["conv2_w"], 1, 1), params["bn2"])
    y = jax.nn.relu(y + sc)
    return jnp.transpose(y, (0, 3, 1, 2))


def init_params(key, in_channels, out_channels, stride):
    ks = jax.random.split(key, 8)

    def bn_params(k):
        k1, k2, k3, k4 = jax.random.split(k, 4)
        gamma = 1.0 + 0.1 * jax.random.normal(k1, (out_channels,), jnp.float32)
        beta = 0.1 * jax.random.normal(k2, (out_channels,), jnp.float32)
        mean = 0.1 * jax.random.normal(k3, (out_channels,), jnp.float32)
        var = 0.5 + jnp.abs(jax.random.normal(k4, (out_channels,), jnp.float32))
        return (gamma, beta, mean, var)

    params = {
        "conv1_w": 0.1 * jax.random.normal(
            ks[0], (out_channels, in_channels, 3, 3), jnp.float32),
        "bn1": bn_params(ks[1]),
        "conv2_w": 0.1 * jax.random.normal(
            ks[2], (out_channels, out_channels, 3, 3), jnp.float32),
        "bn2": bn_params(ks[3]),
    }
    if in_channels != out_channels or stride != 1:
        params["sc_w"] = 0.1 * jax.random.normal(
            ks[4], (out_channels, in_channels, 1, 1), jnp.float32)
        params["sc_bn"] = bn_params(ks[5])
    return params


if __name__ == "__main__":
    key = jax.random.PRNGKey(0)
    k_x, k_p, k_x2, k_p2 = jax.random.split(key, 4)

    fwd = jax.jit(residual_block_forward, static_argnames=("stride",))

    # Config 1: projection shortcut (1x1 conv + BN), stride 2, Cin != Cout.
    N, C_in, H, W = 2, 4, 16, 16
    C_out, stride = 8, 2
    x = jax.random.normal(k_x, (N, C_in, H, W), jnp.float32)     # NCHW
    params = init_params(k_p, C_in, C_out, stride)

    out = jax.block_until_ready(fwd(x, params, stride=stride))
    assert out.shape == (N, C_out, H // stride, W // stride), out.shape
    assert bool(jnp.all(out >= 0.0))                             # final ReLU
    ref = _reference_forward(x, params, stride)
    assert bool(jnp.allclose(out, ref, atol=0.1, rtol=0.1)), float(
        jnp.max(jnp.abs(out - ref)))

    # Config 2: identity shortcut, stride 1, Cin == Cout.
    N2, C2 = 2, 8
    x2 = jax.random.normal(k_x2, (N2, C2, H, W), jnp.float32)
    params2 = init_params(k_p2, C2, C2, 1)

    out2 = jax.block_until_ready(fwd(x2, params2, stride=1))
    assert out2.shape == (N2, C2, H, W), out2.shape
    assert bool(jnp.all(out2 >= 0.0))
    ref2 = _reference_forward(x2, params2, 1)
    assert bool(jnp.allclose(out2, ref2, atol=0.1, rtol=0.1)), float(
        jnp.max(jnp.abs(out2 - ref2)))

    print("KERNEL_OK")
</pallas_src>

<mosaic_0001>
module attributes {stable_mosaic.version = 11 : i64} {
  func.func @kernel(%arg0: i32, %arg1: memref<9x9x16xbf16, #tpu.memory_space<vmem>>, %arg2: memref<64x128xbf16, #tpu.memory_space<vmem>>, %arg3: memref<1x128xf32, #tpu.memory_space<vmem>>, %arg4: memref<1152x128xbf16, #tpu.memory_space<vmem>>, %arg5: memref<1x128xf32, #tpu.memory_space<vmem>>, %arg6: memref<4x128xbf16, #tpu.memory_space<vmem>>, %arg7: memref<1x128xf32, #tpu.memory_space<vmem>>, %arg8: memref<64x128xf32, #tpu.memory_space<vmem>>, %arg9: memref<64x64xbf16, #tpu.memory_space<vmem>>, %arg10: memref<64x128xbf16, #tpu.memory_space<vmem>>, %arg11: memref<10x10x128xbf16, #tpu.memory_space<vmem>>, %arg12: memref<64x1152xbf16, #tpu.memory_space<vmem>>) attributes {dimension_semantics = [#tpu.dimension_semantics<parallel>], iteration_bounds = array<i64: 2>, scalar_prefetch = 0 : i64, scratch_operands = 4 : i64, tpu.core_type = #tpu.core_type<tc>, window_params = [{transform_indices = @transform_0, window_bounds = array<i64: 9, 9, 16>}, {pipeline_mode = #tpu.pipeline_mode<synchronous>, transform_indices = @transform_1, window_bounds = array<i64: 64, 128>}, {pipeline_mode = #tpu.pipeline_mode<synchronous>, transform_indices = @transform_2, window_bounds = array<i64: 1, 128>}, {pipeline_mode = #tpu.pipeline_mode<synchronous>, transform_indices = @transform_3, window_bounds = array<i64: 1152, 128>}, {pipeline_mode = #tpu.pipeline_mode<synchronous>, transform_indices = @transform_4, window_bounds = array<i64: 1, 128>}, {pipeline_mode = #tpu.pipeline_mode<synchronous>, transform_indices = @transform_5, window_bounds = array<i64: 4, 128>}, {pipeline_mode = #tpu.pipeline_mode<synchronous>, transform_indices = @transform_6, window_bounds = array<i64: 1, 128>}, {transform_indices = @transform_7, window_bounds = array<i64: 64, 128>}]} {
    %c0 = arith.constant 0 : index
    %c0_0 = arith.constant 0 : index
    %c0_1 = arith.constant 0 : index
    %0 = vector.load %arg1[%c0, %c0_0, %c0_1] : memref<9x9x16xbf16, #tpu.memory_space<vmem>>, vector<1x8x16xbf16>
    %1 = vector.shape_cast %0 : vector<1x8x16xbf16> to vector<8x16xbf16>
    %c0_2 = arith.constant 0 : index
    %c0_3 = arith.constant 0 : index
    %2 = vector.load %arg9[%c0_2, %c0_3] : memref<64x64xbf16, #tpu.memory_space<vmem>>, vector<8x16xbf16>
    tpu.vector_store %arg9[%c0_2, %c0_3], %1 {strides = array<i32>} : memref<64x64xbf16, #tpu.memory_space<vmem>>, vector<8x16xbf16>,
    %c0_4 = arith.constant 0 : index
    %c1 = arith.constant 1 : index
    %c0_5 = arith.constant 0 : index
    %3 = vector.load %arg1[%c0_4, %c1, %c0_5] : memref<9x9x16xbf16, #tpu.memory_space<vmem>>, vector<1x8x16xbf16>
    %4 = vector.shape_cast %3 : vector<1x8x16xbf16> to vector<8x16xbf16>
    %c0_6 = arith.constant 0 : index
    %c16 = arith.constant 16 : index
    %5 = vector.load %arg9[%c0_6, %c16] : memref<64x64xbf16, #tpu.memory_space<vmem>>, vector<8x16xbf16>
    tpu.vector_store %arg9[%c0_6, %c16], %4 {strides = array<i32>} : memref<64x64xbf16, #tpu.memory_space<vmem>>, vector<8x16xbf16>,
    %c1_7 = arith.constant 1 : index
    %c0_8 = arith.constant 0 : index
    %c0_9 = arith.constant 0 : index
    %6 = vector.load %arg1[%c1_7, %c0_8, %c0_9] : memref<9x9x16xbf16, #tpu.memory_space<vmem>>, vector<1x8x16xbf16>
    %7 = vector.shape_cast %6 : vector<1x8x16xbf16> to vector<8x16xbf16>
    %c0_10 = arith.constant 0 : index
    %c32 = arith.constant 32 : index
    %8 = vector.load %arg9[%c0_10, %c32] : memref<64x64xbf16, #tpu.memory_space<vmem>>, vector<8x16xbf16>
    tpu.vector_store %arg9[%c0_10, %c32], %7 {strides = array<i32>} : memref<64x64xbf16, #tpu.memory_space<vmem>>, vector<8x16xbf16>,
    %c1_11 = arith.constant 1 : index
    %c1_12 = arith.constant 1 : index
    %c0_13 = arith.constant 0 : index
    %9 = vector.load %arg1[%c1_11, %c1_12, %c0_13] : memref<9x9x16xbf16, #tpu.memory_space<vmem>>, vector<1x8x16xbf16>
    %10 = vector.shape_cast %9 : vector<1x8x16xbf16> to vector<8x16xbf16>
    %c0_14 = arith.constant 0 : index
    %c48 = arith.constant 48 : index
    %11 = vector.load %arg9[%c0_14, %c48] : memref<64x64xbf16, #tpu.memory_space<vmem>>, vector<8x16xbf16>
    tpu.vector_store %arg9[%c0_14, %c48], %10 {strides = array<i32>} : memref<64x64xbf16, #tpu.memory_space<vmem>>, vector<8x16xbf16>,
    %c1_15 = arith.constant 1 : index
    %c0_16 = arith.constant 0 : index
    %c0_17 = arith.constant 0 : index
    %12 = vector.load %arg1[%c1_15, %c0_16, %c0_17] : memref<9x9x16xbf16, #tpu.memory_space<vmem>>, vector<1x8x16xbf16>
    %13 = vector.shape_cast %12 : vector<1x8x16xbf16> to vector<8x16xbf16>
    %c8 = arith.constant 8 : index
    %c0_18 = arith.constant 0 : index
    %14 = vector.load %arg9[%c8, %c0_18] : memref<64x64xbf16, #tpu.memory_space<vmem>>, vector<8x16xbf16>
    tpu.vector_store %arg9[%c8, %c0_18], %13 {strides = array<i32>} : memref<64x64xbf16, #tpu.memory_space<vmem>>, vector<8x16xbf16>,
    %c1_19 = arith.constant 1 : index
    %c1_20 = arith.constant 1 : index
    %c0_21 = arith.constant 0 : index
    %15 = vector.load %arg1[%c1_19, %c1_20, %c0_21] : memref<9x9x16xbf16, #tpu.memory_space<vmem>>, vector<1x8x16xbf16>
    %16 = vector.shape_cast %15 : vector<1x8x16xbf16> to vector<8x16xbf16>
    %c8_22 = arith.constant 8 : index
    %c16_23 = arith.constant 16 : index
    %17 = vector.load %arg9[%c8_22, %c16_23] : memref<64x64xbf16, #tpu.memory_space<vmem>>, vector<8x16xbf16>
    tpu.vector_store %arg9[%c8_22, %c16_23], %16 {strides = array<i32>} : memref<64x64xbf16, #tpu.memory_space<vmem>>, vector<8x16xbf16>,
    %c2 = arith.constant 2 : index
    %c0_24 = arith.constant 0 : index
    %c0_25 = arith.constant 0 : index
    %18 = vector.load %arg1[%c2, %c0_24, %c0_25] : memref<9x9x16xbf16, #tpu.memory_space<vmem>>, vector<1x8x16xbf16>
    %19 = vector.shape_cast %18 : vector<1x8x16xbf16> to vector<8x16xbf16>
    %c8_26 = arith.constant 8 : index
    %c32_27 = arith.constant 32 : index
    %20 = vector.load %arg9[%c8_26, %c32_27] : memref<64x64xbf16, #tpu.memory_space<vmem>>, vector<8x16xbf16>
    tpu.vector_store %arg9[%c8_26, %c32_27], %19 {strides = array<i32>} : memref<64x64xbf16, #tpu.memory_space<vmem>>, vector<8x16xbf16>,
    %c2_28 = arith.constant 2 : index
    %c1_29 = arith.constant 1 : index
    %c0_30 = arith.constant 0 : index
    %21 = vector.load %arg1[%c2_28, %c1_29, %c0_30] : memref<9x9x16xbf16, #tpu.memory_space<vmem>>, vector<1x8x16xbf16>
    %22 = vector.shape_cast %21 : vector<1x8x16xbf16> to vector<8x16xbf16>
    %c8_31 = arith.constant 8 : index
    %c48_32 = arith.constant 48 : index
    %23 = vector.load %arg9[%c8_31, %c48_32] : memref<64x64xbf16, #tpu.memory_space<vmem>>, vector<8x16xbf16>
    tpu.vector_store %arg9[%c8_31, %c48_32], %22 {strides = array<i32>} : memref<64x64xbf16, #tpu.memory_space<vmem>>, vector<8x16xbf16>,
    %c2_33 = arith.constant 2 : index
    %c0_34 = arith.constant 0 : index
    %c0_35 = arith.constant 0 : index
    %24 = vector.load %arg1[%c2_33, %c0_34, %c0_35] : memref<9x9x16xbf16, #tpu.memory_space<vmem>>, vector<1x8x16xbf16>
    %25 = vector.shape_cast %24 : vector<1x8x16xbf16> to vector<8x16xbf16>
    %c16_36 = arith.constant 16 : index
    %c0_37 = arith.constant 0 : index
    %26 = vector.load %arg9[%c16_36, %c0_37] : memref<64x64xbf16, #tpu.memory_space<vmem>>, vector<8x16xbf16>
    tpu.vector_store %arg9[%c16_36, %c0_37], %25 {strides = array<i32>} : memref<64x64xbf16, #tpu.memory_space<vmem>>, vector<8x16xbf16>,
    %c2_38 = arith.constant 2 : index
    %c1_39 = arith.constant 1 : index
    %c0_40 = arith.constant 0 : index
    %27 = vector.load %arg1[%c2_38, %c1_39, %c0_40] : memref<9x9x16xbf16, #tpu.memory_space<vmem>>, vector<1x8x16xbf16>
    %28 = vector.shape_cast %27 : vector<1x8x16xbf16> to vector<8x16xbf16>
    %c16_41 = arith.constant 16 : index
    %c16_42 = arith.constant 16 : index
    %29 = vector.load %arg9[%c16_41, %c16_42] : memref<64x64xbf16, #tpu.memory_space<vmem>>, vector<8x16xbf16>
    tpu.vector_store %arg9[%c16_41, %c16_42], %28 {strides = array<i32>} : memref<64x64xbf16, #tpu.memory_space<vmem>>, vector<8x16xbf16>,
    %c3 = arith.constant 3 : index
    %c0_43 = arith.constant 0 : index
    %c0_44 = arith.constant 0 : index
    %30 = vector.load %arg1[%c3, %c0_43, %c0_44] : memref<9x9x16xbf16, #tpu.memory_space<vmem>>, vector<1x8x16xbf16>
    %31 = vector.shape_cast %30 : vector<1x8x16xbf16> to vector<8x16xbf16>
    %c16_45 = arith.constant 16 : index
    %c32_46 = arith.constant 32 : index
    %32 = vector.load %arg9[%c16_45, %c32_46] : memref<64x64xbf16, #tpu.memory_space<vmem>>, vector<8x16xbf16>
    tpu.vector_store %arg9[%c16_45, %c32_46], %31 {strides = array<i32>} : memref<64x64xbf16, #tpu.memory_space<vmem>>, vector<8x16xbf16>,
    %c3_47 = arith.constant 3 : index
    %c1_48 = arith.constant 1 : index
    %c0_49 = arith.constant 0 : index
    %33 = vector.load %arg1[%c3_47, %c1_48, %c0_49] : memref<9x9x16xbf16, #tpu.memory_space<vmem>>, vector<1x8x16xbf16>
    %34 = vector.shape_cast %33 : vector<1x8x16xbf16> to vector<8x16xbf16>
    %c16_50 = arith.constant 16 : index
    %c48_51 = arith.constant 48 : index
    %35 = vector.load %arg9[%c16_50, %c48_51] : memref<64x64xbf16, #tpu.memory_space<vmem>>, vector<8x16xbf16>
    tpu.vector_store %arg9[%c16_50, %c48_51], %34 {strides = array<i32>} : memref<64x64xbf16, #tpu.memory_space<vmem>>, vector<8x16xbf16>,
    %c3_52 = arith.constant 3 : index
    %c0_53 = arith.constant 0 : index
    %c0_54 = arith.constant 0 : index
    %36 = vector.load %arg1[%c3_52, %c0_53, %c0_54] : memref<9x9x16xbf16, #tpu.memory_space<vmem>>, vector<1x8x16xbf16>
    %37 = vector.shape_cast %36 : vector<1x8x16xbf16> to vector<8x16xbf16>
    %c24 = arith.constant 24 : index
    %c0_55 = arith.constant 0 : index
    %38 = vector.load %arg9[%c24, %c0_55] : memref<64x64xbf16, #tpu.memory_space<vmem>>, vector<8x16xbf16>
    tpu.vector_store %arg9[%c24, %c0_55], %37 {strides = array<i32>} : memref<64x64xbf16, #tpu.memory_space<vmem>>, vector<8x16xbf16>,
    %c3_56 = arith.constant 3 : index
    %c1_57 = arith.constant 1 : index
    %c0_58 = arith.constant 0 : index
    %39 = vector.load %arg1[%c3_56, %c1_57, %c0_58] : memref<9x9x16xbf16, #tpu.memory_space<vmem>>, vector<1x8x16xbf16>
    %40 = vector.shape_cast %39 : vector<1x8x16xbf16> to vector<8x16xbf16>
    %c24_59 = arith.constant 24 : index
    %c16_60 = arith.constant 16 : index
    %41 = vector.load %arg9[%c24_59, %c16_60] : memref<64x64xbf16, #tpu.memory_space<vmem>>, vector<8x16xbf16>
    tpu.vector_store %arg9[%c24_59, %c16_60], %40 {strides = array<i32>} : memref<64x64xbf16, #tpu.memory_space<vmem>>, vector<8x16xbf16>,
    %c4 = arith.constant 4 : index
    %c0_61 = arith.constant 0 : index
    %c0_62 = arith.constant 0 : index
    %42 = vector.load %arg1[%c4, %c0_61, %c0_62] : memref<9x9x16xbf16, #tpu.memory_space<vmem>>, vector<1x8x16xbf16>
    %43 = vector.shape_cast %42 : vector<1x8x16xbf16> to vector<8x16xbf16>
    %c24_63 = arith.constant 24 : index
    %c32_64 = arith.constant 32 : index
    %44 = vector.load %arg9[%c24_63, %c32_64] : memref<64x64xbf16, #tpu.memory_space<vmem>>, vector<8x16xbf16>
    tpu.vector_store %arg9[%c24_63, %c32_64], %43 {strides = array<i32>} : memref<64x64xbf16, #tpu.memory_space<vmem>>, vector<8x16xbf16>,
    %c4_65 = arith.constant 4 : index
    %c1_66 = arith.constant 1 : index
    %c0_67 = arith.constant 0 : index
    %45 = vector.load %arg1[%c4_65, %c1_66, %c0_67] : memref<9x9x16xbf16, #tpu.memory_space<vmem>>, vector<1x8x16xbf16>
    %46 = vector.shape_cast %45 : vector<1x8x16xbf16> to vector<8x16xbf16>
    %c24_68 = arith.constant 24 : index
    %c48_69 = arith.constant 48 : index
    %47 = vector.load %arg9[%c24_68, %c48_69] : memref<64x64xbf16, #tpu.memory_space<vmem>>, vector<8x16xbf16>
    tpu.vector_store %arg9[%c24_68, %c48_69], %46 {strides = array<i32>} : memref<64x64xbf16, #tpu.memory_space<vmem>>, vector<8x16xbf16>,
    %c4_70 = arith.constant 4 : index
    %c0_71 = arith.constant 0 : index
    %c0_72 = arith.constant 0 : index
    %48 = vector.load %arg1[%c4_70, %c0_71, %c0_72] : memref<9x9x16xbf16, #tpu.memory_space<vmem>>, vector<1x8x16xbf16>
    %49 = vector.shape_cast %48 : vector<1x8x16xbf16> to vector<8x16xbf16>
    %c32_73 = arith.constant 32 : index
    %c0_74 = arith.constant 0 : index
    %50 = vector.load %arg9[%c32_73, %c0_74] : memref<64x64xbf16, #tpu.memory_space<vmem>>, vector<8x16xbf16>
    tpu.vector_store %arg9[%c32_73, %c0_74], %49 {strides = array<i32>} : memref<64x64xbf16, #tpu.memory_space<vmem>>, vector<8x16xbf16>,
    %c4_75 = arith.constant 4 : index
    %c1_76 = arith.constant 1 : index
    %c0_77 = arith.constant 0 : index
    %51 = vector.load %arg1[%c4_75, %c1_76, %c0_77] : memref<9x9x16xbf16, #tpu.memory_space<vmem>>, vector<1x8x16xbf16>
    %52 = vector.shape_cast %51 : vector<1x8x16xbf16> to vector<8x16xbf16>
    %c32_78 = arith.constant 32 : index
    %c16_79 = arith.constant 16 : index
    %53 = vector.load %arg9[%c32_78, %c16_79] : memref<64x64xbf16, #tpu.memory_space<vmem>>, vector<8x16xbf16>
    tpu.vector_store %arg9[%c32_78, %c16_79], %52 {strides = array<i32>} : memref<64x64xbf16, #tpu.memory_space<vmem>>, vector<8x16xbf16>,
    %c5 = arith.constant 5 : index
    %c0_80 = arith.constant 0 : index
    %c0_81 = arith.constant 0 : index
    %54 = vector.load %arg1[%c5, %c0_80, %c0_81] : memref<9x9x16xbf16, #tpu.memory_space<vmem>>, vector<1x8x16xbf16>
    %55 = vector.shape_cast %54 : vector<1x8x16xbf16> to vector<8x16xbf16>
    %c32_82 = arith.constant 32 : index
    %c32_83 = arith.constant 32 : index
    %56 = vector.load %arg9[%c32_82, %c32_83] : memref<64x64xbf16, #tpu.memory_space<vmem>>, vector<8x16xbf16>
    tpu.vector_store %arg9[%c32_82, %c32_83], %55 {strides = array<i32>} : memref<64x64xbf16, #tpu.memory_space<vmem>>, vector<8x16xbf16>,
    %c5_84 = arith.constant 5 : index
    %c1_85 = arith.constant 1 : index
    %c0_86 = arith.constant 0 : index
    %57 = vector.load %arg1[%c5_84, %c1_85, %c0_86] : memref<9x9x16xbf16, #tpu.memory_space<vmem>>, vector<1x8x16xbf16>
    %58 = vector.shape_cast %57 : vector<1x8x16xbf16> to vector<8x16xbf16>
    %c32_87 = arith.constant 32 : index
    %c48_88 = arith.constant 48 : index
    %59 = vector.load %arg9[%c32_87, %c48_88] : memref<64x64xbf16, #tpu.memory_space<vmem>>, vector<8x16xbf16>
    tpu.vector_store %arg9[%c32_87, %c48_88], %58 {strides = array<i32>} : memref<64x64xbf16, #tpu.memory_space<vmem>>, vector<8x16xbf16>,
    %c5_89 = arith.constant 5 : index
    %c0_90 = arith.constant 0 : index
    %c0_91 = arith.constant 0 : index
    %60 = vector.load %arg1[%c5_89, %c0_90, %c0_91] : memref<9x9x16xbf16, #tpu.memory_space<vmem>>, vector<1x8x16xbf16>
    %61 = vector.shape_cast %60 : vector<1x8x16xbf16> to vector<8x16xbf16>
    %c40 = arith.constant 40 : index
    %c0_92 = arith.constant 0 : index
    %62 = vector.load %arg9[%c40, %c0_92] : memref<64x64xbf16, #tpu.memory_space<vmem>>, vector<8x16xbf16>
    tpu.vector_store %arg9[%c40, %c0_92], %61 {strides = array<i32>} : memref<64x64xbf16, #tpu.memory_space<vmem>>, vector<8x16xbf16>,
    %c5_93 = arith.constant 5 : index
    %c1_94 = arith.constant 1 : index
    %c0_95 = arith.constant 0 : index
    %63 = vector.load %arg1[%c5_93, %c1_94, %c0_95] : memref<9x9x16xbf16, #tpu.memory_space<vmem>>, vector<1x8x16xbf16>
    %64 = vector.shape_cast %63 : vector<1x8x16xbf16> to vector<8x16xbf16>
    %c40_96 = arith.constant 40 : index
    %c16_97 = arith.constant 16 : index
    %65 = vector.load %arg9[%c40_96, %c16_97] : memref<64x64xbf16, #tpu.memory_space<vmem>>, vector<8x16xbf16>
    tpu.vector_store %arg9[%c40_96, %c16_97], %64 {strides = array<i32>} : memref<64x64xbf16, #tpu.memory_space<vmem>>, vector<8x16xbf16>,
    %c6 = arith.constant 6 : index
    %c0_98 = arith.constant 0 : index
    %c0_99 = arith.constant 0 : index
    %66 = vector.load %arg1[%c6, %c0_98, %c0_99] : memref<9x9x16xbf16, #tpu.memory_space<vmem>>, vector<1x8x16xbf16>
    %67 = vector.shape_cast %66 : vector<1x8x16xbf16> to vector<8x16xbf16>
    %c40_100 = arith.constant 40 : index
    %c32_101 = arith.constant 32 : index
    %68 = vector.load %arg9[%c40_100, %c32_101] : memref<64x64xbf16, #tpu.memory_space<vmem>>, vector<8x16xbf16>
    tpu.vector_store %arg9[%c40_100, %c32_101], %67 {strides = array<i32>} : memref<64x64xbf16, #tpu.memory_space<vmem>>, vector<8x16xbf16>,
    %c6_102 = arith.constant 6 : index
    %c1_103 = arith.constant 1 : index
    %c0_104 = arith.constant 0 : index
    %69 = vector.load %arg1[%c6_102, %c1_103, %c0_104] : memref<9x9x16xbf16, #tpu.memory_space<vmem>>, vector<1x8x16xbf16>
    %70 = vector.shape_cast %69 : vector<1x8x16xbf16> to vector<8x16xbf16>
    %c40_105 = arith.constant 40 : index
    %c48_106 = arith.constant 48 : index
    %71 = vector.load %arg9[%c40_105, %c48_106] : memref<64x64xbf16, #tpu.memory_space<vmem>>, vector<8x16xbf16>
    tpu.vector_store %arg9[%c40_105, %c48_106], %70 {strides = array<i32>} : memref<64x64xbf16, #tpu.memory_space<vmem>>, vector<8x16xbf16>,
    %c6_107 = arith.constant 6 : index
    %c0_108 = arith.constant 0 : index
    %c0_109 = arith.constant 0 : index
    %72 = vector.load %arg1[%c6_107, %c0_108, %c0_109] : memref<9x9x16xbf16, #tpu.memory_space<vmem>>, vector<1x8x16xbf16>
    %73 = vector.shape_cast %72 : vector<1x8x16xbf16> to vector<8x16xbf16>
    %c48_110 = arith.constant 48 : index
    %c0_111 = arith.constant 0 : index
    %74 = vector.load %arg9[%c48_110, %c0_111] : memref<64x64xbf16, #tpu.memory_space<vmem>>, vector<8x16xbf16>
    tpu.vector_store %arg9[%c48_110, %c0_111], %73 {strides = array<i32>} : memref<64x64xbf16, #tpu.memory_space<vmem>>, vector<8x16xbf16>,
    %c6_112 = arith.constant 6 : index
    %c1_113 = arith.constant 1 : index
    %c0_114 = arith.constant 0 : index
    %75 = vector.load %arg1[%c6_112, %c1_113, %c0_114] : memref<9x9x16xbf16, #tpu.memory_space<vmem>>, vector<1x8x16xbf16>
    %76 = vector.shape_cast %75 : vector<1x8x16xbf16> to vector<8x16xbf16>
    %c48_115 = arith.constant 48 : index
    %c16_116 = arith.constant 16 : index
    %77 = vector.load %arg9[%c48_115, %c16_116] : memref<64x64xbf16, #tpu.memory_space<vmem>>, vector<8x16xbf16>
    tpu.vector_store %arg9[%c48_115, %c16_116], %76 {strides = array<i32>} : memref<64x64xbf16, #tpu.memory_space<vmem>>, vector<8x16xbf16>,
    %c7 = arith.constant 7 : index
    %c0_117 = arith.constant 0 : index
    %c0_118 = arith.constant 0 : index
    %78 = vector.load %arg1[%c7, %c0_117, %c0_118] : memref<9x9x16xbf16, #tpu.memory_space<vmem>>, vector<1x8x16xbf16>
    %79 = vector.shape_cast %78 : vector<1x8x16xbf16> to vector<8x16xbf16>
    %c48_119 = arith.constant 48 : index
    %c32_120 = arith.constant 32 : index
    %80 = vector.load %arg9[%c48_119, %c32_120] : memref<64x64xbf16, #tpu.memory_space<vmem>>, vector<8x16xbf16>
    tpu.vector_store %arg9[%c48_119, %c32_120], %79 {strides = array<i32>} : memref<64x64xbf16, #tpu.memory_space<vmem>>, vector<8x16xbf16>,
    %c7_121 = arith.constant 7 : index
    %c1_122 = arith.constant 1 : index
    %c0_123 = arith.constant 0 : index
    %81 = vector.load %arg1[%c7_121, %c1_122, %c0_123] : memref<9x9x16xbf16, #tpu.memory_space<vmem>>, vector<1x8x16xbf16>
    %82 = vector.shape_cast %81 : vector<1x8x16xbf16> to vector<8x16xbf16>
    %c48_124 = arith.constant 48 : index
    %c48_125 = arith.constant 48 : index
    %83 = vector.load %arg9[%c48_124, %c48_125] : memref<64x64xbf16, #tpu.memory_space<vmem>>, vector<8x16xbf16>
    tpu.vector_store %arg9[%c48_124, %c48_125], %82 {strides = array<i32>} : memref<64x64xbf16, #tpu.memory_space<vmem>>, vector<8x16xbf16>,
    %c7_126 = arith.constant 7 : index
    %c0_127 = arith.constant 0 : index
    %c0_128 = arith.constant 0 : index
    %84 = vector.load %arg1[%c7_126, %c0_127, %c0_128] : memref<9x9x16xbf16, #tpu.memory_space<vmem>>, vector<1x8x16xbf16>
    %85 = vector.shape_cast %84 : vector<1x8x16xbf16> to vector<8x16xbf16>
    %c56 = arith.constant 56 : index
    %c0_129 = arith.constant 0 : index
    %86 = vector.load %arg9[%c56, %c0_129] : memref<64x64xbf16, #tpu.memory_space<vmem>>, vector<8x16xbf16>
    tpu.vector_store %arg9[%c56, %c0_129], %85 {strides = array<i32>} : memref<64x64xbf16, #tpu.memory_space<vmem>>, vector<8x16xbf16>,
    %c7_130 = arith.constant 7 : index
    %c1_131 = arith.constant 1 : index
    %c0_132 = arith.constant 0 : index
    %87 = vector.load %arg1[%c7_130, %c1_131, %c0_132] : memref<9x9x16xbf16, #tpu.memory_space<vmem>>, vector<1x8x16xbf16>
    %88 = vector.shape_cast %87 : vector<1x8x16xbf16> to vector<8x16xbf16>
    %c56_133 = arith.constant 56 : index
    %c16_134 = arith.constant 16 : index
    %89 = vector.load %arg9[%c56_133, %c16_134] : memref<64x64xbf16, #tpu.memory_space<vmem>>, vector<8x16xbf16>
    tpu.vector_store %arg9[%c56_133, %c16_134], %88 {strides = array<i32>} : memref<64x64xbf16, #tpu.memory_space<vmem>>, vector<8x16xbf16>,
    %c8_135 = arith.constant 8 : index
    %c0_136 = arith.constant 0 : index
    %c0_137 = arith.constant 0 : index
    %90 = vector.load %arg1[%c8_135, %c0_136, %c0_137] : memref<9x9x16xbf16, #tpu.memory_space<vmem>>, vector<1x8x16xbf16>
    %91 = vector.shape_cast %90 : vector<1x8x16xbf16> to vector<8x16xbf16>
    %c56_138 = arith.constant 56 : index
    %c32_139 = arith.constant 32 : index
    %92 = vector.load %arg9[%c56_138, %c32_139] : memref<64x64xbf16, #tpu.memory_space<vmem>>, vector<8x16xbf16>
    tpu.vector_store %arg9[%c56_138, %c32_139], %91 {strides = array<i32>} : memref<64x64xbf16, #tpu.memory_space<vmem>>, vector<8x16xbf16>,
    %c8_140 = arith.constant 8 : index
    %c1_141 = arith.constant 1 : index
    %c0_142 = arith.constant 0 : index
    %93 = vector.load %arg1[%c8_140, %c1_141, %c0_142] : memref<9x9x16xbf16, #tpu.memory_space<vmem>>, vector<1x8x16xbf16>
    %94 = vector.shape_cast %93 : vector<1x8x16xbf16> to vector<8x16xbf16>
    %c56_143 = arith.constant 56 : index
    %c48_144 = arith.constant 48 : index
    %95 = vector.load %arg9[%c56_143, %c48_144] : memref<64x64xbf16, #tpu.memory_space<vmem>>, vector<8x16xbf16>
    tpu.vector_store %arg9[%c56_143, %c48_144], %94 {strides = array<i32>} : memref<64x64xbf16, #tpu.memory_space<vmem>>, vector<8x16xbf16>,
    %c0_145 = arith.constant 0 : index
    %c0_146 = arith.constant 0 : index
    %96 = vector.load %arg9[%c0_145, %c0_146] : memref<64x64xbf16, #tpu.memory_space<vmem>>, vector<64x64xbf16>
    %c0_147 = arith.constant 0 : index
    %c0_148 = arith.constant 0 : index
    %97 = vector.load %arg2[%c0_147, %c0_148] : memref<64x128xbf16, #tpu.memory_space<vmem>>, vector<64x128xbf16>
    %cst = arith.constant dense<0.000000e+00> : vector<64x128xf32>
    %98 = tpu.matmul %96, %97, %cst {dimension_numbers = #tpu.dot_dimension_numbers<[1], [0], [0], [1], [0, 0, 1, 1], [], []>} : vector<64x64xbf16>, vector<64x128xbf16>, vector<64x128xf32> -> vector<64x128xf32>
    %c0_149 = arith.constant 0 : index
    %c0_150 = arith.constant 0 : index
    %99 = vector.load %arg3[%c0_149, %c0_150] : memref<1x128xf32, #tpu.memory_space<vmem>>, vector<1x128xf32>
    %100 = vector.broadcast %99 : vector<1x128xf32> to vector<64x128xf32>
    %101 = arith.addf %98, %100 : vector<64x128xf32>
    %cst_151 = arith.constant 0.000000e+00 : f32
    %102 = vector.broadcast %cst_151 : f32 to vector<64x128xf32>
    %103 = arith.maximumf %101, %102 : vector<64x128xf32>
    %104 = arith.truncf %103 : vector<64x128xf32> to vector<64x128xbf16>
    %c0_152 = arith.constant 0 : index
    %c0_153 = arith.constant 0 : index
    %105 = vector.load %arg10[%c0_152, %c0_153] : memref<64x128xbf16, #tpu.memory_space<vmem>>, vector<64x128xbf16>
    tpu.vector_store %arg10[%c0_152, %c0_153], %104 {strides = array<i32>} : memref<64x128xbf16, #tpu.memory_space<vmem>>, vector<64x128xbf16>,
    %c0_154 = arith.constant 0 : index
    %c12 = arith.constant 12 : index
    %106 = vector.load %arg9[%c0_154, %c12] : memref<64x64xbf16, #tpu.memory_space<vmem>>, vector<64x4xbf16>
    %c0_155 = arith.constant 0 : index
    %c0_156 = arith.constant 0 : index
    %107 = vector.load %arg6[%c0_155, %c0_156] : memref<4x128xbf16, #tpu.memory_space<vmem>>, vector<4x128xbf16>
    %cst_157 = arith.constant dense<0.000000e+00> : vector<64x128xf32>
    %108 = tpu.matmul %106, %107, %cst_157 {dimension_numbers = #tpu.dot_dimension_numbers<[1], [0], [0], [1], [0, 0, 1, 1], [], []>} : vector<64x4xbf16>, vector<4x128xbf16>, vector<64x128xf32> -> vector<64x128xf32>
    %c0_158 = arith.constant 0 : index
    %c0_159 = arith.constant 0 : index
    %109 = vector.load %arg7[%c0_158, %c0_159] : memref<1x128xf32, #tpu.memory_space<vmem>>, vector<1x128xf32>
    %110 = vector.broadcast %109 : vector<1x128xf32> to vector<64x128xf32>
    %111 = arith.addf %108, %110 : vector<64x128xf32>
    %cst_160 = arith.constant 0.000000e+00 : bf16
    %112 = vector.broadcast %cst_160 : bf16 to vector<10x10x128xbf16>
    %c0_161 = arith.constant 0 : index
    %c0_162 = arith.constant 0 : index
    %c0_163 = arith.constant 0 : index
    %113 = vector.load %arg11[%c0_161, %c0_162, %c0_163] : memref<10x10x128xbf16, #tpu.memory_space<vmem>>, vector<10x10x128xbf16>
    tpu.vector_store %arg11[%c0_161, %c0_162, %c0_163], %112 {strides = array<i32>} : memref<10x10x128xbf16, #tpu.memory_space<vmem>>, vector<10x10x128xbf16>,
    %c0_164 = arith.constant 0 : index
    %c0_165 = arith.constant 0 : index
    %114 = vector.load %arg10[%c0_164, %c0_165] : memref<64x128xbf16, #tpu.memory_space<vmem>>, vector<8x128xbf16>
    %c1_166 = arith.constant 1 : index
    %c1_167 = arith.constant 1 : index
    %c0_168 = arith.constant 0 : index
    %115 = vector.load %arg11[%c1_166, %c1_167, %c0_168] : memref<10x10x128xbf16, #tpu.memory_space<vmem>>, vector<1x8x128xbf16>
    %116 = vector.shape_cast %115 : vector<1x8x128xbf16> to vector<8x128xbf16>
    %117 = vector.shape_cast %114 : vector<8x128xbf16> to vector<1x8x128xbf16>
    tpu.vector_store %arg11[%c1_166, %c1_167, %c0_168], %117 {strides = array<i32>} : memref<10x10x128xbf16, #tpu.memory_space<vmem>>, vector<1x8x128xbf16>,
    %c8_169 = arith.constant 8 : index
    %c0_170 = arith.constant 0 : index
    %118 = vector.load %arg10[%c8_169, %c0_170] : memref<64x128xbf16, #tpu.memory_space<vmem>>, vector<8x128xbf16>
    %c2_171 = arith.constant 2 : index
    %c1_172 = arith.constant 1 : index
    %c0_173 = arith.constant 0 : index
    %119 = vector.load %arg11[%c2_171, %c1_172, %c0_173] : memref<10x10x128xbf16, #tpu.memory_space<vmem>>, vector<1x8x128xbf16>
    %120 = vector.shape_cast %119 : vector<1x8x128xbf16> to vector<8x128xbf16>
    %121 = vector.shape_cast %118 : vector<8x128xbf16> to vector<1x8x128xbf16>
    tpu.vector_store %arg11[%c2_171, %c1_172, %c0_173], %121 {strides = array<i32>} : memref<10x10x128xbf16, #tpu.memory_space<vmem>>, vector<1x8x128xbf16>,
    %c16_174 = arith.constant 16 : index
    %c0_175 = arith.constant 0 : index
    %122 = vector.load %arg10[%c16_174, %c0_175] : memref<64x128xbf16, #tpu.memory_space<vmem>>, vector<8x128xbf16>
    %c3_176 = arith.constant 3 : index
    %c1_177 = arith.constant 1 : index
    %c0_178 = arith.constant 0 : index
    %123 = vector.load %arg11[%c3_176, %c1_177, %c0_178] : memref<10x10x128xbf16, #tpu.memory_space<vmem>>, vector<1x8x128xbf16>
    %124 = vector.shape_cast %123 : vector<1x8x128xbf16> to vector<8x128xbf16>
    %125 = vector.shape_cast %122 : vector<8x128xbf16> to vector<1x8x128xbf16>
    tpu.vector_store %arg11[%c3_176, %c1_177, %c0_178], %125 {strides = array<i32>} : memref<10x10x128xbf16, #tpu.memory_space<vmem>>, vector<1x8x128xbf16>,
    %c24_179 = arith.constant 24 : index
    %c0_180 = arith.constant 0 : index
    %126 = vector.load %arg10[%c24_179, %c0_180] : memref<64x128xbf16, #tpu.memory_space<vmem>>, vector<8x128xbf16>
    %c4_181 = arith.constant 4 : index
    %c1_182 = arith.constant 1 : index
    %c0_183 = arith.constant 0 : index
    %127 = vector.load %arg11[%c4_181, %c1_182, %c0_183] : memref<10x10x128xbf16, #tpu.memory_space<vmem>>, vector<1x8x128xbf16>
    %128 = vector.shape_cast %127 : vector<1x8x128xbf16> to vector<8x128xbf16>
    %129 = vector.shape_cast %126 : vector<8x128xbf16> to vector<1x8x128xbf16>
    tpu.vector_store %arg11[%c4_181, %c1_182, %c0_183], %129 {strides = array<i32>} : memref<10x10x128xbf16, #tpu.memory_space<vmem>>, vector<1x8x128xbf16>,
    %c32_184 = arith.constant 32 : index
    %c0_185 = arith.constant 0 : index
    %130 = vector.load %arg10[%c32_184, %c0_185] : memref<64x128xbf16, #tpu.memory_space<vmem>>, vector<8x128xbf16>
    %c5_186 = arith.constant 5 : index
    %c1_187 = arith.constant 1 : index
    %c0_188 = arith.constant 0 : index
    %131 = vector.load %arg11[%c5_186, %c1_187, %c0_188] : memref<10x10x128xbf16, #tpu.memory_space<vmem>>, vector<1x8x128xbf16>
    %132 = vector.shape_cast %131 : vector<1x8x128xbf16> to vector<8x128xbf16>
    %133 = vector.shape_cast %130 : vector<8x128xbf16> to vector<1x8x128xbf16>
    tpu.vector_store %arg11[%c5_186, %c1_187, %c0_188], %133 {strides = array<i32>} : memref<10x10x128xbf16, #tpu.memory_space<vmem>>, vector<1x8x128xbf16>,
    %c40_189 = arith.constant 40 : index
    %c0_190 = arith.constant 0 : index
    %134 = vector.load %arg10[%c40_189, %c0_190] : memref<64x128xbf16, #tpu.memory_space<vmem>>, vector<8x128xbf16>
    %c6_191 = arith.constant 6 : index
    %c1_192 = arith.constant 1 : index
    %c0_193 = arith.constant 0 : index
    %135 = vector.load %arg11[%c6_191, %c1_192, %c0_193] : memref<10x10x128xbf16, #tpu.memory_space<vmem>>, vector<1x8x128xbf16>
    %136 = vector.shape_cast %135 : vector<1x8x128xbf16> to vector<8x128xbf16>
    %137 = vector.shape_cast %134 : vector<8x128xbf16> to vector<1x8x128xbf16>
    tpu.vector_store %arg11[%c6_191, %c1_192, %c0_193], %137 {strides = array<i32>} : memref<10x10x128xbf16, #tpu.memory_space<vmem>>, vector<1x8x128xbf16>,
    %c48_194 = arith.constant 48 : index
    %c0_195 = arith.constant 0 : index
    %138 = vector.load %arg10[%c48_194, %c0_195] : memref<64x128xbf16, #tpu.memory_space<vmem>>, vector<8x128xbf16>
    %c7_196 = arith.constant 7 : index
    %c1_197 = arith.constant 1 : index
    %c0_198 = arith.constant 0 : index
    %139 = vector.load %arg11[%c7_196, %c1_197, %c0_198] : memref<10x10x128xbf16, #tpu.memory_space<vmem>>, vector<1x8x128xbf16>
    %140 = vector.shape_cast %139 : vector<1x8x128xbf16> to vector<8x128xbf16>
    %141 = vector.shape_cast %138 : vector<8x128xbf16> to vector<1x8x128xbf16>
    tpu.vector_store %arg11[%c7_196, %c1_197, %c0_198], %141 {strides = array<i32>} : memref<10x10x128xbf16, #tpu.memory_space<vmem>>, vector<1x8x128xbf16>,
    %c56_199 = arith.constant 56 : index
    %c0_200 = arith.constant 0 : index
    %142 = vector.load %arg10[%c56_199, %c0_200] : memref<64x128xbf16, #tpu.memory_space<vmem>>, vector<8x128xbf16>
    %c8_201 = arith.constant 8 : index
    %c1_202 = arith.constant 1 : index
    %c0_203 = arith.constant 0 : index
    %143 = vector.load %arg11[%c8_201, %c1_202, %c0_203] : memref<10x10x128xbf16, #tpu.memory_space<vmem>>, vector<1x8x128xbf16>
    %144 = vector.shape_cast %143 : vector<1x8x128xbf16> to vector<8x128xbf16>
    %145 = vector.shape_cast %142 : vector<8x128xbf16> to vector<1x8x128xbf16>
    tpu.vector_store %arg11[%c8_201, %c1_202, %c0_203], %145 {strides = array<i32>} : memref<10x10x128xbf16, #tpu.memory_space<vmem>>, vector<1x8x128xbf16>,
    %c0_204 = arith.constant 0 : index
    %c0_205 = arith.constant 0 : index
    %c0_206 = arith.constant 0 : index
    %146 = vector.load %arg11[%c0_204, %c0_205, %c0_206] : memref<10x10x128xbf16, #tpu.memory_space<vmem>>, vector<1x8x128xbf16>
    %147 = vector.shape_cast %146 : vector<1x8x128xbf16> to vector<8x128xbf16>
    %c0_207 = arith.constant 0 : index
    %c0_208 = arith.constant 0 : index
    %148 = vector.load %arg12[%c0_207, %c0_208] : memref<64x1152xbf16, #tpu.memory_space<vmem>>, vector<8x128xbf16>
    tpu.vector_store %arg12[%c0_207, %c0_208], %147 {strides = array<i32>} : memref<64x1152xbf16, #tpu.memory_space<vmem>>, vector<8x128xbf16>,
    %c0_209 = arith.constant 0 : index
    %c1_210 = arith.constant 1 : index
    %c0_211 = arith.constant 0 : index
    %149 = vector.load %arg11[%c0_209, %c1_210, %c0_211] : memref<10x10x128xbf16, #tpu.memory_space<vmem>>, vector<1x8x128xbf16>
    %150 = vector.shape_cast %149 : vector<1x8x128xbf16> to vector<8x128xbf16>
    %c0_212 = arith.constant 0 : index
    %c128 = arith.constant 128 : index
    %151 = vector.load %arg12[%c0_212, %c128] : memref<64x1152xbf16, #tpu.memory_space<vmem>>, vector<8x128xbf16>
    tpu.vector_store %arg12[%c0_212, %c128], %150 {strides = array<i32>} : memref<64x1152xbf16, #tpu.memory_space<vmem>>, vector<8x128xbf16>,
    %c0_213 = arith.constant 0 : index
    %c2_214 = arith.constant 2 : index
    %c0_215 = arith.constant 0 : index
    %152 = vector.load %arg11[%c0_213, %c2_214, %c0_215] : memref<10x10x128xbf16, #tpu.memory_space<vmem>>, vector<1x8x128xbf16>
    %153 = vector.shape_cast %152 : vector<1x8x128xbf16> to vector<8x128xbf16>
    %c0_216 = arith.constant 0 : index
    %c256 = arith.constant 256 : index
    %154 = vector.load %arg12[%c0_216, %c256] : memref<64x1152xbf16, #tpu.memory_space<vmem>>, vector<8x128xbf16>
    tpu.vector_store %arg12[%c0_216, %c256], %153 {strides = array<i32>} : memref<64x1152xbf16, #tpu.memory_space<vmem>>, vector<8x128xbf16>,
    %c1_217 = arith.constant 1 : index
    %c0_218 = arith.constant 0 : index
    %c0_219 = arith.constant 0 : index
    %155 = vector.load %arg11[%c1_217, %c0_218, %c0_219] : memref<10x10x128xbf16, #tpu.memory_space<vmem>>, vector<1x8x128xbf16>
    %156 = vector.shape_cast %155 : vector<1x8x128xbf16> to vector<8x128xbf16>
    %c0_220 = arith.constant 0 : index
    %c384 = arith.constant 384 : index
    %157 = vector.load %arg12[%c0_220, %c384] : memref<64x1152xbf16, #tpu.memory_space<vmem>>, vector<8x128xbf16>
    tpu.vector_store %arg12[%c0_220, %c384], %156 {strides = array<i32>} : memref<64x1152xbf16, #tpu.memory_space<vmem>>, vector<8x128xbf16>,
    %c1_221 = arith.constant 1 : index
    %c1_222 = arith.constant 1 : index
    %c0_223 = arith.constant 0 : index
    %158 = vector.load %arg11[%c1_221, %c1_222, %c0_223] : memref<10x10x128xbf16, #tpu.memory_space<vmem>>, vector<1x8x128xbf16>
    %159 = vector.shape_cast %158 : vector<1x8x128xbf16> to vector<8x128xbf16>
    %c0_224 = arith.constant 0 : index
    %c512 = arith.constant 512 : index
    %160 = vector.load %arg12[%c0_224, %c512] : memref<64x1152xbf16, #tpu.memory_space<vmem>>, vector<8x128xbf16>
    tpu.vector_store %arg12[%c0_224, %c512], %159 {strides = array<i32>} : memref<64x1152xbf16, #tpu.memory_space<vmem>>, vector<8x128xbf16>,
    %c1_225 = arith.constant 1 : index
    %c2_226 = arith.constant 2 : index
    %c0_227 = arith.constant 0 : index
    %161 = vector.load %arg11[%c1_225, %c2_226, %c0_227] : memref<10x10x128xbf16, #tpu.memory_space<vmem>>, vector<1x8x128xbf16>
    %162 = vector.shape_cast %161 : vector<1x8x128xbf16> to vector<8x128xbf16>
    %c0_228 = arith.constant 0 : index
    %c640 = arith.constant 640 : index
    %163 = vector.load %arg12[%c0_228, %c640] : memref<64x1152xbf16, #tpu.memory_space<vmem>>, vector<8x128xbf16>
    tpu.vector_store %arg12[%c0_228, %c640], %162 {strides = array<i32>} : memref<64x1152xbf16, #tpu.memory_space<vmem>>, vector<8x128xbf16>,
    %c2_229 = arith.constant 2 : index
    %c0_230 = arith.constant 0 : index
    %c0_231 = arith.constant 0 : index
    %164 = vector.load %arg11[%c2_229, %c0_230, %c0_231] : memref<10x10x128xbf16, #tpu.memory_space<vmem>>, vector<1x8x128xbf16>
    %165 = vector.shape_cast %164 : vector<1x8x128xbf16> to vector<8x128xbf16>
    %c0_232 = arith.constant 0 : index
    %c768 = arith.constant 768 : index
    %166 = vector.load %arg12[%c0_232, %c768] : memref<64x1152xbf16, #tpu.memory_space<vmem>>, vector<8x128xbf16>
    tpu.vector_store %arg12[%c0_232, %c768], %165 {strides = array<i32>} : memref<64x1152xbf16, #tpu.memory_space<vmem>>, vector<8x128xbf16>,
    %c2_233 = arith.constant 2 : index
    %c1_234 = arith.constant 1 : index
    %c0_235 = arith.constant 0 : index
    %167 = vector.load %arg11[%c2_233, %c1_234, %c0_235] : memref<10x10x128xbf16, #tpu.memory_space<vmem>>, vector<1x8x128xbf16>
    %168 = vector.shape_cast %167 : vector<1x8x128xbf16> to vector<8x128xbf16>
    %c0_236 = arith.constant 0 : index
    %c896 = arith.constant 896 : index
    %169 = vector.load %arg12[%c0_236, %c896] : memref<64x1152xbf16, #tpu.memory_space<vmem>>, vector<8x128xbf16>
    tpu.vector_store %arg12[%c0_236, %c896], %168 {strides = array<i32>} : memref<64x1152xbf16, #tpu.memory_space<vmem>>, vector<8x128xbf16>,
    %c2_237 = arith.constant 2 : index
    %c2_238 = arith.constant 2 : index
    %c0_239 = arith.constant 0 : index
    %170 = vector.load %arg11[%c2_237, %c2_238, %c0_239] : memref<10x10x128xbf16, #tpu.memory_space<vmem>>, vector<1x8x128xbf16>
    %171 = vector.shape_cast %170 : vector<1x8x128xbf16> to vector<8x128xbf16>
    %c0_240 = arith.constant 0 : index
    %c1024 = arith.constant 1024 : index
    %172 = vector.load %arg12[%c0_240, %c1024] : memref<64x1152xbf16, #tpu.memory_space<vmem>>, vector<8x128xbf16>
    tpu.vector_store %arg12[%c0_240, %c1024], %171 {strides = array<i32>} : memref<64x1152xbf16, #tpu.memory_space<vmem>>, vector<8x128xbf16>,
    %c1_241 = arith.constant 1 : index
    %c0_242 = arith.constant 0 : index
    %c0_243 = arith.constant 0 : index
    %173 = vector.load %arg11[%c1_241, %c0_242, %c0_243] : memref<10x10x128xbf16, #tpu.memory_space<vmem>>, vector<1x8x128xbf16>
    %174 = vector.shape_cast %173 : vector<1x8x128xbf16> to vector<8x128xbf16>
    %c8_244 = arith.constant 8 : index
    %c0_245 = arith.constant 0 : index
    %175 = vector.load %arg12[%c8_244, %c0_245] : memref<64x1152xbf16, #tpu.memory_space<vmem>>, vector<8x128xbf16>
    tpu.vector_store %arg12[%c8_244, %c0_245], %174 {strides = array<i32>} : memref<64x1152xbf16, #tpu.memory_space<vmem>>, vector<8x128xbf16>,
    %c1_246 = arith.constant 1 : index
    %c1_247 = arith.constant 1 : index
    %c0_248 = arith.constant 0 : index
    %176 = vector.load %arg11[%c1_246, %c1_247, %c0_248] : memref<10x10x128xbf16, #tpu.memory_space<vmem>>, vector<1x8x128xbf16>
    %177 = vector.shape_cast %176 : vector<1x8x128xbf16> to vector<8x128xbf16>
    %c8_249 = arith.constant 8 : index
    %c128_250 = arith.constant 128 : index
    %178 = vector.load %arg12[%c8_249, %c128_250] : memref<64x1152xbf16, #tpu.memory_space<vmem>>, vector<8x128xbf16>
    tpu.vector_store %arg12[%c8_249, %c128_250], %177 {strides = array<i32>} : memref<64x1152xbf16, #tpu.memory_space<vmem>>, vector<8x128xbf16>,
    %c1_251 = arith.constant 1 : index
    %c2_252 = arith.constant 2 : index
    %c0_253 = arith.constant 0 : index
    %179 = vector.load %arg11[%c1_251, %c2_252, %c0_253] : memref<10x10x128xbf16, #tpu.memory_space<vmem>>, vector<1x8x128xbf16>
    %180 = vector.shape_cast %179 : vector<1x8x128xbf16> to vector<8x128xbf16>
    %c8_254 = arith.constant 8 : index
    %c256_255 = arith.constant 256 : index
    %181 = vector.load %arg12[%c8_254, %c256_255] : memref<64x1152xbf16, #tpu.memory_space<vmem>>, vector<8x128xbf16>
    tpu.vector_store %arg12[%c8_254, %c256_255], %180 {strides = array<i32>} : memref<64x1152xbf16, #tpu.memory_space<vmem>>, vector<8x128xbf16>,
    %c2_256 = arith.constant 2 : index
    %c0_257 = arith.constant 0 : index
    %c0_258 = arith.constant 0 : index
    %182 = vector.load %arg11[%c2_256, %c0_257, %c0_258] : memref<10x10x128xbf16, #tpu.memory_space<vmem>>, vector<1x8x128xbf16>
    %183 = vector.shape_cast %182 : vector<1x8x128xbf16> to vector<8x128xbf16>
    %c8_259 = arith.constant 8 : index
    %c384_260 = arith.constant 384 : index
    %184 = vector.load %arg12[%c8_259, %c384_260] : memref<64x1152xbf16, #tpu.memory_space<vmem>>, vector<8x128xbf16>
    tpu.vector_store %arg12[%c8_259, %c384_260], %183 {strides = array<i32>} : memref<64x1152xbf16, #tpu.memory_space<vmem>>, vector<8x128xbf16>,
    %c2_261 = arith.constant 2 : index
    %c1_262 = arith.constant 1 : index
    %c0_263 = arith.constant 0 : index
    %185 = vector.load %arg11[%c2_261, %c1_262, %c0_263] : memref<10x10x128xbf16, #tpu.memory_space<vmem>>, vector<1x8x128xbf16>
    %186 = vector.shape_cast %185 : vector<1x8x128xbf16> to vector<8x128xbf16>
    %c8_264 = arith.constant 8 : index
    %c512_265 = arith.constant 512 : index
    %187 = vector.load %arg12[%c8_264, %c512_265] : memref<64x1152xbf16, #tpu.memory_space<vmem>>, vector<8x128xbf16>
    tpu.vector_store %arg12[%c8_264, %c512_265], %186 {strides = array<i32>} : memref<64x1152xbf16, #tpu.memory_space<vmem>>, vector<8x128xbf16>,
    %c2_266 = arith.constant 2 : index
    %c2_267 = arith.constant 2 : index
    %c0_268 = arith.constant 0 : index
    %188 = vector.load %arg11[%c2_266, %c2_267, %c0_268] : memref<10x10x128xbf16, #tpu.memory_space<vmem>>, vector<1x8x128xbf16>
    %189 = vector.shape_cast %188 : vector<1x8x128xbf16> to vector<8x128xbf16>
    %c8_269 = arith.constant 8 : index
    %c640_270 = arith.constant 640 : index
    %190 = vector.load %arg12[%c8_269, %c640_270] : memref<64x1152xbf16, #tpu.memory_space<vmem>>, vector<8x128xbf16>
    tpu.vector_store %arg12[%c8_269, %c640_270], %189 {strides = array<i32>} : memref<64x1152xbf16, #tpu.memory_space<vmem>>, vector<8x128xbf16>,
    %c3_271 = arith.constant 3 : index
    %c0_272 = arith.constant 0 : index
    %c0_273 = arith.constant 0 : index
    %191 = vector.load %arg11[%c3_271, %c0_272, %c0_273] : memref<10x10x128xbf16, #tpu.memory_space<vmem>>, vector<1x8x128xbf16>
    %192 = vector.shape_cast %191 : vector<1x8x128xbf16> to vector<8x128xbf16>
    %c8_274 = arith.constant 8 : index
    %c768_275 = arith.constant 768 : index
    %193 = vector.load %arg12[%c8_274, %c768_275] : memref<64x1152xbf16, #tpu.memory_space<vmem>>, vector<8x128xbf16>
    tpu.vector_store %arg12[%c8_274, %c768_275], %192 {strides = array<i32>} : memref<64x1152xbf16, #tpu.memory_space<vmem>>, vector<8x128xbf16>,
    %c3_276 = arith.constant 3 : index
    %c1_277 = arith.constant 1 : index
    %c0_278 = arith.constant 0 : index
    %194 = vector.load %arg11[%c3_276, %c1_277, %c0_278] : memref<10x10x128xbf16, #tpu.memory_space<vmem>>, vector<1x8x128xbf16>
    %195 = vector.shape_cast %194 : vector<1x8x128xbf16> to vector<8x128xbf16>
    %c8_279 = arith.constant 8 : index
    %c896_280 = arith.constant 896 : index
    %196 = vector.load %arg12[%c8_279, %c896_280] : memref<64x1152xbf16, #tpu.memory_space<vmem>>, vector<8x128xbf16>
    tpu.vector_store %arg12[%c8_279, %c896_280], %195 {strides = array<i32>} : memref<64x1152xbf16, #tpu.memory_space<vmem>>, vector<8x128xbf16>,
    %c3_281 = arith.constant 3 : index
    %c2_282 = arith.constant 2 : index
    %c0_283 = arith.constant 0 : index
    %197 = vector.load %arg11[%c3_281, %c2_282, %c0_283] : memref<10x10x128xbf16, #tpu.memory_space<vmem>>, vector<1x8x128xbf16>
    %198 = vector.shape_cast %197 : vector<1x8x128xbf16> to vector<8x128xbf16>
    %c8_284 = arith.constant 8 : index
    %c1024_285 = arith.constant 1024 : index
    %199 = vector.load %arg12[%c8_284, %c1024_285] : memref<64x1152xbf16, #tpu.memory_space<vmem>>, vector<8x128xbf16>
    tpu.vector_store %arg12[%c8_284, %c1024_285], %198 {strides = array<i32>} : memref<64x1152xbf16, #tpu.memory_space<vmem>>, vector<8x128xbf16>,
    %c2_286 = arith.constant 2 : index
    %c0_287 = arith.constant 0 : index
    %c0_288 = arith.constant 0 : index
    %200 = vector.load %arg11[%c2_286, %c0_287, %c0_288] : memref<10x10x128xbf16, #tpu.memory_space<vmem>>, vector<1x8x128xbf16>
    %201 = vector.shape_cast %200 : vector<1x8x128xbf16> to vector<8x128xbf16>
    %c16_289 = arith.constant 16 : index
    %c0_290 = arith.constant 0 : index
    %202 = vector.load %arg12[%c16_289, %c0_290] : memref<64x1152xbf16, #tpu.memory_space<vmem>>, vector<8x128xbf16>
    tpu.vector_store %arg12[%c16_289, %c0_290], %201 {strides = array<i32>} : memref<64x1152xbf16, #tpu.memory_space<vmem>>, vector<8x128xbf16>,
    %c2_291 = arith.constant 2 : index
    %c1_292 = arith.constant 1 : index
    %c0_293 = arith.constant 0 : index
    %203 = vector.load %arg11[%c2_291, %c1_292, %c0_293] : memref<10x10x128xbf16, #tpu.memory_space<vmem>>, vector<1x8x128xbf16>
    %204 = vector.shape_cast %203 : vector<1x8x128xbf16> to vector<8x128xbf16>
    %c16_294 = arith.constant 16 : index
    %c128_295 = arith.constant 128 : index
    %205 = vector.load %arg12[%c16_294, %c128_295] : memref<64x1152xbf16, #tpu.memory_space<vmem>>, vector<8x128xbf16>
    tpu.vector_store %arg12[%c16_294, %c128_295], %204 {strides = array<i32>} : memref<64x1152xbf16, #tpu.memory_space<vmem>>, vector<8x128xbf16>,
    %c2_296 = arith.constant 2 : index
    %c2_297 = arith.constant 2 : index
    %c0_298 = arith.constant 0 : index
    %206 = vector.load %arg11[%c2_296, %c2_297, %c0_298] : memref<10x10x128xbf16, #tpu.memory_space<vmem>>, vector<1x8x128xbf16>
    %207 = vector.shape_cast %206 : vector<1x8x128xbf16> to vector<8x128xbf16>
    %c16_299 = arith.constant 16 : index
    %c256_300 = arith.constant 256 : index
    %208 = vector.load %arg12[%c16_299, %c256_300] : memref<64x1152xbf16, #tpu.memory_space<vmem>>, vector<8x128xbf16>
    tpu.vector_store %arg12[%c16_299, %c256_300], %207 {strides = array<i32>} : memref<64x1152xbf16, #tpu.memory_space<vmem>>, vector<8x128xbf16>,
    %c3_301 = arith.constant 3 : index
    %c0_302 = arith.constant 0 : index
    %c0_303 = arith.constant 0 : index
    %209 = vector.load %arg11[%c3_301, %c0_302, %c0_303] : memref<10x10x128xbf16, #tpu.memory_space<vmem>>, vector<1x8x128xbf16>
    %210 = vector.shape_cast %209 : vector<1x8x128xbf16> to vector<8x128xbf16>
    %c16_304 = arith.constant 16 : index
    %c384_305 = arith.constant 384 : index
    %211 = vector.load %arg12[%c16_304, %c384_305] : memref<64x1152xbf16, #tpu.memory_space<vmem>>, vector<8x128xbf16>
    tpu.vector_store %arg12[%c16_304, %c384_305], %210 {strides = array<i32>} : memref<64x1152xbf16, #tpu.memory_space<vmem>>, vector<8x128xbf16>,
    %c3_306 = arith.constant 3 : index
    %c1_307 = arith.constant 1 : index
    %c0_308 = arith.constant 0 : index
    %212 = vector.load %arg11[%c3_306, %c1_307, %c0_308] : memref<10x10x128xbf16, #tpu.memory_space<vmem>>, vector<1x8x128xbf16>
    %213 = vector.shape_cast %212 : vector<1x8x128xbf16> to vector<8x128xbf16>
    %c16_309 = arith.constant 16 : index
    %c512_310 = arith.constant 512 : index
    %214 = vector.load %arg12[%c16_309, %c512_310] : memref<64x1152xbf16, #tpu.memory_space<vmem>>, vector<8x128xbf16>
    tpu.vector_store %arg12[%c16_309, %c512_310], %213 {strides = array<i32>} : memref<64x1152xbf16, #tpu.memory_space<vmem>>, vector<8x128xbf16>,
    %c3_311 = arith.constant 3 : index
    %c2_312 = arith.constant 2 : index
    %c0_313 = arith.constant 0 : index
    %215 = vector.load %arg11[%c3_311, %c2_312, %c0_313] : memref<10x10x128xbf16, #tpu.memory_space<vmem>>, vector<1x8x128xbf16>
    %216 = vector.shape_cast %215 : vector<1x8x128xbf16> to vector<8x128xbf16>
    %c16_314 = arith.constant 16 : index
    %c640_315 = arith.constant 640 : index
    %217 = vector.load %arg12[%c16_314, %c640_315] : memref<64x1152xbf16, #tpu.memory_space<vmem>>, vector<8x128xbf16>
    tpu.vector_store %arg12[%c16_314, %c640_315], %216 {strides = array<i32>} : memref<64x1152xbf16, #tpu.memory_space<vmem>>, vector<8x128xbf16>,
    %c4_316 = arith.constant 4 : index
    %c0_317 = arith.constant 0 : index
    %c0_318 = arith.constant 0 : index
    %218 = vector.load %arg11[%c4_316, %c0_317, %c0_318] : memref<10x10x128xbf16, #tpu.memory_space<vmem>>, vector<1x8x128xbf16>
    %219 = vector.shape_cast %218 : vector<1x8x128xbf16> to vector<8x128xbf16>
    %c16_319 = arith.constant 16 : index
    %c768_320 = arith.constant 768 : index
    %220 = vector.load %arg12[%c16_319, %c768_320] : memref<64x1152xbf16, #tpu.memory_space<vmem>>, vector<8x128xbf16>
    tpu.vector_store %arg12[%c16_319, %c768_320], %219 {strides = array<i32>} : memref<64x1152xbf16, #tpu.memory_space<vmem>>, vector<8x128xbf16>,
    %c4_321 = arith.constant 4 : index
    %c1_322 = arith.constant 1 : index
    %c0_323 = arith.constant 0 : index
    %221 = vector.load %arg11[%c4_321, %c1_322, %c0_323] : memref<10x10x128xbf16, #tpu.memory_space<vmem>>, vector<1x8x128xbf16>
    %222 = vector.shape_cast %221 : vector<1x8x128xbf16> to vector<8x128xbf16>
    %c16_324 = arith.constant 16 : index
    %c896_325 = arith.constant 896 : index
    %223 = vector.load %arg12[%c16_324, %c896_325] : memref<64x1152xbf16, #tpu.memory_space<vmem>>, vector<8x128xbf16>
    tpu.vector_store %arg12[%c16_324, %c896_325], %222 {strides = array<i32>} : memref<64x1152xbf16, #tpu.memory_space<vmem>>, vector<8x128xbf16>,
    %c4_326 = arith.constant 4 : index
    %c2_327 = arith.constant 2 : index
    %c0_328 = arith.constant 0 : index
    %224 = vector.load %arg11[%c4_326, %c2_327, %c0_328] : memref<10x10x128xbf16, #tpu.memory_space<vmem>>, vector<1x8x128xbf16>
    %225 = vector.shape_cast %224 : vector<1x8x128xbf16> to vector<8x128xbf16>
    %c16_329 = arith.constant 16 : index
    %c1024_330 = arith.constant 1024 : index
    %226 = vector.load %arg12[%c16_329, %c1024_330] : memref<64x1152xbf16, #tpu.memory_space<vmem>>, vector<8x128xbf16>
    tpu.vector_store %arg12[%c16_329, %c1024_330], %225 {strides = array<i32>} : memref<64x1152xbf16, #tpu.memory_space<vmem>>, vector<8x128xbf16>,
    %c3_331 = arith.constant 3 : index
    %c0_332 = arith.constant 0 : index
    %c0_333 = arith.constant 0 : index
    %227 = vector.load %arg11[%c3_331, %c0_332, %c0_333] : memref<10x10x128xbf16, #tpu.memory_space<vmem>>, vector<1x8x128xbf16>
    %228 = vector.shape_cast %227 : vector<1x8x128xbf16> to vector<8x128xbf16>
    %c24_334 = arith.constant 24 : index
    %c0_335 = arith.constant 0 : index
    %229 = vector.load %arg12[%c24_334, %c0_335] : memref<64x1152xbf16, #tpu.memory_space<vmem>>, vector<8x128xbf16>
    tpu.vector_store %arg12[%c24_334, %c0_335], %228 {strides = array<i32>} : memref<64x1152xbf16, #tpu.memory_space<vmem>>, vector<8x128xbf16>,
    %c3_336 = arith.constant 3 : index
    %c1_337 = arith.constant 1 : index
    %c0_338 = arith.constant 0 : index
    %230 = vector.load %arg11[%c3_336, %c1_337, %c0_338] : memref<10x10x128xbf16, #tpu.memory_space<vmem>>, vector<1x8x128xbf16>
    %231 = vector.shape_cast %230 : vector<1x8x128xbf16> to vector<8x128xbf16>
    %c24_339 = arith.constant 24 : index
    %c128_340 = arith.constant 128 : index
    %232 = vector.load %arg12[%c24_339, %c128_340] : memref<64x1152xbf16, #tpu.memory_space<vmem>>, vector<8x128xbf16>
    tpu.vector_store %arg12[%c24_339, %c128_340], %231 {strides = array<i32>} : memref<64x1152xbf16, #tpu.memory_space<vmem>>, vector<8x128xbf16>,
    %c3_341 = arith.constant 3 : index
    %c2_342 = arith.constant 2 : index
    %c0_343 = arith.constant 0 : index
    %233 = vector.load %arg11[%c3_341, %c2_342, %c0_343] : memref<10x10x128xbf16, #tpu.memory_space<vmem>>, vector<1x8x128xbf16>
    %234 = vector.shape_cast %233 : vector<1x8x128xbf16> to vector<8x128xbf16>
    %c24_344 = arith.constant 24 : index
    %c256_345 = arith.constant 256 : index
    %235 = vector.load %arg12[%c24_344, %c256_345] : memref<64x1152xbf16, #tpu.memory_space<vmem>>, vector<8x128xbf16>
    tpu.vector_store %arg12[%c24_344, %c256_345], %234 {strides = array<i32>} : memref<64x1152xbf16, #tpu.memory_space<vmem>>, vector<8x128xbf16>,
    %c4_346 = arith.constant 4 : index
    %c0_347 = arith.constant 0 : index
    %c0_348 = arith.constant 0 : index
    %236 = vector.load %arg11[%c4_346, %c0_347, %c0_348] : memref<10x10x128xbf16, #tpu.memory_space<vmem>>, vector<1x8x128xbf16>
    %237 = vector.shape_cast %236 : vector<1x8x128xbf16> to vector<8x128xbf16>
    %c24_349 = arith.constant 24 : index
    %c384_350 = arith.constant 384 : index
    %238 = vector.load %arg12[%c24_349, %c384_350] : memref<64x1152xbf16, #tpu.memory_space<vmem>>, vector<8x128xbf16>
    tpu.vector_store %arg12[%c24_349, %c384_350], %237 {strides = array<i32>} : memref<64x1152xbf16, #tpu.memory_space<vmem>>, vector<8x128xbf16>,
    %c4_351 = arith.constant 4 : index
    %c1_352 = arith.constant 1 : index
    %c0_353 = arith.constant 0 : index
    %239 = vector.load %arg11[%c4_351, %c1_352, %c0_353] : memref<10x10x128xbf16, #tpu.memory_space<vmem>>, vector<1x8x128xbf16>
    %240 = vector.shape_cast %239 : vector<1x8x128xbf16> to vector<8x128xbf16>
    %c24_354 = arith.constant 24 : index
    %c512_355 = arith.constant 512 : index
    %241 = vector.load %arg12[%c24_354, %c512_355] : memref<64x1152xbf16, #tpu.memory_space<vmem>>, vector<8x128xbf16>
    tpu.vector_store %arg12[%c24_354, %c512_355], %240 {strides = array<i32>} : memref<64x1152xbf16, #tpu.memory_space<vmem>>, vector<8x128xbf16>,
    %c4_356 = arith.constant 4 : index
    %c2_357 = arith.constant 2 : index
    %c0_358 = arith.constant 0 : index
    %242 = vector.load %arg11[%c4_356, %c2_357, %c0_358] : memref<10x10x128xbf16, #tpu.memory_space<vmem>>, vector<1x8x128xbf16>
    %243 = vector.shape_cast %242 : vector<1x8x128xbf16> to vector<8x128xbf16>
    %c24_359 = arith.constant 24 : index
    %c640_360 = arith.constant 640 : index
    %244 = vector.load %arg12[%c24_359, %c640_360] : memref<64x1152xbf16, #tpu.memory_space<vmem>>, vector<8x128xbf16>
    tpu.vector_store %arg12[%c24_359, %c640_360], %243 {strides = array<i32>} : memref<64x1152xbf16, #tpu.memory_space<vmem>>, vector<8x128xbf16>,
    %c5_361 = arith.constant 5 : index
    %c0_362 = arith.constant 0 : index
    %c0_363 = arith.constant 0 : index
    %245 = vector.load %arg11[%c5_361, %c0_362, %c0_363] : memref<10x10x128xbf16, #tpu.memory_space<vmem>>, vector<1x8x128xbf16>
    %246 = vector.shape_cast %245 : vector<1x8x128xbf16> to vector<8x128xbf16>
    %c24_364 = arith.constant 24 : index
    %c768_365 = arith.constant 768 : index
    %247 = vector.load %arg12[%c24_364, %c768_365] : memref<64x1152xbf16, #tpu.memory_space<vmem>>, vector<8x128xbf16>
    tpu.vector_store %arg12[%c24_364, %c768_365], %246 {strides = array<i32>} : memref<64x1152xbf16, #tpu.memory_space<vmem>>, vector<8x128xbf16>,
    %c5_366 = arith.constant 5 : index
    %c1_367 = arith.constant 1 : index
    %c0_368 = arith.constant 0 : index
    %248 = vector.load %arg11[%c5_366, %c1_367, %c0_368] : memref<10x10x128xbf16, #tpu.memory_space<vmem>>, vector<1x8x128xbf16>
    %249 = vector.shape_cast %248 : vector<1x8x128xbf16> to vector<8x128xbf16>
    %c24_369 = arith.constant 24 : index
    %c896_370 = arith.constant 896 : index
    %250 = vector.load %arg12[%c24_369, %c896_370] : memref<64x1152xbf16, #tpu.memory_space<vmem>>, vector<8x128xbf16>
    tpu.vector_store %arg12[%c24_369, %c896_370], %249 {strides = array<i32>} : memref<64x1152xbf16, #tpu.memory_space<vmem>>, vector<8x128xbf16>,
    %c5_371 = arith.constant 5 : index
    %c2_372 = arith.constant 2 : index
    %c0_373 = arith.constant 0 : index
    %251 = vector.load %arg11[%c5_371, %c2_372, %c0_373] : memref<10x10x128xbf16, #tpu.memory_space<vmem>>, vector<1x8x128xbf16>
    %252 = vector.shape_cast %251 : vector<1x8x128xbf16> to vector<8x128xbf16>
    %c24_374 = arith.constant 24 : index
    %c1024_375 = arith.constant 1024 : index
    %253 = vector.load %arg12[%c24_374, %c1024_375] : memref<64x1152xbf16, #tpu.memory_space<vmem>>, vector<8x128xbf16>
    tpu.vector_store %arg12[%c24_374, %c1024_375], %252 {strides = array<i32>} : memref<64x1152xbf16, #tpu.memory_space<vmem>>, vector<8x128xbf16>,
    %c4_376 = arith.constant 4 : index
    %c0_377 = arith.constant 0 : index
    %c0_378 = arith.constant 0 : index
    %254 = vector.load %arg11[%c4_376, %c0_377, %c0_378] : memref<10x10x128xbf16, #tpu.memory_space<vmem>>, vector<1x8x128xbf16>
    %255 = vector.shape_cast %254 : vector<1x8x128xbf16> to vector<8x128xbf16>
    %c32_379 = arith.constant 32 : index
    %c0_380 = arith.constant 0 : index
    %256 = vector.load %arg12[%c32_379, %c0_380] : memref<64x1152xbf16, #tpu.memory_space<vmem>>, vector<8x128xbf16>
    tpu.vector_store %arg12[%c32_379, %c0_380], %255 {strides = array<i32>} : memref<64x1152xbf16, #tpu.memory_space<vmem>>, vector<8x128xbf16>,
    %c4_381 = arith.constant 4 : index
    %c1_382 = arith.constant 1 : index
    %c0_383 = arith.constant 0 : index
    %257 = vector.load %arg11[%c4_381, %c1_382, %c0_383] : memref<10x10x128xbf16, #tpu.memory_space<vmem>>, vector<1x8x128xbf16>
    %258 = vector.shape_cast %257 : vector<1x8x128xbf16> to vector<8x128xbf16>
    %c32_384 = arith.constant 32 : index
    %c128_385 = arith.constant 128 : index
    %259 = vector.load %arg12[%c32_384, %c128_385] : memref<64x1152xbf16, #tpu.memory_space<vmem>>, vector<8x128xbf16>
    tpu.vector_store %arg12[%c32_384, %c128_385], %258 {strides = array<i32>} : memref<64x1152xbf16, #tpu.memory_space<vmem>>, vector<8x128xbf16>,
    %c4_386 = arith.constant 4 : index
    %c2_387 = arith.constant 2 : index
    %c0_388 = arith.constant 0 : index
    %260 = vector.load %arg11[%c4_386, %c2_387, %c0_388] : memref<10x10x128xbf16, #tpu.memory_space<vmem>>, vector<1x8x128xbf16>
    %261 = vector.shape_cast %260 : vector<1x8x128xbf16> to vector<8x128xbf16>
    %c32_389 = arith.constant 32 : index
    %c256_390 = arith.constant 256 : index
    %262 = vector.load %arg12[%c32_389, %c256_390] : memref<64x1152xbf16, #tpu.memory_space<vmem>>, vector<8x128xbf16>
    tpu.vector_store %arg12[%c32_389, %c256_390], %261 {strides = array<i32>} : memref<64x1152xbf16, #tpu.memory_space<vmem>>, vector<8x128xbf16>,
    %c5_391 = arith.constant 5 : index
    %c0_392 = arith.constant 0 : index
    %c0_393 = arith.constant 0 : index
    %263 = vector.load %arg11[%c5_391, %c0_392, %c0_393] : memref<10x10x128xbf16, #tpu.memory_space<vmem>>, vector<1x8x128xbf16>
    %264 = vector.shape_cast %263 : vector<1x8x128xbf16> to vector<8x128xbf16>
    %c32_394 = arith.constant 32 : index
    %c384_395 = arith.constant 384 : index
    %265 = vector.load %arg12[%c32_394, %c384_395] : memref<64x1152xbf16, #tpu.memory_space<vmem>>, vector<8x128xbf16>
    tpu.vector_store %arg12[%c32_394, %c384_395], %264 {strides = array<i32>} : memref<64x1152xbf16, #tpu.memory_space<vmem>>, vector<8x128xbf16>,
    %c5_396 = arith.constant 5 : index
    %c1_397 = arith.constant 1 : index
    %c0_398 = arith.constant 0 : index
    %266 = vector.load %arg11[%c5_396, %c1_397, %c0_398] : memref<10x10x128xbf16, #tpu.memory_space<vmem>>, vector<1x8x128xbf16>
    %267 = vector.shape_cast %266 : vector<1x8x128xbf16> to vector<8x128xbf16>
    %c32_399 = arith.constant 32 : index
    %c512_400 = arith.constant 512 : index
    %268 = vector.load %arg12[%c32_399, %c512_400] : memref<64x1152xbf16, #tpu.memory_space<vmem>>, vector<8x128xbf16>
    tpu.vector_store %arg12[%c32_399, %c512_400], %267 {strides = array<i32>} : memref<64x1152xbf16, #tpu.memory_space<vmem>>, vector<8x128xbf16>,
    %c5_401 = arith.constant 5 : index
    %c2_402 = arith.constant 2 : index
    %c0_403 = arith.constant 0 : index
    %269 = vector.load %arg11[%c5_401, %c2_402, %c0_403] : memref<10x10x128xbf16, #tpu.memory_space<vmem>>, vector<1x8x128xbf16>
    %270 = vector.shape_cast %269 : vector<1x8x128xbf16> to vector<8x128xbf16>
    %c32_404 = arith.constant 32 : index
    %c640_405 = arith.constant 640 : index
    %271 = vector.load %arg12[%c32_404, %c640_405] : memref<64x1152xbf16, #tpu.memory_space<vmem>>, vector<8x128xbf16>
    tpu.vector_store %arg12[%c32_404, %c640_405], %270 {strides = array<i32>} : memref<64x1152xbf16, #tpu.memory_space<vmem>>, vector<8x128xbf16>,
    %c6_406 = arith.constant 6 : index
    %c0_407 = arith.constant 0 : index
    %c0_408 = arith.constant 0 : index
    %272 = vector.load %arg11[%c6_406, %c0_407, %c0_408] : memref<10x10x128xbf16, #tpu.memory_space<vmem>>, vector<1x8x128xbf16>
    %273 = vector.shape_cast %272 : vector<1x8x128xbf16> to vector<8x128xbf16>
    %c32_409 = arith.constant 32 : index
    %c768_410 = arith.constant 768 : index
    %274 = vector.load %arg12[%c32_409, %c768_410] : memref<64x1152xbf16, #tpu.memory_space<vmem>>, vector<8x128xbf16>
    tpu.vector_store %arg12[%c32_409, %c768_410], %273 {strides = array<i32>} : memref<64x1152xbf16, #tpu.memory_space<vmem>>, vector<8x128xbf16>,
    %c6_411 = arith.constant 6 : index
    %c1_412 = arith.constant 1 : index
    %c0_413 = arith.constant 0 : index
    %275 = vector.load %arg11[%c6_411, %c1_412, %c0_413] : memref<10x10x128xbf16, #tpu.memory_space<vmem>>, vector<1x8x128xbf16>
    %276 = vector.shape_cast %275 : vector<1x8x128xbf16> to vector<8x128xbf16>
    %c32_414 = arith.constant 32 : index
    %c896_415 = arith.constant 896 : index
    %277 = vector.load %arg12[%c32_414, %c896_415] : memref<64x1152xbf16, #tpu.memory_space<vmem>>, vector<8x128xbf16>
    tpu.vector_store %arg12[%c32_414, %c896_415], %276 {strides = array<i32>} : memref<64x1152xbf16, #tpu.memory_space<vmem>>, vector<8x128xbf16>,
    %c6_416 = arith.constant 6 : index
    %c2_417 = arith.constant 2 : index
    %c0_418 = arith.constant 0 : index
    %278 = vector.load %arg11[%c6_416, %c2_417, %c0_418] : memref<10x10x128xbf16, #tpu.memory_space<vmem>>, vector<1x8x128xbf16>
    %279 = vector.shape_cast %278 : vector<1x8x128xbf16> to vector<8x128xbf16>
    %c32_419 = arith.constant 32 : index
    %c1024_420 = arith.constant 1024 : index
    %280 = vector.load %arg12[%c32_419, %c1024_420] : memref<64x1152xbf16, #tpu.memory_space<vmem>>, vector<8x128xbf16>
    tpu.vector_store %arg12[%c32_419, %c1024_420], %279 {strides = array<i32>} : memref<64x1152xbf16, #tpu.memory_space<vmem>>, vector<8x128xbf16>,
    %c5_421 = arith.constant 5 : index
    %c0_422 = arith.constant 0 : index
    %c0_423 = arith.constant 0 : index
    %281 = vector.load %arg11[%c5_421, %c0_422, %c0_423] : memref<10x10x128xbf16, #tpu.memory_space<vmem>>, vector<1x8x128xbf16>
    %282 = vector.shape_cast %281 : vector<1x8x128xbf16> to vector<8x128xbf16>
    %c40_424 = arith.constant 40 : index
    %c0_425 = arith.constant 0 : index
    %283 = vector.load %arg12[%c40_424, %c0_425] : memref<64x1152xbf16, #tpu.memory_space<vmem>>, vector<8x128xbf16>
    tpu.vector_store %arg12[%c40_424, %c0_425], %282 {strides = array<i32>} : memref<64x1152xbf16, #tpu.memory_space<vmem>>, vector<8x128xbf16>,
    %c5_426 = arith.constant 5 : index
    %c1_427 = arith.constant 1 : index
    %c0_428 = arith.constant 0 : index
    %284 = vector.load %arg11[%c5_426, %c1_427, %c0_428] : memref<10x10x128xbf16, #tpu.memory_space<vmem>>, vector<1x8x128xbf16>
    %285 = vector.shape_cast %284 : vector<1x8x128xbf16> to vector<8x128xbf16>
    %c40_429 = arith.constant 40 : index
    %c128_430 = arith.constant 128 : index
    %286 = vector.load %arg12[%c40_429, %c128_430] : memref<64x1152xbf16, #tpu.memory_space<vmem>>, vector<8x128xbf16>
    tpu.vector_store %arg12[%c40_429, %c128_430], %285 {strides = array<i32>} : memref<64x1152xbf16, #tpu.memory_space<vmem>>, vector<8x128xbf16>,
    %c5_431 = arith.constant 5 : index
    %c2_432 = arith.constant 2 : index
    %c0_433 = arith.constant 0 : index
    %287 = vector.load %arg11[%c5_431, %c2_432, %c0_433] : memref<10x10x128xbf16, #tpu.memory_space<vmem>>, vector<1x8x128xbf16>
    %288 = vector.shape_cast %287 : vector<1x8x128xbf16> to vector<8x128xbf16>
    %c40_434 = arith.constant 40 : index
    %c256_435 = arith.constant 256 : index
    %289 = vector.load %arg12[%c40_434, %c256_435] : memref<64x1152xbf16, #tpu.memory_space<vmem>>, vector<8x128xbf16>
    tpu.vector_store %arg12[%c40_434, %c256_435], %288 {strides = array<i32>} : memref<64x1152xbf16, #tpu.memory_space<vmem>>, vector<8x128xbf16>,
    %c6_436 = arith.constant 6 : index
    %c0_437 = arith.constant 0 : index
    %c0_438 = arith.constant 0 : index
    %290 = vector.load %arg11[%c6_436, %c0_437, %c0_438] : memref<10x10x128xbf16, #tpu.memory_space<vmem>>, vector<1x8x128xbf16>
    %291 = vector.shape_cast %290 : vector<1x8x128xbf16> to vector<8x128xbf16>
    %c40_439 = arith.constant 40 : index
    %c384_440 = arith.constant 384 : index
    %292 = vector.load %arg12[%c40_439, %c384_440] : memref<64x1152xbf16, #tpu.memory_space<vmem>>, vector<8x128xbf16>
    tpu.vector_store %arg12[%c40_439, %c384_440], %291 {strides = array<i32>} : memref<64x1152xbf16, #tpu.memory_space<vmem>>, vector<8x128xbf16>,
    %c6_441 = arith.constant 6 : index
    %c1_442 = arith.constant 1 : index
    %c0_443 = arith.constant 0 : index
    %293 = vector.load %arg11[%c6_441, %c1_442, %c0_443] : memref<10x10x128xbf16, #tpu.memory_space<vmem>>, vector<1x8x128xbf16>
    %294 = vector.shape_cast %293 : vector<1x8x128xbf16> to vector<8x128xbf16>
    %c40_444 = arith.constant 40 : index
    %c512_445 = arith.constant 512 : index
    %295 = vector.load %arg12[%c40_444, %c512_445] : memref<64x1152xbf16, #tpu.memory_space<vmem>>, vector<8x128xbf16>
    tpu.vector_store %arg12[%c40_444, %c512_445], %294 {strides = array<i32>} : memref<64x1152xbf16, #tpu.memory_space<vmem>>, vector<8x128xbf16>,
    %c6_446 = arith.constant 6 : index
    %c2_447 = arith.constant 2 : index
    %c0_448 = arith.constant 0 : index
    %296 = vector.load %arg11[%c6_446, %c2_447, %c0_448] : memref<10x10x128xbf16, #tpu.memory_space<vmem>>, vector<1x8x128xbf16>
    %297 = vector.shape_cast %296 : vector<1x8x128xbf16> to vector<8x128xbf16>
    %c40_449 = arith.constant 40 : index
    %c640_450 = arith.constant 640 : index
    %298 = vector.load %arg12[%c40_449, %c640_450] : memref<64x1152xbf16, #tpu.memory_space<vmem>>, vector<8x128xbf16>
    tpu.vector_store %arg12[%c40_449, %c640_450], %297 {strides = array<i32>} : memref<64x1152xbf16, #tpu.memory_space<vmem>>, vector<8x128xbf16>,
    %c7_451 = arith.constant 7 : index
    %c0_452 = arith.constant 0 : index
    %c0_453 = arith.constant 0 : index
    %299 = vector.load %arg11[%c7_451, %c0_452, %c0_453] : memref<10x10x128xbf16, #tpu.memory_space<vmem>>, vector<1x8x128xbf16>
    %300 = vector.shape_cast %299 : vector<1x8x128xbf16> to vector<8x128xbf16>
    %c40_454 = arith.constant 40 : index
    %c768_455 = arith.constant 768 : index
    %301 = vector.load %arg12[%c40_454, %c768_455] : memref<64x1152xbf16, #tpu.memory_space<vmem>>, vector<8x128xbf16>
    tpu.vector_store %arg12[%c40_454, %c768_455], %300 {strides = array<i32>} : memref<64x1152xbf16, #tpu.memory_space<vmem>>, vector<8x128xbf16>,
    %c7_456 = arith.constant 7 : index
    %c1_457 = arith.constant 1 : index
    %c0_458 = arith.constant 0 : index
    %302 = vector.load %arg11[%c7_456, %c1_457, %c0_458] : memref<10x10x128xbf16, #tpu.memory_space<vmem>>, vector<1x8x128xbf16>
    %303 = vector.shape_cast %302 : vector<1x8x128xbf16> to vector<8x128xbf16>
    %c40_459 = arith.constant 40 : index
    %c896_460 = arith.constant 896 : index
    %304 = vector.load %arg12[%c40_459, %c896_460] : memref<64x1152xbf16, #tpu.memory_space<vmem>>, vector<8x128xbf16>
    tpu.vector_store %arg12[%c40_459, %c896_460], %303 {strides = array<i32>} : memref<64x1152xbf16, #tpu.memory_space<vmem>>, vector<8x128xbf16>,
    %c7_461 = arith.constant 7 : index
    %c2_462 = arith.constant 2 : index
    %c0_463 = arith.constant 0 : index
    %305 = vector.load %arg11[%c7_461, %c2_462, %c0_463] : memref<10x10x128xbf16, #tpu.memory_space<vmem>>, vector<1x8x128xbf16>
    %306 = vector.shape_cast %305 : vector<1x8x128xbf16> to vector<8x128xbf16>
    %c40_464 = arith.constant 40 : index
    %c1024_465 = arith.constant 1024 : index
    %307 = vector.load %arg12[%c40_464, %c1024_465] : memref<64x1152xbf16, #tpu.memory_space<vmem>>, vector<8x128xbf16>
    tpu.vector_store %arg12[%c40_464, %c1024_465], %306 {strides = array<i32>} : memref<64x1152xbf16, #tpu.memory_space<vmem>>, vector<8x128xbf16>,
    %c6_466 = arith.constant 6 : index
    %c0_467 = arith.constant 0 : index
    %c0_468 = arith.constant 0 : index
    %308 = vector.load %arg11[%c6_466, %c0_467, %c0_468] : memref<10x10x128xbf16, #tpu.memory_space<vmem>>, vector<1x8x128xbf16>
    %309 = vector.shape_cast %308 : vector<1x8x128xbf16> to vector<8x128xbf16>
    %c48_469 = arith.constant 48 : index
    %c0_470 = arith.constant 0 : index
    %310 = vector.load %arg12[%c48_469, %c0_470] : memref<64x1152xbf16, #tpu.memory_space<vmem>>, vector<8x128xbf16>
    tpu.vector_store %arg12[%c48_469, %c0_470], %309 {strides = array<i32>} : memref<64x1152xbf16, #tpu.memory_space<vmem>>, vector<8x128xbf16>,
    %c6_471 = arith.constant 6 : index
    %c1_472 = arith.constant 1 : index
    %c0_473 = arith.constant 0 : index
    %311 = vector.load %arg11[%c6_471, %c1_472, %c0_473] : memref<10x10x128xbf16, #tpu.memory_space<vmem>>, vector<1x8x128xbf16>
    %312 = vector.shape_cast %311 : vector<1x8x128xbf16> to vector<8x128xbf16>
    %c48_474 = arith.constant 48 : index
    %c128_475 = arith.constant 128 : index
    %313 = vector.load %arg12[%c48_474, %c128_475] : memref<64x1152xbf16, #tpu.memory_space<vmem>>, vector<8x128xbf16>
    tpu.vector_store %arg12[%c48_474, %c128_475], %312 {strides = array<i32>} : memref<64x1152xbf16, #tpu.memory_space<vmem>>, vector<8x128xbf16>,
    %c6_476 = arith.constant 6 : index
    %c2_477 = arith.constant 2 : index
    %c0_478 = arith.constant 0 : index
    %314 = vector.load %arg11[%c6_476, %c2_477, %c0_478] : memref<10x10x128xbf16, #tpu.memory_space<vmem>>, vector<1x8x128xbf16>
    %315 = vector.shape_cast %314 : vector<1x8x128xbf16> to vector<8x128xbf16>
    %c48_479 = arith.constant 48 : index
    %c256_480 = arith.constant 256 : index
    %316 = vector.load %arg12[%c48_479, %c256_480] : memref<64x1152xbf16, #tpu.memory_space<vmem>>, vector<8x128xbf16>
    tpu.vector_store %arg12[%c48_479, %c256_480], %315 {strides = array<i32>} : memref<64x1152xbf16, #tpu.memory_space<vmem>>, vector<8x128xbf16>,
    %c7_481 = arith.constant 7 : index
    %c0_482 = arith.constant 0 : index
    %c0_483 = arith.constant 0 : index
    %317 = vector.load %arg11[%c7_481, %c0_482, %c0_483] : memref<10x10x128xbf16, #tpu.memory_space<vmem>>, vector<1x8x128xbf16>
    %318 = vector.shape_cast %317 : vector<1x8x128xbf16> to vector<8x128xbf16>
    %c48_484 = arith.constant 48 : index
    %c384_485 = arith.constant 384 : index
    %319 = vector.load %arg12[%c48_484, %c384_485] : memref<64x1152xbf16, #tpu.memory_space<vmem>>, vector<8x128xbf16>
    tpu.vector_store %arg12[%c48_484, %c384_485], %318 {strides = array<i32>} : memref<64x1152xbf16, #tpu.memory_space<vmem>>, vector<8x128xbf16>,
    %c7_486 = arith.constant 7 : index
    %c1_487 = arith.constant 1 : index
    %c0_488 = arith.constant 0 : index
    %320 = vector.load %arg11[%c7_486, %c1_487, %c0_488] : memref<10x10x128xbf16, #tpu.memory_space<vmem>>, vector<1x8x128xbf16>
    %321 = vector.shape_cast %320 : vector<1x8x128xbf16> to vector<8x128xbf16>
    %c48_489 = arith.constant 48 : index
    %c512_490 = arith.constant 512 : index
    %322 = vector.load %arg12[%c48_489, %c512_490] : memref<64x1152xbf16, #tpu.memory_space<vmem>>, vector<8x128xbf16>
    tpu.vector_store %arg12[%c48_489, %c512_490], %321 {strides = array<i32>} : memref<64x1152xbf16, #tpu.memory_space<vmem>>, vector<8x128xbf16>,
    %c7_491 = arith.constant 7 : index
    %c2_492 = arith.constant 2 : index
    %c0_493 = arith.constant 0 : index
    %323 = vector.load %arg11[%c7_491, %c2_492, %c0_493] : memref<10x10x128xbf16, #tpu.memory_space<vmem>>, vector<1x8x128xbf16>
    %324 = vector.shape_cast %323 : vector<1x8x128xbf16> to vector<8x128xbf16>
    %c48_494 = arith.constant 48 : index
    %c640_495 = arith.constant 640 : index
    %325 = vector.load %arg12[%c48_494, %c640_495] : memref<64x1152xbf16, #tpu.memory_space<vmem>>, vector<8x128xbf16>
    tpu.vector_store %arg12[%c48_494, %c640_495], %324 {strides = array<i32>} : memref<64x1152xbf16, #tpu.memory_space<vmem>>, vector<8x128xbf16>,
    %c8_496 = arith.constant 8 : index
    %c0_497 = arith.constant 0 : index
    %c0_498 = arith.constant 0 : index
    %326 = vector.load %arg11[%c8_496, %c0_497, %c0_498] : memref<10x10x128xbf16, #tpu.memory_space<vmem>>, vector<1x8x128xbf16>
    %327 = vector.shape_cast %326 : vector<1x8x128xbf16> to vector<8x128xbf16>
    %c48_499 = arith.constant 48 : index
    %c768_500 = arith.constant 768 : index
    %328 = vector.load %arg12[%c48_499, %c768_500] : memref<64x1152xbf16, #tpu.memory_space<vmem>>, vector<8x128xbf16>
    tpu.vector_store %arg12[%c48_499, %c768_500], %327 {strides = array<i32>} : memref<64x1152xbf16, #tpu.memory_space<vmem>>, vector<8x128xbf16>,
    %c8_501 = arith.constant 8 : index
    %c1_502 = arith.constant 1 : index
    %c0_503 = arith.constant 0 : index
    %329 = vector.load %arg11[%c8_501, %c1_502, %c0_503] : memref<10x10x128xbf16, #tpu.memory_space<vmem>>, vector<1x8x128xbf16>
    %330 = vector.shape_cast %329 : vector<1x8x128xbf16> to vector<8x128xbf16>
    %c48_504 = arith.constant 48 : index
    %c896_505 = arith.constant 896 : index
    %331 = vector.load %arg12[%c48_504, %c896_505] : memref<64x1152xbf16, #tpu.memory_space<vmem>>, vector<8x128xbf16>
    tpu.vector_store %arg12[%c48_504, %c896_505], %330 {strides = array<i32>} : memref<64x1152xbf16, #tpu.memory_space<vmem>>, vector<8x128xbf16>,
    %c8_506 = arith.constant 8 : index
    %c2_507 = arith.constant 2 : index
    %c0_508 = arith.constant 0 : index
    %332 = vector.load %arg11[%c8_506, %c2_507, %c0_508] : memref<10x10x128xbf16, #tpu.memory_space<vmem>>, vector<1x8x128xbf16>
    %333 = vector.shape_cast %332 : vector<1x8x128xbf16> to vector<8x128xbf16>
    %c48_509 = arith.constant 48 : index
    %c1024_510 = arith.constant 1024 : index
    %334 = vector.load %arg12[%c48_509, %c1024_510] : memref<64x1152xbf16, #tpu.memory_space<vmem>>, vector<8x128xbf16>
    tpu.vector_store %arg12[%c48_509, %c1024_510], %333 {strides = array<i32>} : memref<64x1152xbf16, #tpu.memory_space<vmem>>, vector<8x128xbf16>,
    %c7_511 = arith.constant 7 : index
    %c0_512 = arith.constant 0 : index
    %c0_513 = arith.constant 0 : index
    %335 = vector.load %arg11[%c7_511, %c0_512, %c0_513] : memref<10x10x128xbf16, #tpu.memory_space<vmem>>, vector<1x8x128xbf16>
    %336 = vector.shape_cast %335 : vector<1x8x128xbf16> to vector<8x128xbf16>
    %c56_514 = arith.constant 56 : index
    %c0_515 = arith.constant 0 : index
    %337 = vector.load %arg12[%c56_514, %c0_515] : memref<64x1152xbf16, #tpu.memory_space<vmem>>, vector<8x128xbf16>
    tpu.vector_store %arg12[%c56_514, %c0_515], %336 {strides = array<i32>} : memref<64x1152xbf16, #tpu.memory_space<vmem>>, vector<8x128xbf16>,
    %c7_516 = arith.constant 7 : index
    %c1_517 = arith.constant 1 : index
    %c0_518 = arith.constant 0 : index
    %338 = vector.load %arg11[%c7_516, %c1_517, %c0_518] : memref<10x10x128xbf16, #tpu.memory_space<vmem>>, vector<1x8x128xbf16>
    %339 = vector.shape_cast %338 : vector<1x8x128xbf16> to vector<8x128xbf16>
    %c56_519 = arith.constant 56 : index
    %c128_520 = arith.constant 128 : index
    %340 = vector.load %arg12[%c56_519, %c128_520] : memref<64x1152xbf16, #tpu.memory_space<vmem>>, vector<8x128xbf16>
    tpu.vector_store %arg12[%c56_519, %c128_520], %339 {strides = array<i32>} : memref<64x1152xbf16, #tpu.memory_space<vmem>>, vector<8x128xbf16>,
    %c7_521 = arith.constant 7 : index
    %c2_522 = arith.constant 2 : index
    %c0_523 = arith.constant 0 : index
    %341 = vector.load %arg11[%c7_521, %c2_522, %c0_523] : memref<10x10x128xbf16, #tpu.memory_space<vmem>>, vector<1x8x128xbf16>
    %342 = vector.shape_cast %341 : vector<1x8x128xbf16> to vector<8x128xbf16>
    %c56_524 = arith.constant 56 : index
    %c256_525 = arith.constant 256 : index
    %343 = vector.load %arg12[%c56_524, %c256_525] : memref<64x1152xbf16, #tpu.memory_space<vmem>>, vector<8x128xbf16>
    tpu.vector_store %arg12[%c56_524, %c256_525], %342 {strides = array<i32>} : memref<64x1152xbf16, #tpu.memory_space<vmem>>, vector<8x128xbf16>,
    %c8_526 = arith.constant 8 : index
    %c0_527 = arith.constant 0 : index
    %c0_528 = arith.constant 0 : index
    %344 = vector.load %arg11[%c8_526, %c0_527, %c0_528] : memref<10x10x128xbf16, #tpu.memory_space<vmem>>, vector<1x8x128xbf16>
    %345 = vector.shape_cast %344 : vector<1x8x128xbf16> to vector<8x128xbf16>
    %c56_529 = arith.constant 56 : index
    %c384_530 = arith.constant 384 : index
    %346 = vector.load %arg12[%c56_529, %c384_530] : memref<64x1152xbf16, #tpu.memory_space<vmem>>, vector<8x128xbf16>
    tpu.vector_store %arg12[%c56_529, %c384_530], %345 {strides = array<i32>} : memref<64x1152xbf16, #tpu.memory_space<vmem>>, vector<8x128xbf16>,
    %c8_531 = arith.constant 8 : index
    %c1_532 = arith.constant 1 : index
    %c0_533 = arith.constant 0 : index
    %347 = vector.load %arg11[%c8_531, %c1_532, %c0_533] : memref<10x10x128xbf16, #tpu.memory_space<vmem>>, vector<1x8x128xbf16>
    %348 = vector.shape_cast %347 : vector<1x8x128xbf16> to vector<8x128xbf16>
    %c56_534 = arith.constant 56 : index
    %c512_535 = arith.constant 512 : index
    %349 = vector.load %arg12[%c56_534, %c512_535] : memref<64x1152xbf16, #tpu.memory_space<vmem>>, vector<8x128xbf16>
    tpu.vector_store %arg12[%c56_534, %c512_535], %348 {strides = array<i32>} : memref<64x1152xbf16, #tpu.memory_space<vmem>>, vector<8x128xbf16>,
    %c8_536 = arith.constant 8 : index
    %c2_537 = arith.constant 2 : index
    %c0_538 = arith.constant 0 : index
    %350 = vector.load %arg11[%c8_536, %c2_537, %c0_538] : memref<10x10x128xbf16, #tpu.memory_space<vmem>>, vector<1x8x128xbf16>
    %351 = vector.shape_cast %350 : vector<1x8x128xbf16> to vector<8x128xbf16>
    %c56_539 = arith.constant 56 : index
    %c640_540 = arith.constant 640 : index
    %352 = vector.load %arg12[%c56_539, %c640_540] : memref<64x1152xbf16, #tpu.memory_space<vmem>>, vector<8x128xbf16>
    tpu.vector_store %arg12[%c56_539, %c640_540], %351 {strides = array<i32>} : memref<64x1152xbf16, #tpu.memory_space<vmem>>, vector<8x128xbf16>,
    %c9 = arith.constant 9 : index
    %c0_541 = arith.constant 0 : index
    %c0_542 = arith.constant 0 : index
    %353 = vector.load %arg11[%c9, %c0_541, %c0_542] : memref<10x10x128xbf16, #tpu.memory_space<vmem>>, vector<1x8x128xbf16>
    %354 = vector.shape_cast %353 : vector<1x8x128xbf16> to vector<8x128xbf16>
    %c56_543 = arith.constant 56 : index
    %c768_544 = arith.constant 768 : index
    %355 = vector.load %arg12[%c56_543, %c768_544] : memref<64x1152xbf16, #tpu.memory_space<vmem>>, vector<8x128xbf16>
    tpu.vector_store %arg12[%c56_543, %c768_544], %354 {strides = array<i32>} : memref<64x1152xbf16, #tpu.memory_space<vmem>>, vector<8x128xbf16>,
    %c9_545 = arith.constant 9 : index
    %c1_546 = arith.constant 1 : index
    %c0_547 = arith.constant 0 : index
    %356 = vector.load %arg11[%c9_545, %c1_546, %c0_547] : memref<10x10x128xbf16, #tpu.memory_space<vmem>>, vector<1x8x128xbf16>
    %357 = vector.shape_cast %356 : vector<1x8x128xbf16> to vector<8x128xbf16>
    %c56_548 = arith.constant 56 : index
    %c896_549 = arith.constant 896 : index
    %358 = vector.load %arg12[%c56_548, %c896_549] : memref<64x1152xbf16, #tpu.memory_space<vmem>>, vector<8x128xbf16>
    tpu.vector_store %arg12[%c56_548, %c896_549], %357 {strides = array<i32>} : memref<64x1152xbf16, #tpu.memory_space<vmem>>, vector<8x128xbf16>,
    %c9_550 = arith.constant 9 : index
    %c2_551 = arith.constant 2 : index
    %c0_552 = arith.constant 0 : index
    %359 = vector.load %arg11[%c9_550, %c2_551, %c0_552] : memref<10x10x128xbf16, #tpu.memory_space<vmem>>, vector<1x8x128xbf16>
    %360 = vector.shape_cast %359 : vector<1x8x128xbf16> to vector<8x128xbf16>
    %c56_553 = arith.constant 56 : index
    %c1024_554 = arith.constant 1024 : index
    %361 = vector.load %arg12[%c56_553, %c1024_554] : memref<64x1152xbf16, #tpu.memory_space<vmem>>, vector<8x128xbf16>
    tpu.vector_store %arg12[%c56_553, %c1024_554], %360 {strides = array<i32>} : memref<64x1152xbf16, #tpu.memory_space<vmem>>, vector<8x128xbf16>,
    %c0_555 = arith.constant 0 : index
    %c0_556 = arith.constant 0 : index
    %362 = vector.load %arg12[%c0_555, %c0_556] : memref<64x1152xbf16, #tpu.memory_space<vmem>>, vector<64x1152xbf16>
    %c0_557 = arith.constant 0 : index
    %c0_558 = arith.constant 0 : index
    %363 = vector.load %arg4[%c0_557, %c0_558] : memref<1152x128xbf16, #tpu.memory_space<vmem>>, vector<1152x128xbf16>
    %cst_559 = arith.constant dense<0.000000e+00> : vector<64x128xf32>
    %364 = tpu.matmul %362, %363, %cst_559 {dimension_numbers = #tpu.dot_dimension_numbers<[1], [0], [0], [1], [0, 0, 1, 1], [], []>} : vector<64x1152xbf16>, vector<1152x128xbf16>, vector<64x128xf32> -> vector<64x128xf32>
    %c0_560 = arith.constant 0 : index
    %c0_561 = arith.constant 0 : index
    %365 = vector.load %arg5[%c0_560, %c0_561] : memref<1x128xf32, #tpu.memory_space<vmem>>, vector<1x128xf32>
    %366 = vector.broadcast %365 : vector<1x128xf32> to vector<64x128xf32>
    %367 = arith.addf %364, %366 : vector<64x128xf32>
    %368 = arith.addf %367, %111 : vector<64x128xf32>
    %cst_562 = arith.constant 0.000000e+00 : f32
    %369 = vector.broadcast %cst_562 : f32 to vector<64x128xf32>
    %370 = arith.maximumf %368, %369 : vector<64x128xf32>
    %c0_563 = arith.constant 0 : index
    %c0_564 = arith.constant 0 : index
    %371 = vector.load %arg8[%c0_563, %c0_564] : memref<64x128xf32, #tpu.memory_space<vmem>>, vector<64x128xf32>
    tpu.vector_store %arg8[%c0_563, %c0_564], %370 {strides = array<i32>} : memref<64x128xf32, #tpu.memory_space<vmem>>, vector<64x128xf32>,
    return
  }
  func.func @transform_0(%arg0: i32) -> (i32, i32, i32) {
    %c0_i32 = arith.constant 0 : i32
    %c0_i32_0 = arith.constant 0 : i32
    %c0_i32_1 = arith.constant 0 : i32
    return %arg0, %c0_i32, %c0_i32_0 : i32, i32, i32
  }
  func.func @transform_1(%arg0: i32) -> (i32, i32) {
    %c0_i32 = arith.constant 0 : i32
    %c0_i32_0 = arith.constant 0 : i32
    %c0_i32_1 = arith.constant 0 : i32
    return %c0_i32, %c0_i32_0 : i32, i32
  }
  func.func @transform_2(%arg0: i32) -> (i32, i32) {
    %c0_i32 = arith.constant 0 : i32
    %c0_i32_0 = arith.constant 0 : i32
    %c0_i32_1 = arith.constant 0 : i32
    return %c0_i32, %c0_i32_0 : i32, i32
  }
  func.func @transform_3(%arg0: i32) -> (i32, i32) {
    %c0_i32 = arith.constant 0 : i32
    %c0_i32_0 = arith.constant 0 : i32
    %c0_i32_1 = arith.constant 0 : i32
    return %c0_i32, %c0_i32_0 : i32, i32
  }
  func.func @transform_4(%arg0: i32) -> (i32, i32) {
    %c0_i32 = arith.constant 0 : i32
    %c0_i32_0 = arith.constant 0 : i32
    %c0_i32_1 = arith.constant 0 : i32
    return %c0_i32, %c0_i32_0 : i32, i32
  }
  func.func @transform_5(%arg0: i32) -> (i32, i32) {
    %c0_i32 = arith.constant 0 : i32
    %c0_i32_0 = arith.constant 0 : i32
    %c0_i32_1 = arith.constant 0 : i32
    return %c0_i32, %c0_i32_0 : i32, i32
  }
  func.func @transform_6(%arg0: i32) -> (i32, i32) {
    %c0_i32 = arith.constant 0 : i32
    %c0_i32_0 = arith.constant 0 : i32
    %c0_i32_1 = arith.constant 0 : i32
    return %c0_i32, %c0_i32_0 : i32, i32
  }
  func.func @transform_7(%arg0: i32) -> (i32, i32) {
    %c0_i32 = arith.constant 0 : i32
    %c0_i32_0 = arith.constant 0 : i32
    return %arg0, %c0_i32 : i32, i32
  }
}

</mosaic_0001>

<bundles_post_ra>
// kernel: residual_block_forward.1
= control target key start
LH: loop header
LB: loop body
LE: loop exit
PB: predicated region body
PF: predicated region fallthrough
CT: control target
= control target key end

     0   :  { %s4700_s0 = inlined_call_operand.hbm [shape: bf16[18,9,16], index: 0, kind: input, shape index: {}]   ;;  %s4701_s1 = inlined_call_operand.hbm [shape: bf16[64,128], index: 1, kind: input, shape index: {}]   ;;  %s4702_s2 = inlined_call_operand.hbm [shape: f32[1,128], index: 2, kind: input, shape index: {}]   ;;  %s4703_s3 = inlined_call_operand.hbm [shape: bf16[1152,128], index: 3, kind: input, shape index: {}]   ;;  %s4704_s4 = inlined_call_operand.hbm [shape: f32[1,128], index: 4, kind: input, shape index: {}]   ;;  %s4705_s5 = inlined_call_operand.hbm [shape: bf16[4,128], index: 5, kind: input, shape index: {}]   ;;  %s4706_s6 = inlined_call_operand.hbm [shape: f32[1,128], index: 6, kind: input, shape index: {}]   ;;  %s4707_s7 = inlined_call_operand.hbm [shape: f32[128,128], index: 7, kind: output, shape index: {}]  }
   0x1   :  { %4713 = sst [smem:[#allocation24_spill]] %s4701_s1 }
   0x2   :  { %12 = vsyncpa [#allocation7], 0 }
   0x3   :  { %14 = vsyncpa [#allocation7 + $0x1], 0 }
   0x4   :  { %15 = vsyncpa [#allocation10], 0 }
   0x5   :  { %16 = vsyncpa [#allocation13], 0 }
   0x6   :  { %17 = vsyncpa [#allocation16], 0 }
   0x7   :  { %18 = vsyncpa [#allocation8], 0 }
   0x8   :  { %20 = vsyncpa [#allocation8 + $0x1], 0  ;;  %s4211_s24 = smov 0   ;;  %s4213_s25 = smov 0  }
   0x9   :  { %s4215_s26 = smov 0   ;;  %s4217_s27 = smov 0  }
   0xa LB: > { %s4154_s28 = smov [#allocation9]   ;;  %s4232_s30 = sadd.s32 4294967295, %s4152_s27   ;;  %s4152_s27 = sphi %s4217_s27, %s4742_s27   ;;  %s4148_s26 = sphi %s4215_s26, %s4741_s26   ;;  %s4144_s25 = sphi %s4213_s25, %s4740_s25   ;;  %s4140_s24 = sphi %s4211_s24, %s4739_s24  }
   0xb   : > { %s221_s29 = sshll.u32 %s4154_s28, 4  ;;  %p3071_p0 = scmp.ge.s32.totalorder %s4152_s27, 1  ;;  %s4237_s29 = int_to_ptr.vmem [resolvable:$true] %s221_s29 }
   0xc   : > { %p4708_p1 = scmp.eq.s32.totalorder %s4232_s30, 0  ;;  %p209_p2 = scmp.lt.s32.totalorder %s4152_s27, 3 }
   0xd   : > { %s4155_s9 = smov [#allocation12]   ;;  %s4156_s12 = smov [#allocation15]  }
   0xe   : > { %p4239_p3 = pnand %p3071_p0, %p209_p2  ;;  %s245_s10 = sshll.u32 %s4155_s9, 4  ;;  %s4252_s10 = int_to_ptr.vmem [resolvable:$true] %s245_s10 }
   0xf   : > { %s270_s13 = sshll.u32 %s4156_s12, 4  ;;  %s4716_s1 = sld [smem:[#allocation24_spill]]  ;;  %s4254_s13 = int_to_ptr.vmem [resolvable:$true] %s270_s13 }
  0x10   : > { %s4714_s8 = scalar_select %p4239_p3, 1, 0 }
  0x11   : > { %p3616_p5 = pneg %p4239_p3 }
  0x13   : > { %p4248_p6 = pnand %p3616_p5, %p4708_p1 }
  0x15   : > { %s3876_s16 = scalar_lea.hbm %s4716_s1, 512  ;;  %p4264_p8 = pneg %p4248_p6 }
  0x16   : > { %p3877_p7 = scmp.ne.s32.totalorder %s4716_s1, %s3876_s16  ;;  %p3883_p11 = scmp.lt.u32.totalorder %s3876_s16, %s4716_s1 }
  0x18   : > { %p3879_p9 = pnand %p4264_p8, %p3877_p7 }
  0x1a   : > { %p3880_p10 = pneg %p3879_p9 }
  0x1c   : > { %p3885_p12 = pnand %p3883_p11, %p3880_p10 }
  0x1e   : > { %3888 = shalt.err (!%p3885_p12)
}
  0x1f   : > { %s3889_s22 = scalar_lea.vmem %s4237_s29, 512  ;;  %p3897_p5 = scmp.lt.s32.totalorder %s4237_s29, %s4237_s29 }
  0x20   : > { %p3890_p13 = scmp.ne.s32.totalorder %s4237_s29, %s3889_s22  ;;  %p3898_p4 = scmp.lt.s32.totalorder %s3889_s22, %s3889_s22 }
  0x22   : > { %p3892_p0 = pnand %p3890_p13, %p4264_p8  ;;  %p3899_p7 = por %p3898_p4, %p3897_p5 }
  0x24   : > { %p3893_p2 = pneg %p3892_p0 }
  0x26   : > { %p3900_p9 = pnand %p3899_p7, %p3893_p2 }
  0x28   : > { %3903 = shalt.err (!%p3900_p9)
}
  0x29   : > { %s4710_s23 = smov 64   ;;  %s4711_s28 = smov 4  }
  0x2a   : > { %3619 = dma.hbm_to_vmem [thread:$0]  (!%p4248_p6), %s4716_s1, 512, %s4237_s29, [#allocation10], %s4710_s23, %s4710_s23, %s4711_s28  }
  0x2b   : > { %s3904_s16 = scalar_lea.hbm %s4703_s3, 9216 }
  0x2c   : > { %p3905_p4 = scmp.ne.s32.totalorder %s4703_s3, %s3904_s16  ;;  %p3911_p12 = scmp.lt.u32.totalorder %s3904_s16, %s4703_s3 }
  0x2e   : > { %p3907_p10 = pnand %p3905_p4, %p4264_p8 }
  0x30   : > { %p3908_p11 = pneg %p3907_p10 }
  0x32   : > { %p3913_p13 = pnand %p3911_p12, %p3908_p11 }
  0x34   : > { %3916 = shalt.err (!%p3913_p13)
}
  0x35   : > { %s3917_s29 = scalar_lea.vmem %s4252_s10, 9216  ;;  %p3925_p7 = scmp.lt.s32.totalorder %s4252_s10, %s4252_s10 }
  0x36   : > { %p3918_p0 = scmp.ne.s32.totalorder %s4252_s10, %s3917_s29  ;;  %p3926_p9 = scmp.lt.s32.totalorder %s3917_s29, %s3917_s29 }
  0x38   : > { %p3920_p2 = pnand %p3918_p0, %p4264_p8  ;;  %p3927_p4 = por %p3926_p9, %p3925_p7 }
  0x3a   : > { %p3921_p5 = pneg %p3920_p2 }
  0x3c   : > { %p3928_p10 = pnand %p3927_p4, %p3921_p5 }
  0x3e   : > { %3931 = shalt.err (!%p3928_p10)
}
  0x3f   : > { %3625 = dma.hbm_to_vmem [thread:$0]  (!%p4248_p6), %s4703_s3, 9216, %s4252_s10, [#allocation13], %s4710_s23, %s4710_s23, %s4711_s28  }
  0x40   : > { %s3932_s15 = scalar_lea.hbm %s4705_s5, 32 }
  0x41   : > { %p3933_p11 = scmp.ne.s32.totalorder %s4705_s5, %s3932_s15  ;;  %p3939_p0 = scmp.lt.u32.totalorder %s3932_s15, %s4705_s5 }
  0x43   : > { %p3935_p12 = pnand %p3933_p11, %p4264_p8 }
  0x45   : > { %p3936_p13 = pneg %p3935_p12 }
  0x47   : > { %p3941_p2 = pnand %p3939_p0, %p3936_p13 }
  0x49   : > { %3944 = shalt.err (!%p3941_p2)
}
  0x4a   : > { %s3945_s10 = scalar_lea.vmem %s4254_s13, 32  ;;  %p3953_p4 = scmp.lt.s32.totalorder %s4254_s13, %s4254_s13 }
  0x4b   : > { %p3946_p5 = scmp.ne.s32.totalorder %s4254_s13, %s3945_s10  ;;  %p3954_p10 = scmp.lt.s32.totalorder %s3945_s10, %s3945_s10 }
  0x4d   : > { %p3948_p7 = pnand %p3946_p5, %p4264_p8  ;;  %p3955_p11 = por %p3954_p10, %p3953_p4 }
  0x4f   : > { %p3949_p9 = pneg %p3948_p7 }
  0x51   : > { %p3956_p12 = pnand %p3955_p11, %p3949_p9 }
  0x53   : > { %3959 = shalt.err (!%p3956_p12)
}
  0x54   : > { %3631 = dma.hbm_to_vmem [thread:$0]  (!%p4248_p6), %s4705_s5, 32, %s4254_s13, [#allocation16]  }
  0x55   : > { %s4159_s22 = smov [#allocation11]   ;;  %s4160_s12 = smov [#allocation14]  }
  0x56   : > { %s235_s9 = sshll.u32 %s4159_s22, 4  ;;  %s259_s14 = sshll.u32 %s4160_s12, 4  ;;  %s236_s9 = int_to_ptr.vmem [resolvable:$true] %s235_s9  ;;  %s260_s14 = int_to_ptr.vmem [resolvable:$true] %s259_s14 }
  0x57   : > { %s3960_s17 = scalar_lea.hbm %s4702_s2, 16 }
  0x58   : > { %p3961_p13 = scmp.ne.s32.totalorder %s4702_s2, %s3960_s17  ;;  %p3967_p5 = scmp.lt.u32.totalorder %s3960_s17, %s4702_s2 }
  0x5a   : > { %p3963_p0 = pnand %p3961_p13, %p4264_p8 }
  0x5c   : > { %p3964_p2 = pneg %p3963_p0 }
  0x5e   : > { %p3969_p7 = pnand %p3967_p5, %p3964_p2 }
  0x60   : > { %3972 = shalt.err (!%p3969_p7)
}
  0x61   : > { %s3973_s13 = scalar_lea.vmem %s236_s9, 16  ;;  %s3980_s29 = scalar_lea.vmem %s236_s9, 32 }
  0x62   : > { %p3974_p9 = scmp.ne.s32.totalorder %s236_s9, %s3973_s13  ;;  %p3981_p11 = scmp.lt.s32.totalorder %s236_s9, %s236_s9 }
  0x63   : > { %p3982_p12 = scmp.lt.s32.totalorder %s3980_s29, %s3973_s13 }
  0x64   : > { %p3976_p4 = pnand %p3974_p9, %p4264_p8 }
  0x65   : > { %p3983_p1 = por %p3982_p12, %p3981_p11 }
  0x66   : > { %p3977_p10 = pneg %p3976_p4 }
  0x68   : > { %p3984_p3 = pnand %p3983_p1, %p3977_p10 }
  0x6a   : > { %3987 = shalt.err (!%p3984_p3)
}
  0x6b   : > { %3622 = dma.hbm_to_vmem [thread:$0]  (!%p4248_p6), %s4702_s2, 16, %s236_s9, [#allocation10]  }
  0x6c   : > { %s3988_s17 = scalar_lea.hbm %s4704_s4, 16 }
  0x6d   : > { %p3989_p13 = scmp.ne.s32.totalorder %s4704_s4, %s3988_s17  ;;  %p3995_p3 = scmp.lt.u32.totalorder %s3988_s17, %s4704_s4 }
  0x6f   : > { %p3991_p0 = pnand %p3989_p13, %p4264_p8 }
  0x71   : > { %p3992_p1 = pneg %p3991_p0 }
  0x73   : > { %p3997_p2 = pnand %p3995_p3, %p3992_p1 }
  0x75   : > { %4000 = shalt.err (!%p3997_p2)
}
  0x76   : > { %s4001_s13 = scalar_lea.vmem %s260_s14, 16  ;;  %s4008_s9 = scalar_lea.vmem %s260_s14, 32 }
  0x77   : > { %p4002_p5 = scmp.ne.s32.totalorder %s260_s14, %s4001_s13  ;;  %p4009_p4 = scmp.lt.s32.totalorder %s260_s14, %s260_s14 }
  0x78   : > { %p4010_p10 = scmp.lt.s32.totalorder %s4008_s9, %s4001_s13 }
  0x79   : > { %p4004_p7 = pnand %p4002_p5, %p4264_p8 }
  0x7a   : > { %p4011_p11 = por %p4010_p10, %p4009_p4 }
  0x7b   : > { %p4005_p9 = pneg %p4004_p7 }
  0x7d   : > { %p4012_p12 = pnand %p4011_p11, %p4005_p9 }
  0x7f   : > { %4015 = shalt.err (!%p4012_p12)
}
  0x80   : > { %3628 = dma.hbm_to_vmem [thread:$0]  (!%p4248_p6), %s4704_s4, 16, %s260_s14, [#allocation13]  }
  0x81   : > { %s4161_s12 = smov [#allocation17]   ;;  %s4016_s18 = scalar_lea.hbm %s4706_s6, 16 }
  0x82   : > { %s281_s15 = sshll.u32 %s4161_s12, 4  ;;  %p4017_p13 = scmp.ne.s32.totalorder %s4706_s6, %s4016_s18  ;;  %s282_s15 = int_to_ptr.vmem [resolvable:$true] %s281_s15 }
  0x83   : > { %p4023_p3 = scmp.lt.u32.totalorder %s4016_s18, %s4706_s6 }
  0x84   : > { %p4019_p0 = pnand %p4017_p13, %p4264_p8 }
  0x86   : > { %p4020_p1 = pneg %p4019_p0 }
  0x88   : > { %p4025_p2 = pnand %p4023_p3, %p4020_p1 }
  0x8a   : > { %4028 = shalt.err (!%p4025_p2)
}
  0x8b   : > { %s4029_s14 = scalar_lea.vmem %s282_s15, 16  ;;  %s4036_s9 = scalar_lea.vmem %s282_s15, 32 }
  0x8c   : > { %p4030_p5 = scmp.ne.s32.totalorder %s282_s15, %s4029_s14  ;;  %p4037_p4 = scmp.lt.s32.totalorder %s282_s15, %s282_s15 }
  0x8d   : > { %p4038_p10 = scmp.lt.s32.totalorder %s4036_s9, %s4029_s14 }
  0x8e   : > { %p4032_p7 = pnand %p4030_p5, %p4264_p8 }
  0x8f   : > { %p4039_p11 = por %p4038_p10, %p4037_p4 }
  0x90   : > { %p4033_p9 = pneg %p4032_p7 }
  0x92   : > { %p4040_p12 = pnand %p4039_p11, %p4033_p9 }
  0x94   : > { %4043 = shalt.err (!%p4040_p12)
}
  0x95   : > { %3634 = dma.hbm_to_vmem [thread:$0]  (!%p4248_p6), %s4706_s6, 16, %s282_s15, [#allocation16]  }
  0x96   : > { %s3070_s19 = sadd.s32 4294967294, %s4152_s27   ;;  %s4393_s11 = sadd.s32 1, %s4152_s27  }
  0x97   : > { %s30_s12 = ssub.s32 %s4152_s27, %s4393_s11  ;;  %s33_s16 = sadd.s32 1, %s4148_s26 }
  0x98   : > { %p31_p8 = scmp.eq.s32.totalorder %s30_s12, 0  ;;  %p40_p13 = scmp.ne.s32.totalorder %s4148_s26, %s4144_s25 }
  0x99   : > { %p41_p0 = scmp.eq.s32.totalorder %s4152_s27, 0  ;;  %p46_p1 = scmp.ne.s32.totalorder %s4144_s25, %s4140_s24 }
  0x9a   : > { %s4404_s17 = scalar_select %p31_p8, %s4148_s26, %s33_s16  }
  0x9b   : > { %p42_p3 = por %p41_p0, %p40_p13  ;;  %p4718_p2 = scmp.eq.s32.totalorder %s4232_s30, 0 }
  0x9c   : > { %p196_p6 = scmp.eq.s32.totalorder %s4232_s30, 1  ;;  %p202_p7 = scmp.eq.s32.totalorder %s3070_s19, 1 }
  0x9d   : > { %p4408_p5 = por %p4718_p2, %p46_p1  ;;  %p3649_p9 = scmp.lt.s32.totalorder %s4152_s27, 2 }
  0x9e   : > { %s292_s15 = sand.u32 1, %s4148_s26   ;;  %p4415_p4 = por %p196_p6, %p40_p13 }
  0x9f   : > { %p4419_p10 = por %p202_p7, %p46_p1  ;;  %s3586_s21 = smul.u32 72, %s292_s15 }
  0xa0   : > { %s4720_s20 = scalar_select %p4415_p4, 1, 0 }
  0xa1   : > { %s4721_s10 = scalar_select %p4419_p10, 1, 0 }
  0xa2   : > { %s3325_s13 = smul.u32 1152, %s4152_s27  ;;  %p4424_p11 = pnand %p3649_p9, %p42_p3 }
  0xa3   : > { %s296_s19 = scalar_lea.vmem [#allocation6], %s3586_s21  ;;  %s4435_s16 = scalar_lea.sflag [#allocation7], %s292_s15 }
  0xa4   : > { %s4431_s22 = scalar_lea.hbm %s4700_s0, %s3325_s13  ;;  %s304_s12 = sshll.u32 %s296_s19, 4  ;;  %s4433_s12 = int_to_ptr.vmem [resolvable:$true] %s304_s12 }
  0xa5   : > { %s4044_s23 = scalar_lea.hbm %s4431_s22, 1152  ;;  %p4046_p8 = pneg %p4424_p11 }
  0xa6   : > { %p4045_p12 = scmp.ne.s32.totalorder %s4431_s22, %s4044_s23  ;;  %s4049_s29 = scalar_lea.hbm %s4700_s0, 2304 }
  0xa7   : > { %p4050_p1 = scmp.lt.u32.totalorder %s4431_s22, %s4700_s0  ;;  %p4051_p3 = scmp.lt.u32.totalorder %s4049_s29, %s4044_s23 }
  0xa8   : > { %p4047_p13 = pnand %p4046_p8, %p4045_p12  ;;  %p4053_p6 = scmp.lt.u32.totalorder %s4044_s23, %s4431_s22 }
  0xa9   : > { %p4052_p2 = por %p4051_p3, %p4050_p1 }
  0xaa   : > { %p4048_p0 = pneg %p4047_p13 }
  0xab   : > { %p4054_p7 = por %p4053_p6, %p4052_p2 }
  0xad   : > { %p4055_p9 = pnand %p4054_p7, %p4048_p0 }
  0xaf   : > { %4058 = shalt.err (!%p4055_p9)
}
  0xb0   : > { %s4059_s15 = scalar_lea.vmem %s4433_s12, 1152  ;;  %s4162_s21 = smov [#allocation6]  }
  0xb1   : > { %p4060_p12 = scmp.ne.s32.totalorder %s4433_s12, %s4059_s15  ;;  %s4064_s19 = sshll.u32 %s4162_s21, 4  ;;  %s4065_s19 = int_to_ptr.vmem [resolvable:$false] %s4064_s19 }
  0xb2   : > { %s4066_s1 = scalar_lea.vmem %s4065_s19, 2304  ;;  %p4067_p4 = scmp.lt.s32.totalorder %s4433_s12, %s4065_s19 }
  0xb3   : > { %p4062_p13 = pnand %p4060_p12, %p4046_p8  ;;  %p4068_p1 = scmp.lt.s32.totalorder %s4066_s1, %s4059_s15 }
  0xb5   : > { %p4063_p10 = pneg %p4062_p13  ;;  %p4069_p3 = por %p4068_p1, %p4067_p4 }
  0xb7   : > { %p4070_p2 = pnand %p4069_p3, %p4063_p10 }
  0xb9   : > { %4073 = shalt.err (!%p4070_p2)
}
  0xba   : > { %s4723_s23 = smov 4   ;;  %s4724_s28 = smov 64  }
  0xbb   : > { %3638 = dma.hbm_to_vmem [thread:$0]  (!%p4424_p11), %s4431_s22, 1152, %s4433_s12, %s4435_s16, %s4724_s28, %s4724_s28, %s4723_s23  }
  0xbc   : > { %p4725_p8 = scmp.ne.s32.totalorder %s4714_s8, 0 }
  0xbd   : > { %s4469_s13 = sand.u32 (!%p4725_p8), 1, %s4144_s25  }
  0xbe   : > { %316 = sbr.rel (%p4725_p8) target bundleno = 934 (0x3a6), region = 48  ;;  %s319_s29 = scalar_lea.sflag (!%p4725_p8), [#allocation7], %s4469_s13 }
  0xbf   : > { %s3587_s9 = smul.u32 (!%p4725_p8), 72, %s4469_s13 }
  0xc1   : > { %s4473_s15 = scalar_lea.vmem (!%p4725_p8), [#allocation6], %s3587_s9 }
  0xc5   : > { %4119 = dma.done.wait (%p4408_p5), %s319_s29, 1152  }
  0xc6   : > { %4121 = vsyncadd (%p4408_p5), %s319_s29, 4294966144  ;;  %p4726_p4 = scmp.eq.s32.totalorder %s4232_s30, 0 }
  0xc8   : > { %4123 = dma.done.wait (%p4726_p4), [#allocation10], 528   ;;  %p4727_p10 = pmov %p4726_p4 }
  0xc9   : > { %p4728_p11 = pmov %p4726_p4 }
  0xca   : > { %4125 = vsyncadd (%p4727_p10), [#allocation10], 4294966768 }
  0xcb   : > { %4127 = dma.done.wait (%p4728_p11), [#allocation13], 9232   ;;  %p4729_p0 = pmov %p4726_p4 }
  0xcd   : > { %4129 = vsyncadd (%p4729_p0), [#allocation13], 4294958064  ;;  %p4730_p6 = pmov %p4729_p0 }
  0xce   : > { %p4731_p7 = pmov %p4729_p0 }
  0xcf   : > { %4131 = dma.done.wait (%p4730_p6), [#allocation16], 48  }
  0xd0   : > { %4133 = vsyncadd (%p4731_p7), [#allocation16], 4294967248  ;;  %v3704_v0 = vld [vmem:[%s4473_s15 + $0x8] ss:$0 sps:$4 sm:$0xff]   ;;  %v3705_v1 = vld [vmem:[%s4473_s15 + $0x18] ss:$0 sps:$4 sm:$0xff]  }
  0xd1   : > { %v3706_v2 = vld [vmem:[%s4473_s15 + $0x10] ss:$0 sps:$4 sm:$0xff]   ;;  %s4163_s8 = smov 32   ;;  %v3707_v3 = vld [vmem:[%s4473_s15] sm:$0x1f]   ;;  %s4164_s18 = smov 16  }
  0xd2   : > { %407 = vrot.lane.b32.xlu1 %v3704_v0, %s4163_s8  ;;  %513 = vrot.lane.b32.xlu0 %v3705_v1, %s4163_s8  ;;  %v391_v4 = vshrl.u32 %v3707_v3, 16  ;;  %v393_v5 = vshll.u32 %v3707_v3, 16  ;;  %v3708_v6 = vld [vmem:[%s4473_s15 + $0x20] ss:$0 sps:$4 sm:$0xff]   ;;  %v3709_v7 = vld [vmem:[%s4473_s15 + $0x8] sm:$0x1f]  }
  0xd3   : > { %v3710_v8 = vld [vmem:[%s4473_s15 + $0x18] sm:$0x1f]   ;;  %v446_v10 = vshrl.u32 %v3709_v7, 16  ;;  %v449_v11 = vshll.u32 %v3709_v7, 16  ;;  %v3730_v12 = vld [vmem:[#allocation9] sm:$0xff]   ;;  %s4165_s14 = smov 48  }
  0xd4   : > { %v395_v9 = vrot.slane %v393_v5, 1  ;;  %v549_v13 = vshrl.u32 %v3710_v8, 16  ;;  %v552_v14 = vshll.u32 %v3710_v8, 16  ;;  %v3711_v15 = vld [vmem:[%s4473_s15 + $0x10] sm:$0x1f]   ;;  %3511 = vmatprep.subr.bf16.mxu0 %v3730_v12  ;;  %v3732_v35 = vld [vmem:[#allocation9 + $0x10] sm:$0xff]  }
  0xd5   : > { %v448_v17 = vrot.slane %v446_v10, 4  ;;  %v451_v18 = vrot.slane %v449_v11, 5  ;;  %v498_v21 = vshrl.u32 %v3711_v15, 16  ;;  %v500_v22 = vshll.u32 %v3711_v15, 16  ;;  %v3712_v23 = vld [vmem:[%s4473_s15 + $0x10] sm:$0x1f]   ;;  %3512 = vmatpush3.bf16.msra.mxu0 %v3730_v12 }
  0xd6   : > { %463 = vrot.lane.b32.xlu1 %v3706_v2, %s4163_s8  ;;  %v396_v16 = vor.u32 %v395_v9, %v391_v4  ;;  %v551_v19 = vrot.slane %v549_v13, 4  ;;  %v554_v20 = vrot.slane %v552_v14, 5  ;;  %v476_v27 = vshrl.u32 %v3712_v23, 16  ;;  %v3713_v29 = vld [vmem:[%s4473_s15 + $0x8] sm:$0x1f]   ;;  %v3731_v30 = vld [vmem:[#allocation9 + $0x8] sm:$0xff]  }
  0xd7   : > { %v452_v24 = vor.u32 %v451_v18, %v448_v17  ;;  %v502_v26 = vrot.slane %v500_v22, 1  ;;  %v479_v28 = vshll.u32 %v3712_v23, 16  ;;  %v3714_v31 = vld [vmem:[%s4473_s15 + $0x20] sm:$0x1f]   ;;  %3513 = vmatprep.subr.bf16.mxu0 %v3731_v30  ;;  %v420_v36 = vshrl.u32 %v3713_v29, 16  ;;  %s4166_s22 = smov 116  }
  0xd8   : > { %397 = vrot.lane.b32.xlu0 %v396_v16, %s4164_s18  ;;  %v555_v25 = vor.u32 %v554_v20, %v551_v19  ;;  %v478_v33 = vrot.slane %v476_v27, 4  ;;  %v422_v37 = vshll.u32 %v3713_v29, 16  ;;  %v577_v38 = vshrl.u32 %v3714_v31, 16  ;;  %v3715_v41 = vld [vmem:[%s4473_s15 + $0x18] sm:$0x1f]   ;;  %v3734_v62 = vld [vmem:[#allocation9 + $0x18] sm:$0xff]  }
  0xd9   : > { %v503_v32 = vor.u32 %v502_v26, %v498_v21  ;;  %v481_v34 = vrot.slane %v479_v28, 5  ;;  %v580_v39 = vshll.u32 %v3714_v31, 16  ;;  %3514 = vmatpush3.bf16.msra.mxu0 %v3731_v30  ;;  %v3716_v45 = vld [vmem:[%s4473_s15 + $0x28] sm:$0x1f]   ;;  %v525_v46 = vshrl.u32 %v3715_v41, 16  ;;  %s3088_s12 = sshll.u32 %s4469_s13, 6 }
  0xda   : > { %565 = vrot.lane.b32.xlu1 %v3708_v6, %s4163_s8  ;;  %v424_v42 = vrot.slane %v422_v37, 1  ;;  %v579_v43 = vrot.slane %v577_v38, 4  ;;  %3515 = vmatprep.subr.bf16.mxu0 %v3732_v35  ;;  %v527_v47 = vshll.u32 %v3715_v41, 16  ;;  %v649_v50 = vshrl.u32 %v3716_v45, 16  ;;  %v3717_v52 = vld [vmem:[%s4473_s15 + $0x20] sm:$0x1f]  }
  0xdb   : > { %v482_v40 = vor.u32 %v481_v34, %v478_v33  ;;  %v582_v44 = vrot.slane %v580_v39, 5  ;;  %v652_v51 = vshll.u32 %v3716_v45, 16  ;;  %v598_v56 = vshrl.u32 %v3717_v52, 16  ;;  %v3720_v58 = vld [vmem:[%s4473_s15 + $0x38] sm:$0x1f]   ;;  %s376_s16 = scalar_lea.vmem [#allocation18], %s3088_s12 }
  0xdc   : > { %453 = vrot.lane.b32.xlu0 %v452_v24, %s4164_s18  ;;  %v425_v48 = vor.u32 %v424_v42, %v420_v36  ;;  %v529_v53 = vrot.slane %v527_v47, 1  ;;  %v651_v54 = vrot.slane %v649_v50, 4  ;;  %v600_v57 = vshll.u32 %v3717_v52, 16  ;;  %v3721_v1 = vld [vmem:[%s4473_s15 + $0x30] sm:$0x1f]   ;;  %s2940_s21 = sshll.u32 %s376_s16, 4  ;;  %s4651_s21 = int_to_ptr.vmem [resolvable:$true] %s2940_s21 }
  0xdd   : > { %v583_v49 = vor.u32 %v582_v44, %v579_v43  ;;  %3516 = vmatpush3.bf16.msra.mxu0 %v3732_v35  ;;  %v654_v55 = vrot.slane %v652_v51, 5  ;;  %v749_v63 = vshrl.u32 %v3720_v58, 16  ;;  %v752_v0 = vshll.u32 %v3720_v58, 16  ;;  %v3718_v2 = vld [vmem:[%s4473_s15 + $0x30] ss:$0 sps:$4 sm:$0xff]   ;;  %s3324_s19 = sshll.u32 %s4232_s30, 10 }
  0xde   : > { %556 = vrot.lane.b32.xlu1 %v555_v25, %s4164_s18  ;;  %v530_v59 = vor.u32 %v529_v53, %v525_v46  ;;  %v602_v61 = vrot.slane %v600_v57, 1  ;;  %v3722_v3 = vld [vmem:[%s4473_s15 + $0x30] sm:$0x1f]   ;;  %3517 = vmatprep.subr.bf16.mxu0 %v3734_v62  ;;  %v700_v6 = vshll.u32 %v3721_v1, 16  ;;  %v3723_v10 = vld [vmem:[%s4473_s15 + $0x28] sm:$0x1f]   ;;  %s4656_s28 = scalar_lea.hbm %s4707_s7, %s3324_s19 }
  0xdf   : > { %v655_v60 = vor.u32 %v654_v55, %v651_v54  ;;  %v751_v4 = vrot.slane %v749_v63, 4  ;;  %v754_v5 = vrot.slane %v752_v0, 5  ;;  %v677_v8 = vshrl.u32 %v3722_v3, 16  ;;  %v3719_v11 = vld [vmem:[%s4473_s15 + $0x28] ss:$0 sps:$4 sm:$0xff]   ;;  %s2927_s30 = scalar_lea.sflag [#allocation8], %s4469_s13 }
  0xe0   : > { %504 = vrot.lane.b32.xlu0 %v503_v32, %s4164_s18  ;;  %v603_v7 = vor.u32 %v602_v61, %v598_v56  ;;  %v680_v9 = vshll.u32 %v3722_v3, 16  ;;  %vm381_vm0 = vcmask 125952   ;;  %vm436_vm1 = vcmask 130052   ;;  %v3726_v16 = vld [vmem:[%s4473_s15 + $0x40] sm:$0x1f]   ;;  %s4074_s9 = scalar_lea.vmem %s4651_s21, 1024 }
  0xe1   : > { %3518 = vmatpush3.bf16.msra.mxu0 %v3734_v62  ;;  %v698_v12 = vshrl.u32 %v3721_v1, 16  ;;  %v702_v13 = vrot.slane %v700_v6, 1  ;;  %v679_v14 = vrot.slane %v677_v8, 4  ;;  %v627_v15 = vshll.u32 %v3723_v10, 16  ;;  %v3727_v22 = vld [vmem:[%s4473_s15 + $0x38] sm:$0x1f]   ;;  %p4075_p5 = scmp.ne.s32.totalorder %s4651_s21, %s4074_s9 }
  0xe2   : > { %483 = vrot.lane.b32.xlu1 %v482_v40, %s4165_s14  ;;  %v755_v17 = vor.u32 %v754_v5, %v751_v4  ;;  %v682_v18 = vrot.slane %v680_v9, 5  ;;  %v625_v19 = vshrl.u32 %v3723_v10, 16  ;;  %v777_v20 = vshrl.u32 %v3726_v16, 16  ;;  %v380_v23 = vld [vmem:[%s4473_s15] sm:$0xf]  ;;  %p4736_p9 = scmp.ne.s32.totalorder %s4720_s20, 0 }
  0xe3   : > { %v780_v21 = vshll.u32 %v3726_v16, 16  ;;  %382 = vst.msk [vmem:[#allocation2] sm:$0xf] %vm381_vm0, %v380_v23  ;;  %v3728_v24 = vld [vmem:[%s4473_s15 + $0x8] ss:$0 sps:$4 sm:$0xff]   ;;  %v629_v25 = vrot.slane %v627_v15, 1  ;;  %v703_v30 = vor.u32 %v702_v13, %v698_v12 }
  0xe4   : > { %426 = vrot.lane.b32.xlu0 %v425_v48, %s4165_s14  ;;  %v779_v26 = vrot.slane %v777_v20, 4  ;;  %v727_v28 = vshll.u32 %v3727_v22, 16  ;;  %v3729_v29 = vld [vmem:[%s4473_s15 + $0x18] ss:$0 sps:$4 sm:$0xff]   ;;  %v683_v31 = vor.u32 %v682_v18, %v679_v14  ;;  %437 = vst.msk [vmem:[#allocation2] sm:$0xf0] %vm436_vm1, %v3728_v24  ;;  %p4076_p12 = pnand %p4075_p5, %p4736_p9 }
  0xe5   : > { %v782_v27 = vrot.slane %v780_v21, 5  ;;  %v3105_v32 = vld [vmem:[%s4473_s15 + $0x10] sm:$0xf]  ;;  %v725_v33 = vshrl.u32 %v3727_v22, 16  ;;  %540 = vst.msk [vmem:[#allocation2 + $0x8] sm:$0xf0] %vm436_vm1, %v3729_v29  ;;  %v630_v38 = vor.u32 %v629_v25, %v625_v19 }
  0xe6   : > { %584 = vrot.lane.b32.xlu1 %v583_v49, %s4165_s14  ;;  %v729_v34 = vrot.slane %v727_v28, 1  ;;  %489 = vst.msk [vmem:[#allocation2 + $0x8] sm:$0xf] %vm381_vm0, %v3105_v32  ;;  %v3724_v35 = vld [vmem:[%s4473_s15 + $0x40] ss:$0 sps:$4 sm:$0xff]   ;;  %vm400_vm2 = vcmask 257152   ;;  %p4077_p13 = pneg %p4076_p12 }
  0xe7   : > { %v3733_v36 = vld [vmem:[%s4473_s15 + $0x28] ss:$0 sps:$4 sm:$0xff]   ;;  %v3124_v37 = vld [vmem:[%s4473_s15 + $0x20] sm:$0xf]  ;;  %v3735_v39 = vld [vmem:[%s4473_s15 + $0x38] ss:$0 sps:$4 sm:$0xff]   ;;  %v783_v42 = vor.u32 %v782_v27, %v779_v26 }
  0xe8   : > { %531 = vrot.lane.b32.xlu0 %v530_v59, %s4165_s14  ;;  %640 = vst.msk [vmem:[#allocation2 + $0x10] sm:$0xf0] %vm436_vm1, %v3733_v36  ;;  %v3143_v40 = vld [vmem:[%s4473_s15 + $0x30] sm:$0xf]  ;;  %v3725_v41 = vld [vmem:[%s4473_s15 + $0x38] ss:$0 sps:$4 sm:$0xff]   ;;  %v730_v43 = vor.u32 %v729_v34, %v725_v33 }
  0xe9   : > { %589 = vst.msk [vmem:[#allocation2 + $0x10] sm:$0xf] %vm381_vm0, %v3124_v37  ;;  %689 = vst.msk [vmem:[#allocation2 + $0x18] sm:$0xf] %vm381_vm0, %v3143_v40  ;;  %vm410_vm3 = vcmask 388352   ;;  %vm456_vm4 = vcmask 261252  }
  0xea   : > { %656 = vrot.lane.b32.xlu1 %v655_v60, %s4164_s18  ;;  %740 = vst.msk [vmem:[#allocation2 + $0x18] sm:$0xf0] %vm436_vm1, %v3735_v39  ;;  %vm466_vm5 = vcmask 392452   ;;  %vm486_vm6 = vcmask 523652   ;;  %v929_v51 = vld [vmem:[#allocation15] sm:$0x3] }
  0xeb   : > { %vm962_vm7 = vcmask 1041408   ;;  %vm429_vm8 = vcmask 519552   ;;  %vm831_vm9 = vcmask 523264   ;;  %v4167_v10 = vmov 0   ;;  %v3741_v12 = vld [vmem:[#allocation12 + $0x80] sm:$0xff]   ;;  %v3742_v13 = vld [vmem:[#allocation12 + $0xc8] sm:$0xff]  }
  0xec   : > { %604 = vrot.lane.b32.xlu0 %v603_v7, %s4164_s18  ;;  %3585 = vmatprep.subr.msk.bf16.mxu1 %vm962_vm7, %v929_v51  ;;  %v964_v54 = vsel %vm962_vm7, %v929_v51, 0  ;;  %1037 = vst [vmem:[#allocation4 + $0x18] sm:$0xf] %v4167_v10  ;;  %1038 = vst [vmem:[#allocation4 + $0x1c] sm:$0x1] %v4167_v10  ;;  %v3743_v14 = vld [vmem:[#allocation12 + $0x40] sm:$0xff]  }
  0xed   : > { %3528 = vmatpush3.bf16.msra.mxu1 %v964_v54  ;;  %1039 = vst [vmem:[#allocation4 + $0x20] sm:$0xf] %v4167_v10  ;;  %1040 = vst [vmem:[#allocation4 + $0x24] sm:$0x1] %v4167_v10  ;;  %v3744_v15 = vld [vmem:[#allocation12 + $0x88] sm:$0xff]   ;;  %v3746_v16 = vld [vmem:[#allocation12 + $0xd0] sm:$0xff]  }
  0xee   : > { %665 = vrot.lane.b32.xlu1 %v3718_v2, %s4163_s8  ;;  %1031 = vst [vmem:[#allocation4] sm:$0xf] %v4167_v10  ;;  %1032 = vst [vmem:[#allocation4 + $0x4] sm:$0x1] %v4167_v10  ;;  %3339 = vmatprep.subr.bf16.mxu1 %v3743_v14  ;;  %v3754_v18 = vld [vmem:[#allocation12 + $0xd8] sm:$0xff]   ;;  %vm949_vm10 = vcmask 31744  }
  0xef   : > { %1033 = vst [vmem:[#allocation4 + $0x8] sm:$0xf] %v4167_v10  ;;  %1034 = vst [vmem:[#allocation4 + $0xc] sm:$0x1] %v4167_v10  ;;  %v3756_v19 = vld [vmem:[#allocation12 + $0x98] sm:$0xff]   ;;  %v3758_v21 = vld [vmem:[#allocation12 + $0xe0] sm:$0xff]  }
  0xf0   : > { %613 = vrot.lane.b32.xlu0 %v3719_v11, %s4163_s8  ;;  %1035 = vst [vmem:[#allocation4 + $0x10] sm:$0xf] %v4167_v10  ;;  %1036 = vst [vmem:[#allocation4 + $0x14] sm:$0x1] %v4167_v10  ;;  %v3740_v11 = vld [vmem:[#allocation12 + $0xc0] sm:$0xff]   ;;  %v3747_v24 = vld [vmem:[#allocation12 + $0x48] sm:$0xff]  }
  0xf1   : > { %1041 = vst [vmem:[#allocation4 + $0x28] sm:$0xf] %v4167_v10  ;;  %1042 = vst [vmem:[#allocation4 + $0x2c] sm:$0x1] %v4167_v10  ;;  %3379 = vmatprep.subr.bf16.mxu0 %v3740_v11  ;;  %v3745_v22 = vld [vmem:[#allocation12] sm:$0xff]   ;;  %v3762_v26 = vld [vmem:[#allocation12 + $0xe8] sm:$0xff]  }
  0xf2   : > { %756 = vrot.lane.b32.xlu1 %v755_v17, %s4164_s18  ;;  %1043 = vst [vmem:[#allocation4 + $0x30] sm:$0xf] %v4167_v10  ;;  %1044 = vst [vmem:[#allocation4 + $0x34] sm:$0x1] %v4167_v10  ;;  %v3748_v17 = vld [vmem:[#allocation12 + $0x90] sm:$0xff]   ;;  %v3760_v23 = vld [vmem:[#allocation12 + $0xa0] sm:$0xff]  }
  0xf3   : > { %1045 = vst [vmem:[#allocation4 + $0x38] sm:$0xf] %v4167_v10  ;;  %1046 = vst [vmem:[#allocation4 + $0x3c] sm:$0x1] %v4167_v10  ;;  %v3749_v27 = vld [vmem:[#allocation12 + $0x8] sm:$0xff]   ;;  %v3755_v29 = vld [vmem:[#allocation12 + $0x50] sm:$0xff]  }
  0xf4   : > { %704 = vrot.lane.b32.xlu0 %v703_v30, %s4164_s18  ;;  %1047 = vst [vmem:[#allocation4 + $0x40] sm:$0xf] %v4167_v10  ;;  %1048 = vst [vmem:[#allocation4 + $0x44] sm:$0x1] %v4167_v10  ;;  %v3764_v28 = vld [vmem:[#allocation12 + $0xa8] sm:$0xff]   ;;  %v3757_v34 = vld [vmem:[#allocation12 + $0x10] sm:$0xff]  }
  0xf5   : > { %1049 = vst [vmem:[#allocation4 + $0x48] sm:$0xf] %v4167_v10  ;;  %1050 = vst [vmem:[#allocation4 + $0x4c] sm:$0x1] %v4167_v10  ;;  %v3775_v30 = vld [vmem:[#allocation4] sm:$0x1e]  }
  0xf6   : > { %684 = vrot.lane.b32.xlu1 %v683_v31, %s4165_s14  ;;  %v3766_v31 = vld [vmem:[#allocation12 + $0xf0] sm:$0xff]   ;;  %v1250_v32 = vrot.slane %v3775_v30, 1  ;;  %v3780_v33 = vld [vmem:[#allocation4] sm:$0x1f]   ;;  %vm1066_vm11 = vcmask 1043456   ;;  %vm1072_vm14 = vcmask 1040384  }
  0xf7   : > { %v3759_v36 = vld [vmem:[#allocation12 + $0x58] sm:$0xff]   ;;  %v1237_v37 = vshll.u32 %v3780_v33, 16  ;;  %v1235_v39 = vshrl.u32 %v3780_v33, 16  ;;  %v3773_v51 = vld [vmem:[#allocation12 + $0x30] sm:$0xff]   ;;  %vm1067_vm12 = vsmask.f32 7938 }
  0xf8   : > { %631 = vrot.lane.b32.xlu0 %v630_v38, %s4165_s14  ;;  %1252 = vst [vmem:[#allocation5 + $0x10] sm:$0xf] %v1250_v32  ;;  %v3770_v38 = vld [vmem:[#allocation12 + $0xf8] sm:$0xff]   ;;  %vm1073_vm13 = vsmask.f32 256  ;;  %vm4593_vm15 = vmand %vm1066_vm11, %vm1067_vm12  ;;  %s4168_s29 = smov [#allocation18]  }
  0xf9   : > { %v1239_v40 = vrot.slane %v1237_v37, 1  ;;  %v3779_v54 = vld [vmem:[#allocation12 + $0x38] sm:$0xff]   ;;  %v1138_v30 = vld [vmem:[#allocation4 + $0x24] sm:$0x1]  ;;  %vm4598_vm0 = vmand %vm1072_vm14, %vm1073_vm13  ;;  %s4078_s15 = sshll.u32 %s4168_s29, 4  ;;  %s4079_s15 = int_to_ptr.vmem [resolvable:$false] %s4078_s15 }
  0xfa   : > { %765 = vrot.lane.b32.xlu1 %v3724_v35, %s4163_s8  ;;  %v3768_v35 = vld [vmem:[#allocation12 + $0xb0] sm:$0xff]   ;;  %v1069_v37 = vld [vmem:[#allocation4 + $0x8] sm:$0xf]  ;;  %p4081_p1 = scmp.lt.s32.totalorder %s4651_s21, %s4079_s15 }
  0xfc   : > { %713 = vrot.lane.b32.xlu0 %v3725_v41, %s4163_s8  ;;  %v3761_v41 = vld [vmem:[#allocation12 + $0x18] sm:$0xff]   ;;  %v3875_v11 = vld [vmem:[#allocation4 + $0x48] sm:$0x1e]   ;;  %s4080_s8 = scalar_lea.vmem %s4079_s15, 2048 }
  0xfd   : > { %p4082_p3 = scmp.lt.s32.totalorder %s4080_s8, %s4074_s9 }
  0xfe   : > { %784 = vrot.lane.b32.xlu1 %v783_v42, %s4165_s14  ;;  %v3772_v42 = vld [vmem:[#allocation12 + $0xb8] sm:$0xff]  }
  0xff   : > { %p4083_p2 = por %p4082_p3, %p4081_p1 }
 0x100   : > { %731 = vrot.lane.b32.xlu0 %v730_v43, %s4165_s14  ;;  %v3763_v43 = vld [vmem:[#allocation12 + $0x60] sm:$0xff]  }
 0x101   : > { %p4084_p8 = pnand %p4083_p2, %p4077_p13 }
 0x144   : > { %v408_v44 = vpop.permute.xlu1 %407  ;;  %v514_v45 = vpop.permute.xlu0 %513 }
 0x148   : > { %v464_v46 = vpop.permute.xlu1 %463 }
 0x14a   : > { %v398_v47 = vpop.permute.xlu0 %397 }
 0x14b   : > { %401 = vst.msk [vmem:[#allocation2] sm:$0xf] %vm400_vm2, %v398_v47  ;;  %v3767_v47 = vld [vmem:[#allocation12 + $0x68] sm:$0xff]  }
 0x14c   : > { %v566_v48 = vpop.permute.xlu1 %565  ;;  %411 = vst.msk [vmem:[#allocation2] sm:$0xf] %vm410_vm3, %v408_v44  ;;  %v1240_v44 = vor.u32 %v1239_v40, %v1235_v39  ;;  %v1075_v40 = vld [vmem:[#allocation4 + $0xc] sm:$0x1] }
 0x14e   : > { %v454_v49 = vpop.permute.xlu0 %453  ;;  %1242 = vst [vmem:[#allocation5 + $0x8] sm:$0xf] %v1240_v44 }
 0x14f   : > { %457 = vst.msk [vmem:[#allocation2] sm:$0xf0] %vm456_vm4, %v454_v49  ;;  %v3769_v49 = vld [vmem:[#allocation12 + $0x28] sm:$0xff]  }
 0x150   : > { %v557_v50 = vpop.permute.xlu1 %556  ;;  %467 = vst.msk [vmem:[#allocation2] sm:$0xf0] %vm466_vm5, %v464_v46  ;;  %v1225_v46 = vld [vmem:[#allocation4] sm:$0xf] }
 0x151   : > { %559 = vst.msk [vmem:[#allocation2 + $0x8] sm:$0xf0] %vm456_vm4, %v557_v50  ;;  %1226 = vst [vmem:[#allocation5] sm:$0xf] %v1225_v46  ;;  %v3771_v50 = vld [vmem:[#allocation12 + $0x70] sm:$0xff]  }
 0x152   : > { %568 = vst.msk [vmem:[#allocation2 + $0x8] sm:$0xf0] %vm466_vm5, %v566_v48  ;;  %v505_v52 = vpop.permute.xlu0 %504 }
 0x153   : > { %507 = vst.msk [vmem:[#allocation2 + $0x8] sm:$0xf] %vm400_vm2, %v505_v52  ;;  %v3777_v52 = vld [vmem:[#allocation12 + $0x78] sm:$0xff]  }
 0x154   : > { %v484_v53 = vpop.permute.xlu1 %483  ;;  %516 = vst.msk [vmem:[#allocation2 + $0x8] sm:$0xf] %vm410_vm3, %v514_v45  ;;  %v3765_v45 = vld [vmem:[#allocation12 + $0x20] sm:$0xff]  }
 0x155   : > { %487 = vst.msk [vmem:[#allocation2] sm:$0xf0] %vm486_vm6, %v484_v53 }
 0x156   : > { %v427_v55 = vpop.permute.xlu0 %426 }
 0x157   : > { %430 = vst.msk [vmem:[#allocation2] sm:$0xf] %vm429_vm8, %v427_v55  ;;  %v3787_v55 = vld [vmem:[#allocation12 + $0x1c0] sm:$0xff]  }
 0x158   : > { %v585_v56 = vpop.permute.xlu1 %584 }
 0x159   : > { %587 = vst.msk [vmem:[#allocation2 + $0x8] sm:$0xf0] %vm486_vm6, %v585_v56  ;;  %v3789_v56 = vld [vmem:[#allocation12 + $0x140] sm:$0xff]  }
 0x15a   : > { %v532_v57 = vpop.permute.xlu0 %531 }
 0x15b   : > { %534 = vst.msk [vmem:[#allocation2 + $0x8] sm:$0xf] %vm429_vm8, %v532_v57  ;;  %v3856_v57 = vld [vmem:[#allocation4 + $0x48] sm:$0x1f]  }
 0x15c   : > { %v657_v58 = vpop.permute.xlu1 %656 }
 0x15d   : > { %659 = vst.msk [vmem:[#allocation2 + $0x10] sm:$0xf0] %vm456_vm4, %v657_v58  ;;  %v1939_v58 = vshrl.u32 %v3856_v57, 16 }
 0x15e   : > { %v605_v59 = vpop.permute.xlu0 %604  ;;  %v925_v60 = vld [vmem:[#allocation2] sm:$0xff] }
 0x15f   : > { %607 = vst.msk [vmem:[#allocation2 + $0x10] sm:$0xf] %vm400_vm2, %v605_v59  ;;  %941 = vrot.lane.b32.xlu0 %v925_v60, %s4166_s22  ;;  %3519 = vmatprep.mubr.msk.bf16.mxu0 %vm831_vm9, %v925_v60  ;;  %v1942_v59 = vshll.u32 %v3856_v57, 16  ;;  %v1941_v60 = vrot.slane %v1939_v58, 4 }
 0x160   : > { %v666_v61 = vpop.permute.xlu1 %665 }
 0x161   : > { %668 = vst.msk [vmem:[#allocation2 + $0x10] sm:$0xf0] %vm466_vm5, %v666_v61  ;;  %v1944_v61 = vrot.slane %v1942_v59, 5 }
 0x162   : > { %v614_v62 = vpop.permute.xlu0 %613  ;;  %v926_v63 = vld [vmem:[#allocation2 + $0x8] sm:$0xff] }
 0x163   : > { %616 = vst.msk [vmem:[#allocation2 + $0x10] sm:$0xf] %vm410_vm3, %v614_v62  ;;  %943 = vrot.lane.b32.xlu1 %v926_v63, %s4166_s22  ;;  %3520 = vmatmul.mubr.msk.bf16.vlgmr.msra.gmra.mrb[0].mxu0 %vm831_vm9, %v926_v63  ;;  %v1945_v62 = vor.u32 %v1944_v61, %v1941_v60  ;;  %v3862_v63 = vld [vmem:[#allocation4 + $0x48] ss:$0 sps:$4 sm:$0xff]  }
 0x164   : > { %v757_v0 = vpop.permute.xlu1 %756  ;;  %3380 = vmatpush3.bf16.msra.mxu0 %v3741_v12  ;;  %1930 = vst [vmem:[#allocation5 + $0x108] sm:$0xf0] %v3862_v63 }
 0x165   : > { %759 = vst.msk [vmem:[#allocation2 + $0x18] sm:$0xf0] %vm456_vm4, %v757_v0  ;;  %3381 = vmatprep.subr.bf16.mxu0 %v3742_v13  ;;  %1947 = vst [vmem:[#allocation5 + $0x110] sm:$0xf0] %v1945_v62  ;;  %v4587_v0 = vld [vmem:[#allocation11] ss:$0 sm:$0xff] }
 0x166   : > { %v705_v1 = vpop.permute.xlu0 %704 }
 0x167   : > { %707 = vst.msk [vmem:[#allocation2 + $0x18] sm:$0xf] %vm400_vm2, %v705_v1 }
 0x168   : > { %v685_v2 = vpop.permute.xlu1 %684  ;;  %3382 = vmatpush3.bf16.msra.mxu0 %v3744_v15  ;;  %v1955_v15 = vrot.slane %v3875_v11, 5 }
 0x169   : > { %687 = vst.msk [vmem:[#allocation2 + $0x10] sm:$0xf0] %vm486_vm6, %v685_v2  ;;  %3383 = vmatprep.subr.bf16.mxu0 %v3746_v16 }
 0x16a   : > { %v632_v3 = vpop.permute.xlu0 %631  ;;  %1957 = vst [vmem:[#allocation5 + $0x118] sm:$0xf0] %v1955_v15 }
 0x16b   : > { %634 = vst.msk [vmem:[#allocation2 + $0x10] sm:$0xf] %vm429_vm8, %v632_v3 }
 0x16c   : > { %v766_v4 = vpop.permute.xlu1 %765  ;;  %3384 = vmatpush3.bf16.msra.mxu0 %v3748_v17 }
 0x16d   : > { %768 = vst.msk [vmem:[#allocation2 + $0x18] sm:$0xf0] %vm466_vm5, %v766_v4  ;;  %3385 = vmatprep.subr.bf16.mxu0 %v3754_v18 }
 0x16e   : > { %v714_v5 = vpop.permute.xlu0 %713 }
 0x16f   : > { %716 = vst.msk [vmem:[#allocation2 + $0x18] sm:$0xf] %vm410_vm3, %v714_v5 }
 0x170   : > { %v785_v6 = vpop.permute.xlu1 %784  ;;  %3386 = vmatpush3.bf16.msra.mxu0 %v3756_v19 }
 0x171   : > { %787 = vst.msk [vmem:[#allocation2 + $0x18] sm:$0xf0] %vm486_vm6, %v785_v6  ;;  %3387 = vmatprep.subr.bf16.mxu0 %v3758_v21 }
 0x172   : > { %v732_v7 = vpop.permute.xlu0 %731  ;;  %v927_v8 = vld [vmem:[#allocation2 + $0x10] sm:$0xff] }
 0x173   : > { %734 = vst.msk [vmem:[#allocation2 + $0x18] sm:$0xf] %vm429_vm8, %v732_v7  ;;  %945 = vrot.lane.b32.xlu0 %v927_v8, %s4166_s22  ;;  %3523 = vmatprep.mubr.msk.bf16.mxu0 %vm831_vm9, %v927_v8 }
 0x174   : > { %3388 = vmatpush3.bf16.msra.mxu0 %v3760_v23  ;;  %v1117_v23 = vld [vmem:[#allocation4 + $0x1c] sm:$0x1] }
 0x175   : > { %3389 = vmatprep.subr.bf16.mxu0 %v3762_v26  ;;  %v3799_v26 = vld [vmem:[#allocation12 + $0x1d8] sm:$0xff]  }
 0x178   : > { %3390 = vmatpush3.bf16.msra.mxu0 %v3764_v28 }
 0x179   : > { %3391 = vmatprep.subr.bf16.mxu0 %v3766_v31 }
 0x17a   : > { %v928_v9 = vld [vmem:[#allocation2 + $0x18] sm:$0xff] }
 0x17b   : > { %947 = vrot.lane.b32.xlu1 %v928_v9, %s4166_s22  ;;  %3524 = vmatmul.mubr.msk.bf16.gmra.mrb[4].mxu0 %vm831_vm9, %v928_v9 }
 0x17c   : > { %3392 = vmatpush3.bf16.msra.mxu0 %v3768_v35 }
 0x17d   : > { %3393 = vmatprep.subr.bf16.mxu0 %v3770_v38 }
 0x180   : > { %3394 = vmatpush3.bf16.msra.mxu0 %v3772_v42 }
 0x181   : > { %3459 = vmatprep.subr.bf16.mxu0 %v3787_v55 }
 0x1d1   : > { %v942_v20 = vpop.permute.xlu0 %941 }
 0x1d2   : > { %3529 = vmatprep.mubr.msk.bf16.mxu1 %vm949_vm10, %v942_v20 }
 0x1d5   : > { %v944_v25 = vpop.permute.xlu1 %943 }
 0x1d6   : > { %3530 = vmatmul.mubr.msk.bf16.vlgmr.msra.gmra.mrb[0].mxu1 %vm949_vm10, %v944_v25 }
 0x1d7   : > { %3340 = vmatpush3.bf16.msra.mxu1 %v3745_v22  ;;  %v1114_v22 = vld [vmem:[#allocation4 + $0x18] sm:$0xf] }
 0x1d8   : > { %3341 = vmatprep.subr.bf16.mxu1 %v3747_v24 }
 0x1db   : > { %3342 = vmatpush3.bf16.msra.mxu1 %v3749_v27 }
 0x1dc   : > { %3343 = vmatprep.subr.bf16.mxu1 %v3755_v29  ;;  %v1135_v29 = vld [vmem:[#allocation4 + $0x20] sm:$0xf] }
 0x1df   : > { %3344 = vmatpush3.bf16.msra.mxu1 %v3757_v34 }
 0x1e0   : > { %3345 = vmatprep.subr.bf16.mxu1 %v3759_v36 }
 0x1e3   : > { %3346 = vmatpush3.bf16.msra.mxu1 %v3761_v41 }
 0x1e4   : > { %3347 = vmatprep.subr.bf16.mxu1 %v3763_v43 }
 0x1e5   : > { %v946_v48 = vpop.permute.xlu0 %945 }
 0x1e6   : > { %3533 = vmatprep.mubr.msk.bf16.mxu1 %vm949_vm10, %v946_v48  ;;  %v1096_v48 = vld [vmem:[#allocation4 + $0x14] sm:$0x1] }
 0x1e7   : > { %3348 = vmatpush3.bf16.msra.mxu1 %v3765_v45 }
 0x1e8   : > { %3349 = vmatprep.subr.bf16.mxu1 %v3767_v47  ;;  %v1093_v47 = vld [vmem:[#allocation4 + $0x10] sm:$0xf] }
 0x1eb   : > { %3350 = vmatpush3.bf16.msra.mxu1 %v3769_v49 }
 0x1ec   : > { %3351 = vmatprep.subr.bf16.mxu1 %v3771_v50 }
 0x1ed   : > { %v948_v53 = vpop.permute.xlu1 %947 }
 0x1ee   : > { %3534 = vmatmul.mubr.msk.bf16.gmra.mrb[4].mxu1 %vm949_vm10, %v948_v53 }
 0x1ef   : > { %3352 = vmatpush3.bf16.msra.mxu1 %v3773_v51 }
 0x1f0   : > { %3353 = vmatprep.subr.bf16.mxu1 %v3777_v52 }
 0x1f3   : > { %3354 = vmatpush3.bf16.msra.mxu1 %v3779_v54 }
 0x1f4   : > { %3419 = vmatprep.subr.bf16.mxu1 %v3789_v56 }
 0x236   : > { %v3521_v1 = vpop.f32.mrb[0].mxu0 }
 0x237   : > { %v887_v2 = vadd.f32 %v3521_v1, %v4587_v0  ;;  %v878_v3 = vpop.f32.mrb[1].mxu0 }
 0x238   : > { %v879_v4 = vadd.f32 %v4587_v0, %v878_v3  ;;  %v3522_v5 = vpop.f32.mrb[2].mxu0 }
 0x239   : > { %v890_v6 = vadd.f32 %v3522_v5, %v4587_v0  ;;  %v881_v7 = vpop.f32.mrb[3].mxu0  ;;  %v911_v9 = vmax.f32 %v887_v2, 0.0 }
 0x23a   : > { %v882_v8 = vadd.f32 %v4587_v0, %v881_v7  ;;  %v909_v12 = vmax.f32 %v879_v4, 0.0 }
 0x23b   : > { %v912_v10 = vmax.f32 %v890_v6, 0.0 }
 0x23c   : > { %v910_v13 = vmax.f32 %v882_v8, 0.0 }
 0x23d   : > { %v918_v14 = vpack.c.bf16 %v912_v10, %v911_v9 }
 0x23e   : > { %v917_v16 = vpack.c.bf16 %v910_v13, %v909_v12 }
 0x23f   : > { %922 = vst [vmem:[#allocation3 + $0x8] sm:$0xff] %v918_v14 }
 0x240   : > { %921 = vst [vmem:[#allocation3] sm:$0xff] %v917_v16 }
 0x246   : > { %v3736_v17 = vld [vmem:[#allocation3 + $0x8] ss:$0 sps:$4 sm:$0xff]   ;;  %v3737_v18 = vld [vmem:[#allocation3 + $0xc] ss:$0 sps:$4 sm:$0xff]  }
 0x247   : > { %v3738_v19 = vld [vmem:[#allocation3] ss:$0 sps:$4 sm:$0xff]   ;;  %v1104_v20 = vshrl.u32 %v3736_v17, 16  ;;  %v3739_v21 = vld [vmem:[#allocation3 + $0x4] ss:$0 sps:$4 sm:$0xff]   ;;  %v1125_v24 = vshrl.u32 %v3737_v18, 16 }
 0x248   : > { %v1056_v25 = vshrl.u32 %v3738_v19, 16  ;;  %v1107_v28 = vshll.u32 %v3736_v17, 16  ;;  %v1083_v31 = vshrl.u32 %v3739_v21, 16  ;;  %v1128_v34 = vshll.u32 %v3737_v18, 16 }
 0x249   : > { %v1106_v27 = vrot.slane %v1104_v20, 7  ;;  %v1127_v33 = vrot.slane %v1125_v24, 7  ;;  %v1059_v36 = vshll.u32 %v3738_v19, 16  ;;  %v1086_v42 = vshll.u32 %v3739_v21, 16 }
 0x24a   : > { %v1058_v35 = vrot.slane %v1056_v25, 7  ;;  %v1085_v41 = vrot.slane %v1083_v31, 7 }
 0x24b   : > { %v1109_v38 = vor.u32 %v1107_v28, %v1106_v27  ;;  %v1110_v39 = vrot.slane %v1106_v27, 4  ;;  %v1130_v43 = vor.u32 %v1128_v34, %v1127_v33  ;;  %v1131_v44 = vrot.slane %v1127_v33, 4  ;;  %v1198_v27 = vld [vmem:[#allocation4 + $0x38] sm:$0xf]  ;;  %v1201_v28 = vld [vmem:[#allocation4 + $0x3c] sm:$0x1] }
 0x24c   : > { %v1061_v45 = vor.u32 %v1059_v36, %v1058_v35  ;;  %v1062_v46 = vrot.slane %v1058_v35, 4  ;;  %v1088_v51 = vor.u32 %v1086_v42, %v1085_v41  ;;  %v1089_v52 = vrot.slane %v1085_v41, 4  ;;  %v3788_v35 = vld [vmem:[#allocation12 + $0x180] sm:$0xff]  }
 0x24d   : > { %v1115_v49 = vsel %vm4593_vm15, %v1109_v38, %v1114_v22  ;;  %v1118_v50 = vsel %vm4598_vm0, %v1110_v39, %v1117_v23  ;;  %v1136_v54 = vsel %vm4593_vm15, %v1130_v43, %v1135_v29  ;;  %v1139_v55 = vsel %vm4598_vm0, %v1131_v44, %v1138_v30  ;;  %v1222_v38 = vld [vmem:[#allocation4 + $0x44] sm:$0x1]  ;;  %v1156_v39 = vld [vmem:[#allocation4 + $0x28] sm:$0xf] }
 0x24e   : > { %v3525_v53 = vpop.f32.mrb[4].mxu0  ;;  %1116 = vst [vmem:[#allocation4 + $0x18] sm:$0xf] %v1115_v49  ;;  %1119 = vst [vmem:[#allocation4 + $0x1c] sm:$0x1] %v1118_v50  ;;  %v1070_v56 = vsel %vm4593_vm15, %v1061_v45, %v1069_v37  ;;  %v1076_v57 = vsel %vm4598_vm0, %v1062_v46, %v1075_v40  ;;  %v1094_v59 = vsel %vm4593_vm15, %v1088_v51, %v1093_v47  ;;  %v3790_v44 = vld [vmem:[#allocation12 + $0x1c8] sm:$0xff]  }
 0x24f   : > { %v894_v58 = vpop.f32.mrb[5].mxu0  ;;  %1137 = vst [vmem:[#allocation4 + $0x20] sm:$0xf] %v1136_v54  ;;  %1140 = vst [vmem:[#allocation4 + $0x24] sm:$0x1] %v1139_v55  ;;  %v1097_v60 = vsel %vm4598_vm0, %v1089_v52, %v1096_v48  ;;  %v903_v61 = vadd.f32 %v3525_v53, %v4587_v0  ;;  %v3793_v53 = vld [vmem:[#allocation12 + $0x188] sm:$0xff]  }
 0x250   : > { %1071 = vst [vmem:[#allocation4 + $0x8] sm:$0xf] %v1070_v56  ;;  %1077 = vst [vmem:[#allocation4 + $0xc] sm:$0x1] %v1076_v57  ;;  %v895_v62 = vadd.f32 %v4587_v0, %v894_v58  ;;  %v3526_v63 = vpop.f32.mrb[6].mxu0 }
 0x251   : > { %1095 = vst [vmem:[#allocation4 + $0x10] sm:$0xf] %v1094_v59  ;;  %1098 = vst [vmem:[#allocation4 + $0x14] sm:$0x1] %v1097_v60  ;;  %v906_v1 = vadd.f32 %v3526_v63, %v4587_v0  ;;  %v897_v2 = vpop.f32.mrb[7].mxu0  ;;  %v915_v4 = vmax.f32 %v903_v61, 0.0 }
 0x252   : > { %v898_v3 = vadd.f32 %v4587_v0, %v897_v2  ;;  %v913_v6 = vmax.f32 %v895_v62, 0.0  ;;  %v1219_v37 = vld [vmem:[#allocation4 + $0x40] sm:$0xf]  ;;  %v1159_v40 = vld [vmem:[#allocation4 + $0x2c] sm:$0x1] }
 0x253   : > { %v916_v5 = vmax.f32 %v906_v1, 0.0  ;;  %v1177_v47 = vld [vmem:[#allocation4 + $0x30] sm:$0xf]  ;;  %v1180_v48 = vld [vmem:[#allocation4 + $0x34] sm:$0x1] }
 0x254   : > { %v914_v7 = vmax.f32 %v898_v3, 0.0 }
 0x255   : > { %v920_v8 = vpack.c.bf16 %v916_v5, %v915_v4  ;;  %v1436_v10 = vld [vmem:[#allocation4 + $0x18] sm:$0xf] }
 0x256   : > { %v919_v9 = vpack.c.bf16 %v914_v7, %v913_v6  ;;  %1437 = vst [vmem:[#allocation5 + $0x60] sm:$0xf] %v1436_v10  ;;  %v3778_v14 = vld [vmem:[#allocation4 + $0x20] ss:$0 sps:$4 sm:$0xff]   ;;  %v3784_v52 = vld [vmem:[#allocation4 + $0x18] sm:$0x1f]  }
 0x257   : > { %924 = vst [vmem:[#allocation3 + $0x18] sm:$0xff] %v920_v8  ;;  %v1253_v11 = vld [vmem:[#allocation4 + $0x8] sm:$0xf]  ;;  %1530 = vst [vmem:[#allocation5 + $0x60] sm:$0xf0] %v3778_v14  ;;  %v3795_v7 = vld [vmem:[#allocation12 + $0x1d0] sm:$0xff]  }
 0x258   : > { %923 = vst [vmem:[#allocation3 + $0x10] sm:$0xff] %v919_v9  ;;  %1254 = vst [vmem:[#allocation5 + $0x18] sm:$0xf] %v1253_v11  ;;  %v3774_v12 = vld [vmem:[#allocation4 + $0x10] ss:$0 sps:$4 sm:$0xff]  }
 0x259   : > { %v3776_v13 = vld [vmem:[#allocation4 + $0x8] sm:$0x1e]   ;;  %1347 = vst [vmem:[#allocation5 + $0x18] sm:$0xf0] %v3774_v12  ;;  %v3782_v0 = vld [vmem:[#allocation4 + $0x8] ss:$0 sps:$4 sm:$0xff]  }
 0x25a   : > { %v1339_v15 = vrot.slane %v3776_v13, 5  ;;  %v3781_v16 = vld [vmem:[#allocation4 + $0x8] sm:$0x1f]   ;;  %1314 = vst [vmem:[#allocation5] sm:$0xf0] %v3782_v0  ;;  %v3797_v0 = vld [vmem:[#allocation12 + $0x190] sm:$0xff]  }
 0x25b   : > { %v1323_v17 = vshrl.u32 %v3781_v16, 16  ;;  %v1326_v18 = vshll.u32 %v3781_v16, 16  ;;  %v4622_v19 = vld [vmem:[#allocation4 + $0x10] sm:$0x1f]   ;;  %v3786_v5 = vld [vmem:[#allocation4 + $0x18] sm:$0x1e]  }
 0x25c   : > { %1341 = vst [vmem:[#allocation5 + $0x10] sm:$0xf0] %v1339_v15  ;;  %v1418_v51 = vshrl.u32 %v4622_v19, 16  ;;  %v1420_v58 = vshll.u32 %v4622_v19, 16  ;;  %v3785_v59 = vld [vmem:[#allocation4 + $0x10] sm:$0x1e]  }
 0x25d   : > { %v1325_v43 = vrot.slane %v1323_v17, 4  ;;  %v1328_v50 = vrot.slane %v1326_v18, 5  ;;  %v1408_v6 = vld [vmem:[#allocation4 + $0x10] sm:$0xf]  ;;  %v3791_v12 = vld [vmem:[#allocation4 + $0x18] ss:$0 sps:$4 sm:$0xff]  }
 0x25e   : > { %v3750_v20 = vld [vmem:[#allocation3 + $0x18] ss:$0 sps:$4 sm:$0xff]   ;;  %v3751_v21 = vld [vmem:[#allocation3 + $0x1c] ss:$0 sps:$4 sm:$0xff]   ;;  %v1970_v57 = vld [vmem:[#allocation5 + $0x60] sm:$0xff]  ;;  %v1422_v16 = vrot.slane %v1420_v58, 1 }
 0x25f   : > { %v3752_v22 = vld [vmem:[#allocation3 + $0x10] ss:$0 sps:$4 sm:$0xff]   ;;  %v1188_v23 = vshrl.u32 %v3750_v20, 16  ;;  %v1191_v24 = vshll.u32 %v3750_v20, 16  ;;  %v3753_v25 = vld [vmem:[#allocation3 + $0x14] ss:$0 sps:$4 sm:$0xff]   ;;  %v1329_v15 = vor.u32 %v1328_v50, %v1325_v43 }
 0x260   : > { %v1209_v29 = vshrl.u32 %v3751_v21, 16  ;;  %v1212_v30 = vshll.u32 %v3751_v21, 16  ;;  %v1146_v31 = vshrl.u32 %v3752_v22, 16  ;;  %v1149_v33 = vshll.u32 %v3752_v22, 16  ;;  %v1961_v34 = vld [vmem:[#allocation5 + $0x18] sm:$0xff] }
 0x261   : > { %v1190_v36 = vrot.slane %v1188_v23, 7  ;;  %v1167_v41 = vshrl.u32 %v3753_v25, 16  ;;  %v1170_v42 = vshll.u32 %v3753_v25, 16  ;;  %2674 = vmatprep.mubr.bf16.mxu0 %v1961_v34  ;;  %1409 = vst [vmem:[#allocation5 + $0x48] sm:$0xf] %v1408_v6  ;;  %v1506_v18 = vshrl.u32 %v3784_v52, 16 }
 0x262   : > { %v1211_v45 = vrot.slane %v1209_v29, 7  ;;  %v1148_v46 = vrot.slane %v1146_v31, 7  ;;  %v3803_v17 = vld [vmem:[#allocation4 + $0x20] sm:$0x1e]   ;;  %v1509_v19 = vshll.u32 %v3784_v52, 16  ;;  %v1433_v20 = vrot.slane %v3785_v59, 1 }
 0x263   : > { %v1960_v49 = vld [vmem:[#allocation5 + $0x10] sm:$0xff]  ;;  %v1193_v54 = vor.u32 %v1191_v24, %v1190_v36  ;;  %v1194_v55 = vrot.slane %v1190_v36, 4  ;;  %v1169_v56 = vrot.slane %v1167_v41, 7  ;;  %v1522_v21 = vrot.slane %v3786_v5, 5  ;;  %1497 = vst [vmem:[#allocation5 + $0x48] sm:$0xf0] %v3791_v12 }
 0x264   : > { %2675 = vmatmul.mubr.bf16.vlgmr.msra.gmra.mrb[8].mxu0 %v1960_v49  ;;  %v1214_v60 = vor.u32 %v1212_v30, %v1211_v45  ;;  %v1215_v61 = vrot.slane %v1211_v45, 4  ;;  %v1151_v62 = vor.u32 %v1149_v33, %v1148_v46  ;;  %v1152_v63 = vrot.slane %v1148_v46, 4  ;;  %1331 = vst [vmem:[#allocation5 + $0x8] sm:$0xf0] %v1329_v15  ;;  %v3810_v24 = vld [vmem:[#allocation4 + $0x20] sm:$0x1f]  }
 0x265   : > { %2682 = vmatprep.mubr.bf16.mxu0 %v1970_v57  ;;  %3460 = vmatpush3.bf16.msra.mxu0 %v3788_v35  ;;  %v1199_v1 = vsel %vm4593_vm15, %v1193_v54, %v1198_v27  ;;  %v1202_v2 = vsel %vm4598_vm0, %v1194_v55, %v1201_v28  ;;  %v1172_v3 = vor.u32 %v1170_v42, %v1169_v56  ;;  %v1173_v4 = vrot.slane %v1169_v56, 4  ;;  %v3801_v27 = vld [vmem:[#allocation12 + $0x198] sm:$0xff]   ;;  %v3806_v29 = vld [vmem:[#allocation12 + $0x1e0] sm:$0xff]   ;;  %v3825_v31 = vld [vmem:[#allocation4 + $0x10] sm:$0x1f]  }
 0x266   : > { %3461 = vmatprep.subr.bf16.mxu0 %v3790_v44  ;;  %1200 = vst [vmem:[#allocation4 + $0x38] sm:$0xf] %v1199_v1  ;;  %1203 = vst [vmem:[#allocation4 + $0x3c] sm:$0x1] %v1202_v2  ;;  %v1220_v8 = vsel %vm4593_vm15, %v1214_v60, %v1219_v37  ;;  %v1223_v9 = vsel %vm4598_vm0, %v1215_v61, %v1222_v38  ;;  %v1157_v10 = vsel %vm4593_vm15, %v1151_v62, %v1156_v39  ;;  %v1591_v28 = vld [vmem:[#allocation4 + $0x20] sm:$0xf] }
 0x267   : > { %v1160_v11 = vsel %vm4598_vm0, %v1152_v63, %v1159_v40  ;;  %1221 = vst [vmem:[#allocation4 + $0x40] sm:$0xf] %v1220_v8  ;;  %1224 = vst [vmem:[#allocation4 + $0x44] sm:$0x1] %v1223_v9  ;;  %v1178_v13 = vsel %vm4593_vm15, %v1172_v3, %v1177_v47  ;;  %v1181_v14 = vsel %vm4598_vm0, %v1173_v4, %v1180_v48  ;;  %v1616_v23 = vrot.slane %v3803_v17, 1  ;;  %v3792_v35 = vld [vmem:[#allocation12 + $0x100] sm:$0xff]  }
 0x268   : > { %1158 = vst [vmem:[#allocation4 + $0x28] sm:$0xf] %v1157_v10  ;;  %1161 = vst [vmem:[#allocation4 + $0x2c] sm:$0x1] %v1160_v11  ;;  %v1423_v22 = vor.u32 %v1422_v16, %v1418_v51  ;;  %v1508_v32 = vrot.slane %v1506_v18, 4  ;;  %v1511_v25 = vrot.slane %v1509_v19, 5 }
 0x269   : > { %1179 = vst [vmem:[#allocation4 + $0x30] sm:$0xf] %v1178_v13  ;;  %1182 = vst [vmem:[#allocation4 + $0x34] sm:$0x1] %v1181_v14  ;;  %3462 = vmatpush3.bf16.msra.mxu0 %v3793_v53  ;;  %v1603_v30 = vshll.u32 %v3810_v24, 16  ;;  %v1601_v37 = vshrl.u32 %v3810_v24, 16 }
 0x26a   : > { %3463 = vmatprep.subr.bf16.mxu0 %v3795_v7  ;;  %1435 = vst [vmem:[#allocation5 + $0x58] sm:$0xf] %v1433_v20  ;;  %1524 = vst [vmem:[#allocation5 + $0x58] sm:$0xf0] %v1522_v21  ;;  %v1512_v33 = vor.u32 %v1511_v25, %v1508_v32  ;;  %v4642_v34 = vld [vmem:[#allocation4 + $0x18] sm:$0x1f]  }
 0x26b   : > { %1425 = vst [vmem:[#allocation5 + $0x50] sm:$0xf] %v1423_v22  ;;  %1618 = vst [vmem:[#allocation5 + $0xa0] sm:$0xf] %v1616_v23  ;;  %v1605_v38 = vrot.slane %v1603_v30, 1  ;;  %v3794_v39 = vld [vmem:[#allocation12 + $0x148] sm:$0xff]  }
 0x26c   : > { %1592 = vst [vmem:[#allocation5 + $0x90] sm:$0xf] %v1591_v28  ;;  %1514 = vst [vmem:[#allocation5 + $0x50] sm:$0xf0] %v1512_v33  ;;  %v3809_v41 = vld [vmem:[#allocation12 + $0x1a0] sm:$0xff]   ;;  %v1958_v42 = vld [vmem:[#allocation5] sm:$0xff] }
 0x26d   : > { %3464 = vmatpush3.bf16.msra.mxu0 %v3797_v0  ;;  %v1802_v36 = vld [vmem:[#allocation4 + $0x38] sm:$0xf]  ;;  %v1606_v44 = vor.u32 %v1605_v38, %v1601_v37  ;;  %v3813_v45 = vld [vmem:[#allocation12 + $0x1e8] sm:$0xff]   ;;  %v1291_v46 = vshrl.u32 %v3825_v31, 16  ;;  %v1293_v47 = vshll.u32 %v3825_v31, 16  ;;  %v1389_v50 = vshrl.u32 %v4642_v34, 16 }
 0x26e   : > { %3465 = vmatprep.subr.bf16.mxu0 %v3799_v26  ;;  %1803 = vst [vmem:[#allocation5 + $0xf0] sm:$0xf] %v1802_v36  ;;  %v1959_v48 = vld [vmem:[#allocation5 + $0x8] sm:$0xff]  ;;  %v3796_v52 = vld [vmem:[#allocation12 + $0x108] sm:$0xff]   ;;  %v3807_v53 = vld [vmem:[#allocation4 + $0x40] ss:$0 sps:$4 sm:$0xff]  }
 0x26f   : > { %v1619_v40 = vld [vmem:[#allocation4 + $0x28] sm:$0xf]  ;;  %2609 = vmatprep.mubr.bf16.mxu1 %v1959_v48  ;;  %1608 = vst [vmem:[#allocation5 + $0x98] sm:$0xf] %v1606_v44  ;;  %v1295_v54 = vrot.slane %v1293_v47, 1  ;;  %v3798_v55 = vld [vmem:[#allocation12 + $0x150] sm:$0xff]  }
 0x270   : > { %1620 = vst [vmem:[#allocation5 + $0xa8] sm:$0xf] %v1619_v40  ;;  %v3802_v43 = vld [vmem:[#allocation4 + $0x30] ss:$0 sps:$4 sm:$0xff]   ;;  %v3804_v49 = vld [vmem:[#allocation4 + $0x28] sm:$0x1e]   ;;  %2610 = vmatmul.mubr.bf16.vlgmr.msra.gmra.mrb[8].mxu1 %v1958_v42 }
 0x271   : > { %3466 = vmatpush3.bf16.msra.mxu0 %v3801_v27  ;;  %v1969_v51 = vld [vmem:[#allocation5 + $0x58] sm:$0xff]  ;;  %1713 = vst [vmem:[#allocation5 + $0xa8] sm:$0xf0] %v3802_v43  ;;  %v1705_v56 = vrot.slane %v3804_v49, 5  ;;  %v4645_v59 = vrot.slane %v1389_v50, 4  ;;  %3420 = vmatpush3.bf16.msra.mxu1 %v3792_v35  ;;  %v3822_v61 = vld [vmem:[#allocation12 + $0x1f0] sm:$0xff]   ;;  %v1296_v62 = vor.u32 %v1295_v54, %v1291_v46 }
 0x272   : > { %3467 = vmatprep.subr.bf16.mxu0 %v3806_v29  ;;  %2683 = vmatmul.mubr.bf16.gmra.mrb[12].mxu0 %v1969_v51  ;;  %v3811_v57 = vld [vmem:[#allocation4 + $0x28] sm:$0x1f]   ;;  %1896 = vst [vmem:[#allocation5 + $0xf0] sm:$0xf0] %v3807_v53  ;;  %v3817_v2 = vld [vmem:[#allocation4 + $0x30] sm:$0x1f]  }
 0x273   : > { %v3816_v58 = vld [vmem:[#allocation12 + $0x1a8] sm:$0xff]   ;;  %v3814_v60 = vld [vmem:[#allocation4 + $0x28] ss:$0 sps:$4 sm:$0xff]   ;;  %3421 = vmatprep.subr.bf16.mxu1 %v3794_v39  ;;  %1707 = vst [vmem:[#allocation5 + $0xa0] sm:$0xf0] %v1705_v56  ;;  %v1689_v63 = vshrl.u32 %v3811_v57, 16 }
 0x274   : > { %v1692_v1 = vshll.u32 %v3811_v57, 16  ;;  %v1968_v3 = vld [vmem:[#allocation5 + $0x50] sm:$0xff]  ;;  %v3800_v4 = vld [vmem:[#allocation12 + $0x110] sm:$0xff]   ;;  %1680 = vst [vmem:[#allocation5 + $0x90] sm:$0xf0] %v3814_v60  ;;  %v1392_v6 = vshll.u32 %v4642_v34, 16 }
 0x275   : > { %3468 = vmatpush3.bf16.msra.mxu0 %v3809_v41  ;;  %v3818_v5 = vld [vmem:[#allocation4 + $0x38] sm:$0x1f]   ;;  %1298 = vst [vmem:[#allocation5 + $0x38] sm:$0xf] %v1296_v62  ;;  %2617 = vmatprep.mubr.bf16.mxu1 %v1968_v3  ;;  %v1691_v8 = vrot.slane %v1689_v63, 4  ;;  %v1784_v10 = vshrl.u32 %v3817_v2, 16 }
 0x276   : > { %3469 = vmatprep.subr.bf16.mxu0 %v3813_v45  ;;  %v3805_v7 = vld [vmem:[#allocation12 + $0x158] sm:$0xff]   ;;  %v1694_v9 = vrot.slane %v1692_v1, 5  ;;  %v1786_v11 = vshll.u32 %v3817_v2, 16  ;;  %3422 = vmatpush3.bf16.msra.mxu1 %v3796_v52  ;;  %v1872_v13 = vshrl.u32 %v3818_v5, 16  ;;  %v1875_v14 = vshll.u32 %v3818_v5, 16  ;;  %v3824_v16 = vld [vmem:[#allocation12 + $0x1b0] sm:$0xff]  }
 0x277   : > { %v1967_v12 = vld [vmem:[#allocation5 + $0x48] sm:$0xff]  ;;  %v3819_v15 = vld [vmem:[#allocation4 + $0x30] sm:$0x1e]   ;;  %3423 = vmatprep.subr.bf16.mxu1 %v3798_v55  ;;  %v1394_v23 = vrot.slane %v1392_v6, 5  ;;  %v3812_v24 = vld [vmem:[#allocation12 + $0x160] sm:$0xff]  }
 0x278   : > { %v1979_v0 = vld [vmem:[#allocation5 + $0xa8] sm:$0xff]  ;;  %v1695_v17 = vor.u32 %v1694_v9, %v1691_v8  ;;  %v1788_v18 = vrot.slane %v1786_v11, 1  ;;  %v1874_v20 = vrot.slane %v1872_v13, 4  ;;  %v1877_v21 = vrot.slane %v1875_v14, 5  ;;  %2618 = vmatmul.mubr.bf16.gmra.mrb[12].mxu1 %v1967_v12  ;;  %v1774_v27 = vld [vmem:[#allocation4 + $0x30] sm:$0xf] }
 0x279   : > { %3470 = vmatpush3.bf16.msra.mxu0 %v3816_v58  ;;  %2690 = vmatprep.mubr.bf16.mxu0 %v1979_v0  ;;  %v3808_v19 = vld [vmem:[#allocation12 + $0x118] sm:$0xff]   ;;  %v1799_v22 = vrot.slane %v3819_v15, 1  ;;  %v1395_v31 = vor.u32 %v1394_v23, %v4645_v59  ;;  %1775 = vst [vmem:[#allocation5 + $0xd8] sm:$0xf] %v1774_v27  ;;  %v3829_v33 = vld [vmem:[#allocation4 + $0x38] ss:$0 sps:$4 sm:$0xff]  }
 0x27a   : > { %v3820_v26 = vld [vmem:[#allocation4 + $0x38] sm:$0x1e]   ;;  %3471 = vmatprep.subr.bf16.mxu0 %v3822_v61  ;;  %1697 = vst [vmem:[#allocation5 + $0x98] sm:$0xf0] %v1695_v17  ;;  %v1789_v32 = vor.u32 %v1788_v18, %v1784_v10  ;;  %3424 = vmatpush3.bf16.msra.mxu1 %v3800_v4  ;;  %v1978_v28 = vld [vmem:[#allocation5 + $0xa0] sm:$0xff]  ;;  %v1878_v29 = vor.u32 %v1877_v21, %v1874_v20  ;;  %v1988_v35 = vld [vmem:[#allocation5 + $0xf0] sm:$0xff] }
 0x27b   : > { %v3828_v25 = vld [vmem:[#allocation12 + $0x1f8] sm:$0xff]   ;;  %1801 = vst [vmem:[#allocation5 + $0xe8] sm:$0xf] %v1799_v22  ;;  %v1888_v30 = vrot.slane %v3820_v26, 5  ;;  %2691 = vmatmul.mubr.bf16.gmra.mrb[16].mxu0 %v1978_v28  ;;  %3425 = vmatprep.subr.bf16.mxu1 %v3805_v7  ;;  %v3832_v36 = vld [vmem:[#allocation4 + $0x8] sm:$0x1e]  }
 0x27c   : > { %v3831_v34 = vld [vmem:[#allocation12 + $0x1b8] sm:$0xff]   ;;  %1791 = vst [vmem:[#allocation5 + $0xe0] sm:$0xf] %v1789_v32  ;;  %2698 = vmatprep.mubr.bf16.mxu0 %v1988_v35  ;;  %1880 = vst [vmem:[#allocation5 + $0xe0] sm:$0xf0] %v1878_v29  ;;  %v1278_v38 = vrot.slane %v3832_v36, 1 }
 0x27d   : > { %1890 = vst [vmem:[#allocation5 + $0xe8] sm:$0xf0] %v1888_v30  ;;  %3472 = vmatpush3.bf16.msra.mxu0 %v3824_v16  ;;  %1397 = vst [vmem:[#allocation5 + $0x38] sm:$0xf0] %v1395_v31  ;;  %v3833_v37 = vld [vmem:[#allocation4 + $0x10] sm:$0x1e]  }
 0x27e   : > { %1863 = vst [vmem:[#allocation5 + $0xd8] sm:$0xf0] %v3829_v33  ;;  %3473 = vmatprep.subr.bf16.mxu0 %v3828_v25  ;;  %v1281_v39 = vld [vmem:[#allocation4 + $0x10] sm:$0xf]  ;;  %3426 = vmatpush3.bf16.msra.mxu1 %v3808_v19  ;;  %v3815_v40 = vld [vmem:[#allocation12 + $0x120] sm:$0xff]   ;;  %v1372_v41 = vrot.slane %v3833_v37, 5 }
 0x27f   : > { %1282 = vst [vmem:[#allocation5 + $0x30] sm:$0xf] %v1281_v39  ;;  %v3835_v42 = vld [vmem:[#allocation4 + $0x18] ss:$0 sps:$4 sm:$0xff]   ;;  %3427 = vmatprep.subr.bf16.mxu1 %v3812_v24  ;;  %v3821_v43 = vld [vmem:[#allocation12 + $0x168] sm:$0xff]   ;;  %v1976_v47 = vld [vmem:[#allocation5 + $0x90] sm:$0xff] }
 0x280   : > { %1280 = vst [vmem:[#allocation5 + $0x28] sm:$0xf] %v1278_v38  ;;  %v3837_v44 = vld [vmem:[#allocation4 + $0x20] sm:$0x1f]   ;;  %1374 = vst [vmem:[#allocation5 + $0x28] sm:$0xf0] %v1372_v41 }
 0x281   : > { %v1977_v45 = vld [vmem:[#allocation5 + $0x98] sm:$0xff]  ;;  %3474 = vmatpush3.bf16.msra.mxu0 %v3831_v34  ;;  %1380 = vst [vmem:[#allocation5 + $0x30] sm:$0xf0] %v3835_v42  ;;  %v1476_v48 = vshll.u32 %v3837_v44, 16  ;;  %v1474_v55 = vshrl.u32 %v3837_v44, 16  ;;  %v3827_v58 = vld [vmem:[#allocation12 + $0x170] sm:$0xff]  }
 0x282   : > { %v3838_v46 = vld [vmem:[#allocation4 + $0x28] sm:$0x1f]   ;;  %2625 = vmatprep.mubr.bf16.mxu1 %v1977_v45  ;;  %3428 = vmatpush3.bf16.msra.mxu1 %v3815_v40  ;;  %v3830_v62 = vld [vmem:[#allocation12 + $0x130] sm:$0xff]   ;;  %v3834_v7 = vld [vmem:[#allocation12 + $0x178] sm:$0xff]  }
 0x283   : > { %2626 = vmatmul.mubr.bf16.gmra.mrb[16].mxu1 %v1976_v47  ;;  %v1572_v49 = vshrl.u32 %v3838_v46, 16  ;;  %v1575_v50 = vshll.u32 %v3838_v46, 16  ;;  %v3840_v51 = vld [vmem:[#allocation4 + $0x8] sm:$0x1f]   ;;  %v1986_v52 = vld [vmem:[#allocation5 + $0xe0] sm:$0xff]  ;;  %v1478_v56 = vrot.slane %v1476_v48, 1  ;;  %3429 = vmatprep.subr.bf16.mxu1 %v3821_v43 }
 0x284   : > { %v1987_v53 = vld [vmem:[#allocation5 + $0xe8] sm:$0xff]  ;;  %v3823_v54 = vld [vmem:[#allocation12 + $0x128] sm:$0xff]   ;;  %2633 = vmatprep.mubr.bf16.mxu1 %v1986_v52  ;;  %v1265_v61 = vshll.u32 %v3840_v51, 16  ;;  %v1263_v3 = vshrl.u32 %v3840_v51, 16  ;;  %v3843_v13 = vld [vmem:[#allocation4 + $0x20] sm:$0x1e]  }
 0x285   : > { %2699 = vmatmul.mubr.bf16.gmra.mrb[20].mxu0 %v1987_v53  ;;  %v1965_v57 = vld [vmem:[#allocation5 + $0x38] sm:$0xff]  ;;  %v1574_v59 = vrot.slane %v1572_v49, 4  ;;  %v1577_v60 = vrot.slane %v1575_v50, 5  ;;  %v1479_v63 = vor.u32 %v1478_v56, %v1474_v55  ;;  %v3841_v1 = vld [vmem:[#allocation4 + $0x10] sm:$0x1f]   ;;  %v3836_v14 = vld [vmem:[#allocation12 + $0x138] sm:$0xff]  }
 0x286   : > { %2804 = vmatprep.mubr.bf16.mxu0 %v1965_v57  ;;  %v1267_v4 = vrot.slane %v1265_v61, 1  ;;  %v3842_v5 = vld [vmem:[#allocation4 + $0x18] sm:$0x1e]   ;;  %3430 = vmatpush3.bf16.msra.mxu1 %v3823_v54  ;;  %v1985_v6 = vld [vmem:[#allocation5 + $0xd8] sm:$0xff]  ;;  %v1356_v8 = vshrl.u32 %v3841_v1, 16  ;;  %v1359_v9 = vshll.u32 %v3841_v1, 16 }
 0x287   : > { %v1578_v2 = vor.u32 %v1577_v60, %v1574_v59  ;;  %1481 = vst [vmem:[#allocation5 + $0x80] sm:$0xf] %v1479_v63  ;;  %3431 = vmatprep.subr.bf16.mxu1 %v3827_v58  ;;  %v1963_v10 = vld [vmem:[#allocation5 + $0x28] sm:$0xff]  ;;  %v1461_v12 = vrot.slane %v3842_v5, 1  ;;  %v1464_v0 = vld [vmem:[#allocation4 + $0x20] sm:$0xf] }
 0x288   : > { %v1268_v11 = vor.u32 %v1267_v4, %v1263_v3  ;;  %v1358_v15 = vrot.slane %v1356_v8, 4  ;;  %v1361_v16 = vrot.slane %v1359_v9, 5  ;;  %v1964_v17 = vld [vmem:[#allocation5 + $0x30] sm:$0xff]  ;;  %v1555_v19 = vrot.slane %v3843_v13, 5  ;;  %1465 = vst [vmem:[#allocation5 + $0x78] sm:$0xf] %v1464_v0 }
 0x289   : > { %1580 = vst [vmem:[#allocation5 + $0x80] sm:$0xf0] %v1578_v2  ;;  %v3839_v18 = vld [vmem:[#allocation12 + $0x200] sm:$0xff]   ;;  %1463 = vst [vmem:[#allocation5 + $0x70] sm:$0xf] %v1461_v12  ;;  %v3845_v45 = vld [vmem:[#allocation12 + $0x208] sm:$0xff]  }
 0x28a   : > { %1270 = vst [vmem:[#allocation5 + $0x20] sm:$0xf] %v1268_v11  ;;  %v3844_v20 = vld [vmem:[#allocation4 + $0x28] ss:$0 sps:$4 sm:$0xff]   ;;  %3432 = vmatpush3.bf16.msra.mxu1 %v3830_v62  ;;  %v1362_v21 = vor.u32 %v1361_v16, %v1358_v15  ;;  %v3846_v22 = vld [vmem:[#allocation4 + $0x30] sm:$0x1f]  }
 0x28b   : > { %2634 = vmatmul.mubr.bf16.gmra.mrb[20].mxu1 %v1985_v6  ;;  %3433 = vmatprep.subr.bf16.mxu1 %v3834_v7  ;;  %1557 = vst [vmem:[#allocation5 + $0x70] sm:$0xf0] %v1555_v19  ;;  %1563 = vst [vmem:[#allocation5 + $0x78] sm:$0xf0] %v3844_v20  ;;  %v3847_v26 = vld [vmem:[#allocation4 + $0x38] sm:$0x1f]  }
 0x28c   : > { %2739 = vmatprep.mubr.bf16.mxu1 %v1963_v10  ;;  %1364 = vst [vmem:[#allocation5 + $0x20] sm:$0xf0] %v1362_v21  ;;  %v1657_v23 = vshrl.u32 %v3846_v22, 16  ;;  %v1659_v24 = vshll.u32 %v3846_v22, 16  ;;  %v3849_v32 = vld [vmem:[#allocation4 + $0x18] sm:$0x1f]  }
 0x28d   : > { %2805 = vmatmul.mubr.bf16.vlgmr.msra.gmra.mrb[24].mxu0 %v1964_v17  ;;  %v1755_v25 = vshrl.u32 %v3847_v26, 16  ;;  %v1758_v27 = vshll.u32 %v3847_v26, 16  ;;  %v1446_v30 = vshrl.u32 %v3849_v32, 16  ;;  %v1448_v31 = vshll.u32 %v3849_v32, 16  ;;  %v3850_v33 = vld [vmem:[#allocation4 + $0x20] sm:$0x1f]  }
 0x28e   : > { %3434 = vmatpush3.bf16.msra.mxu1 %v3836_v14  ;;  %v1661_v29 = vrot.slane %v1659_v24, 1  ;;  %v1539_v38 = vshrl.u32 %v3850_v33, 16  ;;  %v1542_v39 = vshll.u32 %v3850_v33, 16  ;;  %v3851_v40 = vld [vmem:[#allocation4 + $0x28] sm:$0x1e]   ;;  %v3848_v53 = vld [vmem:[#allocation12 + $0x210] sm:$0xff]  }
 0x28f   : > { %3537 = vmatprep.subr.bf16.mxu1 %v3839_v18  ;;  %v1757_v34 = vrot.slane %v1755_v25, 4  ;;  %v1760_v35 = vrot.slane %v1758_v27, 5  ;;  %v1450_v37 = vrot.slane %v1448_v31, 1  ;;  %v3852_v42 = vld [vmem:[#allocation4 + $0x30] sm:$0x1e]   ;;  %v1644_v49 = vrot.slane %v3851_v40, 1 }
 0x290   : > { %v1974_v28 = vld [vmem:[#allocation5 + $0x80] sm:$0xff]  ;;  %v1662_v36 = vor.u32 %v1661_v29, %v1657_v23  ;;  %v1541_v47 = vrot.slane %v1539_v38, 4  ;;  %v1544_v48 = vrot.slane %v1542_v39, 5  ;;  %v1738_v51 = vrot.slane %v3852_v42, 5  ;;  %v3853_v55 = vld [vmem:[#allocation4 + $0x38] ss:$0 sps:$4 sm:$0xff]  }
 0x291   : > { %2812 = vmatprep.mubr.bf16.mxu0 %v1974_v28  ;;  %v1761_v41 = vor.u32 %v1760_v35, %v1757_v34  ;;  %v1451_v46 = vor.u32 %v1450_v37, %v1446_v30  ;;  %v1647_v52 = vld [vmem:[#allocation4 + $0x30] sm:$0xf]  ;;  %1646 = vst [vmem:[#allocation5 + $0xb8] sm:$0xf] %v1644_v49  ;;  %v3855_v56 = vld [vmem:[#allocation4 + $0x40] sm:$0x1f]  }
 0x292   : > { %v1972_v43 = vld [vmem:[#allocation5 + $0x70] sm:$0xff]  ;;  %v1973_v44 = vld [vmem:[#allocation5 + $0x78] sm:$0xff]  ;;  %1664 = vst [vmem:[#allocation5 + $0xc8] sm:$0xf] %v1662_v36  ;;  %v1545_v54 = vor.u32 %v1544_v48, %v1541_v47  ;;  %1648 = vst [vmem:[#allocation5 + $0xc0] sm:$0xf] %v1647_v52 }
 0x293   : > { %v1962_v50 = vld [vmem:[#allocation5 + $0x20] sm:$0xff]  ;;  %1763 = vst [vmem:[#allocation5 + $0xc8] sm:$0xf0] %v1761_v41  ;;  %1453 = vst [vmem:[#allocation5 + $0x68] sm:$0xf] %v1451_v46  ;;  %v1842_v58 = vshll.u32 %v3855_v56, 16 }
 0x294   : > { %2740 = vmatmul.mubr.bf16.vlgmr.msra.gmra.mrb[24].mxu1 %v1962_v50  ;;  %1740 = vst [vmem:[#allocation5 + $0xb8] sm:$0xf0] %v1738_v51  ;;  %1547 = vst [vmem:[#allocation5 + $0x68] sm:$0xf0] %v1545_v54  ;;  %v3858_v57 = vld [vmem:[#allocation4 + $0x28] sm:$0x1f]  }
 0x295   : > { %2813 = vmatmul.mubr.bf16.gmra.mrb[28].mxu0 %v1973_v44  ;;  %3538 = vmatpush3.bf16.msra.mxu1 %v3839_v18  ;;  %1746 = vst [vmem:[#allocation5 + $0xc0] sm:$0xf0] %v3853_v55  ;;  %v3859_v59 = vld [vmem:[#allocation4 + $0x30] sm:$0x1f]   ;;  %v1631_v60 = vshll.u32 %v3858_v57, 16  ;;  %v3854_v62 = vld [vmem:[#allocation12 + $0x218] sm:$0xff]  }
 0x296   : > { %2747 = vmatprep.mubr.bf16.mxu1 %v1972_v43  ;;  %3539 = vmatprep.subr.bf16.mxu1 %v3845_v45  ;;  %v3860_v61 = vld [vmem:[#allocation4 + $0x38] sm:$0x1e]   ;;  %v1840_v63 = vshrl.u32 %v3855_v56, 16  ;;  %v1844_v1 = vrot.slane %v1842_v58, 1  ;;  %v1722_v2 = vshrl.u32 %v3859_v59, 16  ;;  %v1725_v3 = vshll.u32 %v3859_v59, 16 }
 0x297   : > { %v1629_v5 = vshrl.u32 %v3858_v57, 16  ;;  %v1633_v6 = vrot.slane %v1631_v60, 1  ;;  %v1827_v7 = vrot.slane %v3860_v61, 1  ;;  %v3861_v11 = vld [vmem:[#allocation4 + $0x40] sm:$0x1e]   ;;  %v3863_v27 = vld [vmem:[#allocation12 + $0x228] sm:$0xff]  }
 0x298   : > { %v1845_v8 = vor.u32 %v1844_v1, %v1840_v63  ;;  %v1724_v9 = vrot.slane %v1722_v2, 4  ;;  %v1727_v10 = vrot.slane %v1725_v3, 5  ;;  %v1830_v12 = vld [vmem:[#allocation4 + $0x40] sm:$0xf]  ;;  %v1921_v18 = vrot.slane %v3861_v11, 5  ;;  %v3864_v41 = vld [vmem:[#allocation12 + $0x230] sm:$0xff]  }
 0x299   : > { %3540 = vmatpush3.bf16.msra.mxu1 %v3845_v45  ;;  %v3857_v14 = vld [vmem:[#allocation12 + $0x220] sm:$0xff]   ;;  %v1634_v15 = vor.u32 %v1633_v6, %v1629_v5  ;;  %1829 = vst [vmem:[#allocation5 + $0x100] sm:$0xf] %v1827_v7  ;;  %1831 = vst [vmem:[#allocation5 + $0x108] sm:$0xf] %v1830_v12  ;;  %v3869_v48 = vld [vmem:[#allocation12 + $0x238] sm:$0xff]  }
 0x29a   : > { %v1983_v4 = vld [vmem:[#allocation5 + $0xc8] sm:$0xff]  ;;  %3541 = vmatprep.subr.bf16.mxu1 %v3848_v53  ;;  %1847 = vst [vmem:[#allocation5 + $0x110] sm:$0xf] %v1845_v8  ;;  %v1728_v17 = vor.u32 %v1727_v10, %v1724_v9  ;;  %v3866_v20 = vld [vmem:[#allocation4 + $0x40] sm:$0x1f]  }
 0x29b   : > { %2820 = vmatprep.mubr.bf16.mxu0 %v1983_v4  ;;  %v1981_v13 = vld [vmem:[#allocation5 + $0xb8] sm:$0xff]  ;;  %v1971_v16 = vld [vmem:[#allocation5 + $0x68] sm:$0xff]  ;;  %1636 = vst [vmem:[#allocation5 + $0xb0] sm:$0xf] %v1634_v15  ;;  %1923 = vst [vmem:[#allocation5 + $0x100] sm:$0xf0] %v1921_v18 }
 0x29c   : > { %v1982_v0 = vld [vmem:[#allocation5 + $0xc0] sm:$0xff]  ;;  %v3865_v19 = vld [vmem:[#allocation4 + $0x38] sm:$0x1f]   ;;  %2748 = vmatmul.mubr.bf16.gmra.mrb[28].mxu1 %v1971_v16  ;;  %1730 = vst [vmem:[#allocation5 + $0xb0] sm:$0xf0] %v1728_v17  ;;  %v1905_v22 = vshrl.u32 %v3866_v20, 16 }
 0x29d   : > { %3542 = vmatpush3.bf16.msra.mxu1 %v3848_v53  ;;  %2821 = vmatmul.mubr.bf16.gmra.mrb[32].mxu0 %v1982_v0  ;;  %v1814_v21 = vshll.u32 %v3865_v19, 16  ;;  %v1908_v26 = vshll.u32 %v3866_v20, 16  ;;  %v3867_v23 = vld [vmem:[#allocation4 + $0x10] sm:$0x1e]   ;;  %v1812_v24 = vshrl.u32 %v3865_v19, 16 }
 0x29e   : > { %2755 = vmatprep.mubr.bf16.mxu1 %v1981_v13  ;;  %3543 = vmatprep.subr.bf16.mxu1 %v3854_v62  ;;  %v3868_v25 = vld [vmem:[#allocation4 + $0x18] sm:$0x1e]   ;;  %v1907_v28 = vrot.slane %v1905_v22, 4  ;;  %v1306_v30 = vrot.slane %v3867_v23, 1  ;;  %v3870_v34 = vld [vmem:[#allocation4 + $0x20] sm:$0x1e]  }
 0x29f   : > { %v1816_v32 = vrot.slane %v1814_v21, 1  ;;  %v1910_v29 = vrot.slane %v1908_v26, 5  ;;  %v1405_v33 = vrot.slane %v3868_v25, 5  ;;  %v1489_v38 = vrot.slane %v3870_v34, 1  ;;  %v3871_v39 = vld [vmem:[#allocation4 + $0x28] sm:$0x1e]  }
 0x2a0   : > { %1308 = vst [vmem:[#allocation5 + $0x40] sm:$0xf] %v1306_v30  ;;  %v1991_v37 = vld [vmem:[#allocation5 + $0x108] sm:$0xff]  ;;  %v1588_v43 = vrot.slane %v3871_v39, 5  ;;  %v3872_v44 = vld [vmem:[#allocation4 + $0x30] sm:$0x1e]  }
 0x2a1   : > { %3544 = vmatpush3.bf16.msra.mxu1 %v3854_v62  ;;  %v1817_v31 = vor.u32 %v1816_v32, %v1812_v24  ;;  %v1992_v35 = vld [vmem:[#allocation5 + $0x110] sm:$0xff]  ;;  %v1911_v36 = vor.u32 %v1910_v29, %v1907_v28  ;;  %1407 = vst [vmem:[#allocation5 + $0x40] sm:$0xf0] %v1405_v33  ;;  %1491 = vst [vmem:[#allocation5 + $0x88] sm:$0xf] %v1489_v38  ;;  %v1672_v46 = vrot.slane %v3872_v44, 1 }
 0x2a2   : > { %3545 = vmatprep.subr.bf16.mxu1 %v3857_v14  ;;  %2828 = vmatprep.mubr.bf16.mxu0 %v1992_v35  ;;  %v1990_v42 = vld [vmem:[#allocation5 + $0x100] sm:$0xff]  ;;  %v3873_v45 = vld [vmem:[#allocation4 + $0x38] sm:$0x1e]   ;;  %1590 = vst [vmem:[#allocation5 + $0x88] sm:$0xf0] %v1588_v43 }
 0x2a3   : > { %1819 = vst [vmem:[#allocation5 + $0xf8] sm:$0xf] %v1817_v31  ;;  %v1980_v40 = vld [vmem:[#allocation5 + $0xb0] sm:$0xff]  ;;  %1913 = vst [vmem:[#allocation5 + $0xf8] sm:$0xf0] %v1911_v36  ;;  %v1771_v49 = vrot.slane %v3873_v45, 5 }
 0x2a4   : > { %2756 = vmatmul.mubr.bf16.gmra.mrb[32].mxu1 %v1980_v40  ;;  %v3874_v47 = vld [vmem:[#allocation4 + $0x40] sm:$0x1e]   ;;  %1674 = vst [vmem:[#allocation5 + $0xd0] sm:$0xf] %v1672_v46 }
 0x2a5   : > { %3546 = vmatpush3.bf16.msra.mxu1 %v3857_v14  ;;  %2829 = vmatmul.mubr.bf16.gmra.mrb[36].mxu0 %v1991_v37  ;;  %v1855_v50 = vrot.slane %v3874_v47, 1  ;;  %1773 = vst [vmem:[#allocation5 + $0xd0] sm:$0xf0] %v1771_v49  ;;  %v3244_v1 = vld [vmem:[#allocation14] ss:$0 sm:$0xff] }
 0x2a6   : > { %3547 = vmatprep.subr.bf16.mxu1 %v3863_v27  ;;  %2763 = vmatprep.mubr.bf16.mxu1 %v1990_v42 }
 0x2a7   : > { %1857 = vst [vmem:[#allocation5 + $0x118] sm:$0xf] %v1855_v50 }
 0x2a8   : > { %v1966_v52 = vld [vmem:[#allocation5 + $0x40] sm:$0xff] }
 0x2a9   : > { %3548 = vmatpush3.bf16.msra.mxu1 %v3863_v27  ;;  %v1975_v53 = vld [vmem:[#allocation5 + $0x88] sm:$0xff] }
 0x2aa   : > { %3549 = vmatprep.subr.bf16.mxu1 %v3864_v41  ;;  %v1989_v51 = vld [vmem:[#allocation5 + $0xf8] sm:$0xff] }
 0x2ac   : > { %2764 = vmatmul.mubr.bf16.gmra.mrb[36].mxu1 %v1989_v51  ;;  %v1984_v54 = vld [vmem:[#allocation5 + $0xd0] sm:$0xff] }
 0x2ad   : > { %3550 = vmatpush3.bf16.msra.mxu1 %v3864_v41  ;;  %3553 = vmatprep.mubr.bf16.mxu1 %v1966_v52 }
 0x2ae   : > { %3551 = vmatprep.subr.bf16.mxu1 %v3869_v48  ;;  %v1993_v55 = vld [vmem:[#allocation5 + $0x118] sm:$0xff] }
 0x2b1   : > { %3552 = vmatpush3.bf16.msra.mxu1 %v3869_v48 }
 0x2b4   : > { %3554 = vmatmul.mubr.bf16.vlgmr.msra.gmra.mrb[0].mxu1 %v1975_v53 }
 0x2b5   : > { %3557 = vmatprep.mubr.bf16.mxu1 %v1984_v54 }
 0x2bc   : > { %3558 = vmatmul.mubr.bf16.gmra.mrb[4].mxu1 %v1993_v55 }
 0x337   : > { %v3395_v56 = vpop.f32.mrb[8].mxu0 }
 0x338   : > { %v3396_v57 = vpop.f32.mrb[9].mxu0 }
 0x339   : > { %v3397_v58 = vadd.f32 %v3396_v57, %v3395_v56  ;;  %v3398_v59 = vpop.f32.mrb[10].mxu0 }
 0x33a   : > { %v3399_v60 = vpop.f32.mrb[11].mxu0 }
 0x33b   : > { %v3400_v61 = vadd.f32 %v3399_v60, %v3398_v59 }
 0x343   : > { %v3355_v62 = vpop.f32.mrb[8].mxu1 }
 0x344   : > { %v3356_v2 = vpop.f32.mrb[9].mxu1 }
 0x345   : > { %v3401_v63 = vpop.f32.mrb[12].mxu0  ;;  %v3357_v4 = vadd.f32 %v3356_v2, %v3355_v62  ;;  %v3358_v5 = vpop.f32.mrb[10].mxu1 }
 0x346   : > { %v3402_v3 = vpop.f32.mrb[13].mxu0  ;;  %v3359_v8 = vpop.f32.mrb[11].mxu1 }
 0x347   : > { %v3403_v6 = vadd.f32 %v3402_v3, %v3401_v63  ;;  %v3404_v7 = vpop.f32.mrb[14].mxu0  ;;  %v2612_v10 = vadd.f32 %v3357_v4, %v3244_v1  ;;  %v3360_v11 = vadd.f32 %v3359_v8, %v3358_v5 }
 0x348   : > { %v3405_v9 = vpop.f32.mrb[15].mxu0 }
 0x349   : > { %v3406_v12 = vadd.f32 %v3405_v9, %v3404_v7  ;;  %v2615_v13 = vadd.f32 %v3360_v11, %v3244_v1  ;;  %v2677_v14 = vadd.f32 %v3397_v58, %v2612_v10 }
 0x34b   : > { %v3361_v15 = vpop.f32.mrb[12].mxu1  ;;  %v2680_v16 = vadd.f32 %v3400_v61, %v2615_v13 }
 0x34c   : > { %v3362_v0 = vpop.f32.mrb[13].mxu1 }
 0x34d   : > { %v3363_v17 = vadd.f32 %v3362_v0, %v3361_v15  ;;  %v3364_v18 = vpop.f32.mrb[14].mxu1 }
 0x34e   : > { %v3407_v19 = vpop.f32.mrb[16].mxu0  ;;  %v3365_v20 = vpop.f32.mrb[15].mxu1 }
 0x34f   : > { %v3408_v21 = vpop.f32.mrb[17].mxu0  ;;  %v2620_v22 = vadd.f32 %v3363_v17, %v3244_v1  ;;  %v3366_v26 = vadd.f32 %v3365_v20, %v3364_v18 }
 0x350   : > { %v3409_v23 = vadd.f32 %v3408_v21, %v3407_v19  ;;  %v3410_v24 = vpop.f32.mrb[18].mxu0 }
 0x351   : > { %v3411_v32 = vpop.f32.mrb[19].mxu0  ;;  %v2623_v25 = vadd.f32 %v3366_v26, %v3244_v1  ;;  %v2685_v28 = vadd.f32 %v3403_v6, %v2620_v22 }
 0x352   : > { %v3412_v27 = vadd.f32 %v3411_v32, %v3410_v24 }
 0x353   : > { %v2688_v29 = vadd.f32 %v3406_v12, %v2623_v25 }
 0x356   : > { %v3367_v30 = vpop.f32.mrb[16].mxu1 }
 0x357   : > { %v3368_v31 = vpop.f32.mrb[17].mxu1 }
 0x358   : > { %v3369_v33 = vadd.f32 %v3368_v31, %v3367_v30  ;;  %v3370_v34 = vpop.f32.mrb[18].mxu1  ;;  %v3413_v35 = vpop.f32.mrb[20].mxu0 }
 0x359   : > { %v3371_v36 = vpop.f32.mrb[19].mxu1  ;;  %v3414_v37 = vpop.f32.mrb[21].mxu0 }
 0x35a   : > { %v2628_v38 = vadd.f32 %v3369_v33, %v3244_v1  ;;  %v3372_v39 = vadd.f32 %v3371_v36, %v3370_v34  ;;  %v3415_v40 = vadd.f32 %v3414_v37, %v3413_v35  ;;  %v3416_v41 = vpop.f32.mrb[22].mxu0 }
 0x35b   : > { %v3417_v42 = vpop.f32.mrb[23].mxu0 }
 0x35c   : > { %v2631_v43 = vadd.f32 %v3372_v39, %v3244_v1  ;;  %v3418_v44 = vadd.f32 %v3417_v42, %v3416_v41  ;;  %v2693_v45 = vadd.f32 %v3409_v23, %v2628_v38 }
 0x35e   : > { %v3373_v46 = vpop.f32.mrb[20].mxu1  ;;  %v2696_v47 = vadd.f32 %v3412_v27, %v2631_v43 }
 0x35f   : > { %v3374_v48 = vpop.f32.mrb[21].mxu1 }
 0x360   : > { %v3375_v49 = vadd.f32 %v3374_v48, %v3373_v46  ;;  %v3376_v50 = vpop.f32.mrb[22].mxu1  ;;  %v3475_v51 = vpop.f32.mrb[24].mxu0 }
 0x361   : > { %v3377_v52 = vpop.f32.mrb[23].mxu1  ;;  %v3476_v53 = vpop.f32.mrb[25].mxu0 }
 0x362   : > { %v2636_v54 = vadd.f32 %v3375_v49, %v3244_v1  ;;  %v3378_v55 = vadd.f32 %v3377_v52, %v3376_v50  ;;  %v3477_v56 = vadd.f32 %v3476_v53, %v3475_v51  ;;  %v3478_v57 = vpop.f32.mrb[26].mxu0 }
 0x363   : > { %v3479_v58 = vpop.f32.mrb[27].mxu0 }
 0x364   : > { %v2639_v59 = vadd.f32 %v3378_v55, %v3244_v1  ;;  %v3480_v60 = vadd.f32 %v3479_v58, %v3478_v57  ;;  %v2701_v61 = vadd.f32 %v3415_v40, %v2636_v54 }
 0x366   : > { %v2704_v62 = vadd.f32 %v3418_v44, %v2639_v59 }
 0x367   : > { %v3435_v2 = vpop.f32.mrb[24].mxu1 }
 0x368   : > { %v3481_v63 = vpop.f32.mrb[28].mxu0  ;;  %v3436_v4 = vpop.f32.mrb[25].mxu1 }
 0x369   : > { %v3482_v3 = vpop.f32.mrb[29].mxu0  ;;  %v3437_v7 = vadd.f32 %v3436_v4, %v3435_v2  ;;  %v3438_v8 = vpop.f32.mrb[26].mxu1 }
 0x36a   : > { %v3483_v5 = vadd.f32 %v3482_v3, %v3481_v63  ;;  %v3484_v6 = vpop.f32.mrb[30].mxu0  ;;  %v3439_v10 = vpop.f32.mrb[27].mxu1 }
 0x36b   : > { %v3485_v9 = vpop.f32.mrb[31].mxu0  ;;  %v2742_v12 = vadd.f32 %v3437_v7, %v2677_v14  ;;  %v3440_v13 = vadd.f32 %v3439_v10, %v3438_v8 }
 0x36c   : > { %v3486_v11 = vadd.f32 %v3485_v9, %v3484_v6 }
 0x36d   : > { %v2745_v15 = vadd.f32 %v3440_v13, %v2680_v16  ;;  %v2807_v0 = vadd.f32 %v3477_v56, %v2742_v12  ;;  %v3171_v56 = vld [vmem:[#allocation17] ss:$0 sm:$0xff] }
 0x36f   : > { %v2810_v17 = vadd.f32 %v3480_v60, %v2745_v15  ;;  %v3441_v1 = vpop.f32.mrb[28].mxu1  ;;  %v3563_v63 = vadd.f32 %v3171_v56, %v2807_v0 }
 0x370   : > { %v3487_v18 = vpop.f32.mrb[32].mxu0  ;;  %v3442_v19 = vpop.f32.mrb[29].mxu1 }
 0x371   : > { %v3488_v20 = vpop.f32.mrb[33].mxu0  ;;  %v3443_v21 = vadd.f32 %v3442_v19, %v3441_v1  ;;  %v3444_v22 = vpop.f32.mrb[30].mxu1  ;;  %v3567_v6 = vadd.f32 %v3171_v56, %v2810_v17 }
 0x372   : > { %v3489_v26 = vadd.f32 %v3488_v20, %v3487_v18  ;;  %v3490_v23 = vpop.f32.mrb[34].mxu0  ;;  %v3445_v24 = vpop.f32.mrb[31].mxu1 }
 0x373   : > { %v3491_v32 = vpop.f32.mrb[35].mxu0  ;;  %v2750_v25 = vadd.f32 %v3443_v21, %v2685_v28  ;;  %v3446_v27 = vadd.f32 %v3445_v24, %v3444_v22 }
 0x374   : > { %v3492_v30 = vadd.f32 %v3491_v32, %v3490_v23 }
 0x375   : > { %v2753_v31 = vadd.f32 %v3446_v27, %v2688_v29  ;;  %v2815_v33 = vadd.f32 %v3483_v5, %v2750_v25 }
 0x377   : > { %v2818_v34 = vadd.f32 %v3486_v11, %v2753_v31  ;;  %v3447_v16 = vpop.f32.mrb[32].mxu1  ;;  %v3561_v59 = vadd.f32 %v3171_v56, %v2815_v33 }
 0x378   : > { %v3493_v14 = vpop.f32.mrb[36].mxu0  ;;  %v3448_v36 = vpop.f32.mrb[33].mxu1 }
 0x379   : > { %v3494_v35 = vpop.f32.mrb[37].mxu0  ;;  %v3449_v39 = vadd.f32 %v3448_v36, %v3447_v16  ;;  %v3450_v40 = vpop.f32.mrb[34].mxu1 }
 0x37a   : > { %v3495_v37 = vadd.f32 %v3494_v35, %v3493_v14  ;;  %v3496_v38 = vpop.f32.mrb[38].mxu0  ;;  %v3451_v42 = vpop.f32.mrb[35].mxu1 }
 0x37b   : > { %v3497_v41 = vpop.f32.mrb[39].mxu0  ;;  %v2758_v44 = vadd.f32 %v3449_v39, %v2693_v45  ;;  %v3452_v46 = vadd.f32 %v3451_v42, %v3450_v40 }
 0x37c   : > { %v3498_v43 = vadd.f32 %v3497_v41, %v3496_v38 }
 0x37d   : > { %v2761_v28 = vadd.f32 %v3452_v46, %v2696_v47  ;;  %v2823_v48 = vadd.f32 %v3489_v26, %v2758_v44  ;;  %v3565_v47 = vadd.f32 %v3171_v56, %v2818_v34 }
 0x37f   : > { %v3453_v49 = vpop.f32.mrb[36].mxu1  ;;  %v2826_v29 = vadd.f32 %v3492_v30, %v2761_v28  ;;  %v3571_v15 = vadd.f32 %v3171_v56, %v2823_v48 }
 0x380   : > { %v3454_v50 = vpop.f32.mrb[37].mxu1 }
 0x381   : > { %v3455_v51 = vadd.f32 %v3454_v50, %v3453_v49  ;;  %v3456_v52 = vpop.f32.mrb[38].mxu1  ;;  %v3575_v20 = vadd.f32 %v3171_v56, %v2826_v29 }
 0x382   : > { %v3457_v53 = vpop.f32.mrb[39].mxu1 }
 0x383   : > { %v2766_v54 = vadd.f32 %v3455_v51, %v2701_v61  ;;  %v3458_v55 = vadd.f32 %v3457_v53, %v3456_v52 }
 0x385   : > { %v2769_v57 = vadd.f32 %v3458_v55, %v2704_v62  ;;  %v2831_v58 = vadd.f32 %v3495_v37, %v2766_v54 }
 0x387   : > { %v3555_v60 = vpop.f32.mrb[0].mxu1  ;;  %v2834_v2 = vadd.f32 %v3498_v43, %v2769_v57  ;;  %v3569_v12 = vadd.f32 %v3171_v56, %v2831_v58 }
 0x388   : > { %v3562_v45 = vadd.f32 %v3561_v59, %v3555_v60  ;;  %v2871_v3 = vpop.f32.mrb[1].mxu1 }
 0x389   : > { %v3564_v4 = vadd.f32 %v3563_v63, %v2871_v3  ;;  %v3556_v5 = vpop.f32.mrb[2].mxu1  ;;  %v3573_v17 = vadd.f32 %v3171_v56, %v2834_v2 }
 0x38a   : > { %v2912_v7 = vmax.f32 %v3562_v45, 0.0  ;;  %v3566_v8 = vadd.f32 %v3565_v47, %v3556_v5  ;;  %v2874_v9 = vpop.f32.mrb[3].mxu1 }
 0x38b   : > { %v2910_v10 = vmax.f32 %v3564_v4, 0.0  ;;  %v3568_v61 = vadd.f32 %v3567_v6, %v2874_v9 }
 0x38c   : > { %2920 = vst [vmem:[%s376_s16 + $0x10] sm:$0xff] %v2912_v7  ;;  %v2913_v62 = vmax.f32 %v3566_v8, 0.0 }
 0x38d   : > { %2918 = vst [vmem:[%s376_s16] sm:$0xff] %v2910_v10  ;;  %v2911_v11 = vmax.f32 %v3568_v61, 0.0 }
 0x38e   : > { %2921 = vst [vmem:[%s376_s16 + $0x18] sm:$0xff] %v2913_v62 }
 0x38f   : > { %2919 = vst [vmem:[%s376_s16 + $0x8] sm:$0xff] %v2911_v11  ;;  %v3559_v13 = vpop.f32.mrb[4].mxu1 }
 0x390   : > { %v3570_v0 = vadd.f32 %v3569_v12, %v3559_v13  ;;  %v2887_v1 = vpop.f32.mrb[5].mxu1 }
 0x391   : > { %v3572_v18 = vadd.f32 %v3571_v15, %v2887_v1  ;;  %v3560_v19 = vpop.f32.mrb[6].mxu1 }
 0x392   : > { %v2916_v21 = vmax.f32 %v3570_v0, 0.0  ;;  %v3574_v22 = vadd.f32 %v3573_v17, %v3560_v19  ;;  %v2890_v26 = vpop.f32.mrb[7].mxu1 }
 0x393   : > { %v2914_v23 = vmax.f32 %v3572_v18, 0.0  ;;  %v3576_v24 = vadd.f32 %v3575_v20, %v2890_v26 }
 0x394   : > { %2924 = vst [vmem:[%s376_s16 + $0x30] sm:$0xff] %v2916_v21  ;;  %v2917_v32 = vmax.f32 %v3574_v22, 0.0 }
 0x395   : > { %2922 = vst [vmem:[%s376_s16 + $0x20] sm:$0xff] %v2914_v23  ;;  %v2915_v25 = vmax.f32 %v3576_v24, 0.0 }
 0x396   : > { %2925 = vst [vmem:[%s376_s16 + $0x38] sm:$0xff] %v2917_v32 }
 0x397   : > { %2923 = vst [vmem:[%s376_s16 + $0x28] sm:$0xff] %v2915_v25 }
 0x398   : > { %4087 = shalt.err (!%p4084_p8)
}
 0x399   : > { %s4088_s18 = scalar_lea.hbm %s4656_s28, 1024  ;;  %s4092_s12 = scalar_lea.hbm %s4707_s7, 2048 }
 0x39a   : > { %p4089_p4 = scmp.ne.s32.totalorder %s4656_s28, %s4088_s18  ;;  %p4093_p0 = scmp.lt.u32.totalorder %s4656_s28, %s4707_s7 }
 0x39b   : > { %p4094_p6 = scmp.lt.u32.totalorder %s4092_s12, %s4088_s18  ;;  %p4096_p5 = scmp.lt.u32.totalorder %s4088_s18, %s4656_s28 }
 0x39c   : > { %p4090_p10 = pnand %p4089_p4, %p4736_p9 }
 0x39d   : > { %p4095_p7 = por %p4094_p6, %p4093_p0 }
 0x39e   : > { %p4091_p11 = pneg %p4090_p10 }
 0x39f   : > { %p4097_p12 = por %p4096_p5, %p4095_p7 }
 0x3a1   : > { %p4098_p13 = pnand %p4097_p12, %p4091_p11 }
 0x3a3   : > { %4101 = shalt.err (!%p4098_p13)
}
 0x3a4   : > { %s4169_s1 = smov 128   ;;  %s4170_s23 = smov 8  }
 0x3a5   : > { %3614 = dma.vmem_to_hbm [thread:$0]  (%p4736_p9), %s4651_s21, 1024, %s4656_s28, %s2927_s30, %s4169_s1, %s4169_s1, %s4170_s23  }
 0x3a6 PF: > { %s2955_s9 = sand.u32 1, %s4140_s24   ;;  %p4737_p1 = scmp.ne.s32.totalorder %s4721_s10, 0 }
 0x3a7   : > { %p4738_p3 = scmp.ge.s32.totalorder %s4152_s27, 2  ;;  %s2956_s29 = scalar_lea.sflag [#allocation8], %s2955_s9 }
 0x3a9   : > { %p3640_p2 = pnand %p4738_p3, %p4737_p1 }
 0x3ab   : > { %4135 = dma.done.wait (!%p3640_p2), %s2956_s29, 1024  }
 0x3ac   : > { %4137 = vsyncadd (!%p3640_p2), %s2956_s29, 4294966272  ;;  %p23_p8 = scmp.ge.s32.totalorder %s4393_s11, 4   ;;  %s4739_s24 = smov %s4144_s25 }
 0x3ad   : > { %s4740_s25 = smov %s4148_s26  ;;  %s4741_s26 = smov %s4404_s17 }
 0x3ae   : > { %s4742_s27 = smov %s4393_s11  ;;  %25 = sbr.rel (!%p23_p8) target bundleno = 10 (0xa), region = 134 }
 0x3b5   :  { %2961 = vsyncpa [#allocation7], 1 }
 0x3b6   :  { %2963 = vsyncpa [#allocation7 + $0x1], 1 }
 0x3b7   :  { %2964 = vsyncpa [#allocation10], 1 }
 0x3b8   :  { %2965 = vsyncpa [#allocation13], 1 }
 0x3b9   :  { %2966 = vsyncpa [#allocation16], 1 }
 0x3ba   :  { %2967 = vsyncpa [#allocation8], 1 }
 0x3bb   :  { %2969 = vsyncpa [#allocation8 + $0x1], 1 }

</bundles_post_ra>
